<compile_context>
chip_gen: v7x
topology: tpu7x:2x2x1
jax: 0.10.0
libtpu: 0.0.40
codegen_flags: <defaults>
</compile_context>

<pallas_src>
import functools

import jax
import jax.numpy as jnp
from jax import lax
from jax.experimental import pallas as pl
from jax.experimental.pallas import tpu as pltpu

_LPAD = 8  # sublane-aligned column offset of the padded-image interior inside scratch


# ----------------------------------------------------------------------------
# In-kernel helpers
# ----------------------------------------------------------------------------
def _reflect_pad_into(pad_ref, img, H, W):
    """Write a 1-pixel reflection-padded copy of `img` (H, W, C) into `pad_ref`.

    pad_ref: VMEM scratch of shape (H + 2, >= _LPAD + W + 1, C).
    Padded rows occupy [0, H + 2); padded columns occupy [_LPAD - 1, _LPAD + W + 1),
    i.e. the interior starts at column _LPAD so the big stores are sublane-aligned.
    """
    c0 = _LPAD
    # Rows (reflection along H): pad row 0 <- img row 1, pad row H+1 <- img row H-2.
    pad_ref[1:H + 1, c0:c0 + W, :] = img
    pad_ref[0:1, c0:c0 + W, :] = img[1:2, :, :]
    pad_ref[H + 1:H + 2, c0:c0 + W, :] = img[H - 2:H - 1, :, :]
    # Columns (reflection along W); corners reflect the already-padded rows, which
    # reproduces PyTorch ReflectionPad2d corner behaviour (pad[0,0] = x[1,1], ...).
    pad_ref[:, c0 - 1:c0, :] = pad_ref[:, c0 + 1:c0 + 2, :]
    pad_ref[:, c0 + W:c0 + W + 1, :] = pad_ref[:, c0 + W - 2:c0 + W - 1, :]


def _fused_block_kernel(x_ref, wr_ref, br_ref, w1_ref, b1_ref, w2_ref, b2_ref,
                        out_ref, xpad_ref, y1pad_ref, *, H, W, Cin, Cout):
    """One batch element: residual conv, conv1+lrelu, conv2+lrelu, add — all fused.

    x_ref:   (1, H, W, Cin)      input block (VMEM, pipelined over the batch grid)
    w*_ref:  (9, Cin|Cout, Cout) tap-major conv weights (k = dy*3 + dx)
    b*_ref:  (1, Cout)           biases
    out_ref: (1, H, W, Cout)     output block
    xpad_ref / y1pad_ref: VMEM scratch holding the reflection-padded activations.
    """
    M = H * W
    c0 = _LPAD

    # ---- stage 0: reflection-pad x into VMEM scratch (no HBM padding pass) ----
    x_img = x_ref[...].reshape(H, W, Cin)
    _reflect_pad_into(xpad_ref, x_img, H, W)

    # ---- stage 1: residual conv and conv1 share the nine shifted patches ----
    acc_r = jnp.broadcast_to(br_ref[...], (M, Cout)).astype(jnp.float32)  # bias init
    acc_1 = jnp.broadcast_to(b1_ref[...], (M, Cout)).astype(jnp.float32)
    for k in range(9):
        dy, dx = divmod(k, 3)
        patch = xpad_ref[dy:dy + H, c0 - 1 + dx:c0 - 1 + dx + W, :].reshape(M, Cin)
        acc_r = acc_r + jnp.dot(patch, wr_ref[k], preferred_element_type=jnp.float32)
        acc_1 = acc_1 + jnp.dot(patch, w1_ref[k], preferred_element_type=jnp.float32)
    y1 = jnp.where(acc_1 >= 0.0, acc_1, 0.2 * acc_1)          # LeakyReLU(0.2)
    # NOTE: the residual branch has NO activation (matches PyTorch model_residual).

    # ---- stage 2: reflection-pad y1 (VMEM only), conv2 + LeakyReLU + residual ----
    _reflect_pad_into(y1pad_ref, y1.reshape(H, W, Cout), H, W)
    acc_2 = jnp.broadcast_to(b2_ref[...], (M, Cout)).astype(jnp.float32)
    for k in range(9):
        dy, dx = divmod(k, 3)
        patch = y1pad_ref[dy:dy + H, c0 - 1 + dx:c0 - 1 + dx + W, :].reshape(M, Cout)
        acc_2 = acc_2 + jnp.dot(patch, w2_ref[k], preferred_element_type=jnp.float32)
    y2 = jnp.where(acc_2 >= 0.0, acc_2, 0.2 * acc_2)

    out_ref[...] = (y2 + acc_r).reshape(1, H, W, Cout).astype(out_ref.dtype)


# ----------------------------------------------------------------------------
# JAX wrapper (layout glue + pallas_call plumbing)
# ----------------------------------------------------------------------------
def _oihw_to_taps(w_oihw):
    """(Cout, Cin, 3, 3) -> (9, Cin, Cout), tap index k = dy*3 + dx."""
    cout, cin = w_oihw.shape[0], w_oihw.shape[1]
    return jnp.transpose(w_oihw, (2, 3, 1, 0)).reshape(9, cin, cout)


@jax.jit
def dis_res_down_block(x_nchw, params):
    """Full forward. Takes/returns NCHW to match the PyTorch module."""
    # TODO(synk): fold the NCHW<->NHWC layout change into producer/consumer layers.
    x = jnp.transpose(x_nchw, (0, 2, 3, 1)).astype(jnp.float32)   # NCHW -> NHWC
    N, H, W, Cin = x.shape

    w_r = _oihw_to_taps(params["w_r"]).astype(jnp.float32)
    w_1 = _oihw_to_taps(params["w1"]).astype(jnp.float32)
    w_2 = _oihw_to_taps(params["w2"]).astype(jnp.float32)
    Cout = w_r.shape[-1]
    b_r = params["b_r"].reshape(1, Cout).astype(jnp.float32)
    b_1 = params["b1"].reshape(1, Cout).astype(jnp.float32)
    b_2 = params["b2"].reshape(1, Cout).astype(jnp.float32)

    kern = functools.partial(_fused_block_kernel, H=H, W=W, Cin=Cin, Cout=Cout)
    wp = _LPAD + W + 8  # scratch width: interior at column _LPAD (sublane aligned)

    flops = 2 * N * H * W * 9 * (2 * Cin * Cout + Cout * Cout)
    bytes_accessed = 4 * (N * H * W * (Cin + Cout)
                          + 2 * 9 * Cin * Cout + 9 * Cout * Cout + 3 * Cout)

    out_nhwc = pl.pallas_call(
        kern,
        out_shape=jax.ShapeDtypeStruct((N, H, W, Cout), jnp.float32),
        grid_spec=pltpu.PrefetchScalarGridSpec(
            num_scalar_prefetch=0,
            grid=(N,),
            in_specs=[
                pl.BlockSpec((1, H, W, Cin), lambda n: (n, 0, 0, 0)),   # x (per batch)
                pl.BlockSpec((9, Cin, Cout), lambda n: (0, 0, 0)),      # W_r
                pl.BlockSpec((1, Cout), lambda n: (0, 0)),              # b_r
                pl.BlockSpec((9, Cin, Cout), lambda n: (0, 0, 0)),      # W_1
                pl.BlockSpec((1, Cout), lambda n: (0, 0)),              # b_1
                pl.BlockSpec((9, Cout, Cout), lambda n: (0, 0, 0)),     # W_2
                pl.BlockSpec((1, Cout), lambda n: (0, 0)),              # b_2
            ],
            out_specs=pl.BlockSpec((1, H, W, Cout), lambda n: (n, 0, 0, 0)),
            scratch_shapes=[
                pltpu.VMEM((H + 2, wp, Cin), jnp.float32),    # padded x
                pltpu.VMEM((H + 2, wp, Cout), jnp.float32),   # padded y1
            ],
        ),
        compiler_params=pltpu.CompilerParams(
            dimension_semantics=("parallel",),
            vmem_limit_bytes=32 * 1024 * 1024,
        ),
        cost_estimate=pl.CostEstimate(
            flops=flops, transcendentals=0, bytes_accessed=bytes_accessed),
    )(x, w_r, b_r, w_1, b_1, w_2, b_2)

    return jnp.transpose(out_nhwc, (0, 3, 1, 2))  # NHWC -> NCHW


# ----------------------------------------------------------------------------
# Pure-JAX reference (for correctness check only)
# ----------------------------------------------------------------------------
def _ref_forward(x_nchw, params):
    x = jnp.transpose(x_nchw, (0, 2, 3, 1)).astype(jnp.float32)

    def conv(x_nhwc, w_oihw, b, lrelu):
        xpad = jnp.pad(x_nhwc, ((0, 0), (1, 1), (1, 1), (0, 0)), mode="reflect")
        w = jnp.transpose(w_oihw, (2, 3, 1, 0))  # OIHW -> HWIO
        y = lax.conv_general_dilated(
            xpad, w, window_strides=(1, 1), padding="VALID",
            dimension_numbers=("NHWC", "HWIO", "NHWC"),
        ) + b.reshape(1, 1, 1, -1)
        return jnp.where(y >= 0.0, y, 0.2 * y) if lrelu else y

    res = conv(x, params["w_r"], params["b_r"], False)
    y1 = conv(x, params["w1"], params["b1"], True)
    y2 = conv(y1, params["w2"], params["b2"], True)
    return jnp.transpose(y2 + res, (0, 3, 1, 2))


# ----------------------------------------------------------------------------
if __name__ == "__main__":
    N, Cin, Cout, H, W = 2, 4, 8, 16, 16

    key = jax.random.PRNGKey(0)
    ks = jax.random.split(key, 7)
    x = jax.random.normal(ks[0], (N, Cin, H, W), jnp.float32)

    # Deterministic synthetic parameters (PyTorch Conv2d shapes: OIHW weight, (Cout,) bias).
    params = {
        "w_r": 0.1 * jax.random.normal(ks[1], (Cout, Cin, 3, 3), jnp.float32),
        "b_r": 0.1 * jax.random.normal(ks[2], (Cout,), jnp.float32),
        "w1": 0.1 * jax.random.normal(ks[3], (Cout, Cin, 3, 3), jnp.float32),
        "b1": 0.1 * jax.random.normal(ks[4], (Cout,), jnp.float32),
        "w2": 0.1 * jax.random.normal(ks[5], (Cout, Cout, 3, 3), jnp.float32),
        "b2": 0.1 * jax.random.normal(ks[6], (Cout,), jnp.float32),
    }

    out = jax.block_until_ready(dis_res_down_block(x, params))
    ref = jax.block_until_ready(_ref_forward(x, params))

    assert out.shape == (N, Cout, H, W), out.shape
    assert jnp.allclose(out, ref, atol=1e-4, rtol=1e-4), float(jnp.max(jnp.abs(out - ref)))

    print("KERNEL_OK")
</pallas_src>

<mosaic_0001>
module attributes {stable_mosaic.version = 11 : i64} {
  func.func @_fused_block_kernel(%arg0: i32, %arg1: memref<1x16x16x4xf32, #tpu.memory_space<vmem>>, %arg2: memref<9x4x8xf32, #tpu.memory_space<vmem>>, %arg3: memref<1x8xf32, #tpu.memory_space<vmem>>, %arg4: memref<9x4x8xf32, #tpu.memory_space<vmem>>, %arg5: memref<1x8xf32, #tpu.memory_space<vmem>>, %arg6: memref<9x8x8xf32, #tpu.memory_space<vmem>>, %arg7: memref<1x8xf32, #tpu.memory_space<vmem>>, %arg8: memref<1x16x16x8xf32, #tpu.memory_space<vmem>>, %arg9: memref<18x32x4xf32, #tpu.memory_space<vmem>>, %arg10: memref<18x32x8xf32, #tpu.memory_space<vmem>>) attributes {dimension_semantics = [#tpu.dimension_semantics<parallel>], iteration_bounds = array<i64: 2>, scalar_prefetch = 0 : i64, scratch_operands = 2 : i64, tpu.core_type = #tpu.core_type<tc>, window_params = [{transform_indices = @transform_0, window_bounds = array<i64: 1, 16, 16, 4>}, {pipeline_mode = #tpu.pipeline_mode<synchronous>, transform_indices = @transform_1, window_bounds = array<i64: 9, 4, 8>}, {pipeline_mode = #tpu.pipeline_mode<synchronous>, transform_indices = @transform_2, window_bounds = array<i64: 1, 8>}, {pipeline_mode = #tpu.pipeline_mode<synchronous>, transform_indices = @transform_3, window_bounds = array<i64: 9, 4, 8>}, {pipeline_mode = #tpu.pipeline_mode<synchronous>, transform_indices = @transform_4, window_bounds = array<i64: 1, 8>}, {pipeline_mode = #tpu.pipeline_mode<synchronous>, transform_indices = @transform_5, window_bounds = array<i64: 9, 8, 8>}, {pipeline_mode = #tpu.pipeline_mode<synchronous>, transform_indices = @transform_6, window_bounds = array<i64: 1, 8>}, {transform_indices = @transform_7, window_bounds = array<i64: 1, 16, 16, 8>}]} {
    %c0 = arith.constant 0 : index
    %c0_0 = arith.constant 0 : index
    %c0_1 = arith.constant 0 : index
    %c0_2 = arith.constant 0 : index
    %0 = vector.load %arg1[%c0, %c0_0, %c0_1, %c0_2] : memref<1x16x16x4xf32, #tpu.memory_space<vmem>>, vector<1x16x16x4xf32>
    %1 = vector.shape_cast %0 : vector<1x16x16x4xf32> to vector<16x16x4xf32>
    %c1 = arith.constant 1 : index
    %c8 = arith.constant 8 : index
    %c0_3 = arith.constant 0 : index
    %2 = vector.load %arg9[%c1, %c8, %c0_3] : memref<18x32x4xf32, #tpu.memory_space<vmem>>, vector<16x16x4xf32>
    tpu.vector_store %arg9[%c1, %c8, %c0_3], %1 {strides = array<i32>} : memref<18x32x4xf32, #tpu.memory_space<vmem>>, vector<16x16x4xf32>,
    %3 = vector.extract_strided_slice %1 {offsets = [1, 0, 0], sizes = [1, 16, 4], strides = [1, 1, 1]} : vector<16x16x4xf32> to vector<1x16x4xf32>
    %c0_4 = arith.constant 0 : index
    %c8_5 = arith.constant 8 : index
    %c0_6 = arith.constant 0 : index
    %4 = vector.load %arg9[%c0_4, %c8_5, %c0_6] : memref<18x32x4xf32, #tpu.memory_space<vmem>>, vector<1x16x4xf32>
    tpu.vector_store %arg9[%c0_4, %c8_5, %c0_6], %3 {strides = array<i32>} : memref<18x32x4xf32, #tpu.memory_space<vmem>>, vector<1x16x4xf32>,
    %5 = vector.extract_strided_slice %1 {offsets = [14, 0, 0], sizes = [1, 16, 4], strides = [1, 1, 1]} : vector<16x16x4xf32> to vector<1x16x4xf32>
    %c17 = arith.constant 17 : index
    %c8_7 = arith.constant 8 : index
    %c0_8 = arith.constant 0 : index
    %6 = vector.load %arg9[%c17, %c8_7, %c0_8] : memref<18x32x4xf32, #tpu.memory_space<vmem>>, vector<1x16x4xf32>
    tpu.vector_store %arg9[%c17, %c8_7, %c0_8], %5 {strides = array<i32>} : memref<18x32x4xf32, #tpu.memory_space<vmem>>, vector<1x16x4xf32>,
    %c0_9 = arith.constant 0 : index
    %c9 = arith.constant 9 : index
    %c0_10 = arith.constant 0 : index
    %7 = vector.load %arg9[%c0_9, %c9, %c0_10] : memref<18x32x4xf32, #tpu.memory_space<vmem>>, vector<18x1x4xf32>
    %c0_11 = arith.constant 0 : index
    %c7 = arith.constant 7 : index
    %c0_12 = arith.constant 0 : index
    %8 = vector.load %arg9[%c0_11, %c7, %c0_12] : memref<18x32x4xf32, #tpu.memory_space<vmem>>, vector<18x1x4xf32>
    tpu.vector_store %arg9[%c0_11, %c7, %c0_12], %7 {strides = array<i32>} : memref<18x32x4xf32, #tpu.memory_space<vmem>>, vector<18x1x4xf32>,
    %c0_13 = arith.constant 0 : index
    %c22 = arith.constant 22 : index
    %c0_14 = arith.constant 0 : index
    %9 = vector.load %arg9[%c0_13, %c22, %c0_14] : memref<18x32x4xf32, #tpu.memory_space<vmem>>, vector<18x1x4xf32>
    %c0_15 = arith.constant 0 : index
    %c24 = arith.constant 24 : index
    %c0_16 = arith.constant 0 : index
    %10 = vector.load %arg9[%c0_15, %c24, %c0_16] : memref<18x32x4xf32, #tpu.memory_space<vmem>>, vector<18x1x4xf32>
    tpu.vector_store %arg9[%c0_15, %c24, %c0_16], %9 {strides = array<i32>} : memref<18x32x4xf32, #tpu.memory_space<vmem>>, vector<18x1x4xf32>,
    %c0_17 = arith.constant 0 : index
    %c0_18 = arith.constant 0 : index
    %11 = vector.load %arg3[%c0_17, %c0_18] : memref<1x8xf32, #tpu.memory_space<vmem>>, vector<1x8xf32>
    %12 = vector.shape_cast %11 : vector<1x8xf32> to vector<1x8xf32>
    %13 = vector.broadcast %12 : vector<1x8xf32> to vector<256x8xf32>
    %c0_19 = arith.constant 0 : index
    %c0_20 = arith.constant 0 : index
    %14 = vector.load %arg5[%c0_19, %c0_20] : memref<1x8xf32, #tpu.memory_space<vmem>>, vector<1x8xf32>
    %15 = vector.shape_cast %14 : vector<1x8xf32> to vector<1x8xf32>
    %16 = vector.broadcast %15 : vector<1x8xf32> to vector<256x8xf32>
    %c0_21 = arith.constant 0 : index
    %c7_22 = arith.constant 7 : index
    %c0_23 = arith.constant 0 : index
    %17 = vector.load %arg9[%c0_21, %c7_22, %c0_23] : memref<18x32x4xf32, #tpu.memory_space<vmem>>, vector<16x16x4xf32>
    %18 = vector.shape_cast %17 : vector<16x16x4xf32> to vector<256x4xf32>
    %c0_24 = arith.constant 0 : index
    %c0_25 = arith.constant 0 : index
    %c0_26 = arith.constant 0 : index
    %19 = vector.load %arg2[%c0_24, %c0_25, %c0_26] : memref<9x4x8xf32, #tpu.memory_space<vmem>>, vector<1x4x8xf32>
    %20 = vector.shape_cast %19 : vector<1x4x8xf32> to vector<4x8xf32>
    %cst = arith.constant dense<0.000000e+00> : vector<256x8xf32>
    %21 = tpu.matmul %18, %20, %cst {dimension_numbers = #tpu.dot_dimension_numbers<[1], [0], [0], [1], [0, 0, 1, 1], [], []>} : vector<256x4xf32>, vector<4x8xf32>, vector<256x8xf32> -> vector<256x8xf32>
    %22 = arith.addf %13, %21 : vector<256x8xf32>
    %c0_27 = arith.constant 0 : index
    %c0_28 = arith.constant 0 : index
    %c0_29 = arith.constant 0 : index
    %23 = vector.load %arg4[%c0_27, %c0_28, %c0_29] : memref<9x4x8xf32, #tpu.memory_space<vmem>>, vector<1x4x8xf32>
    %24 = vector.shape_cast %23 : vector<1x4x8xf32> to vector<4x8xf32>
    %cst_30 = arith.constant dense<0.000000e+00> : vector<256x8xf32>
    %25 = tpu.matmul %18, %24, %cst_30 {dimension_numbers = #tpu.dot_dimension_numbers<[1], [0], [0], [1], [0, 0, 1, 1], [], []>} : vector<256x4xf32>, vector<4x8xf32>, vector<256x8xf32> -> vector<256x8xf32>
    %26 = arith.addf %16, %25 : vector<256x8xf32>
    %c0_31 = arith.constant 0 : index
    %c8_32 = arith.constant 8 : index
    %c0_33 = arith.constant 0 : index
    %27 = vector.load %arg9[%c0_31, %c8_32, %c0_33] : memref<18x32x4xf32, #tpu.memory_space<vmem>>, vector<16x16x4xf32>
    %28 = vector.shape_cast %27 : vector<16x16x4xf32> to vector<256x4xf32>
    %c1_34 = arith.constant 1 : index
    %c0_35 = arith.constant 0 : index
    %c0_36 = arith.constant 0 : index
    %29 = vector.load %arg2[%c1_34, %c0_35, %c0_36] : memref<9x4x8xf32, #tpu.memory_space<vmem>>, vector<1x4x8xf32>
    %30 = vector.shape_cast %29 : vector<1x4x8xf32> to vector<4x8xf32>
    %cst_37 = arith.constant dense<0.000000e+00> : vector<256x8xf32>
    %31 = tpu.matmul %28, %30, %cst_37 {dimension_numbers = #tpu.dot_dimension_numbers<[1], [0], [0], [1], [0, 0, 1, 1], [], []>} : vector<256x4xf32>, vector<4x8xf32>, vector<256x8xf32> -> vector<256x8xf32>
    %32 = arith.addf %22, %31 : vector<256x8xf32>
    %c1_38 = arith.constant 1 : index
    %c0_39 = arith.constant 0 : index
    %c0_40 = arith.constant 0 : index
    %33 = vector.load %arg4[%c1_38, %c0_39, %c0_40] : memref<9x4x8xf32, #tpu.memory_space<vmem>>, vector<1x4x8xf32>
    %34 = vector.shape_cast %33 : vector<1x4x8xf32> to vector<4x8xf32>
    %cst_41 = arith.constant dense<0.000000e+00> : vector<256x8xf32>
    %35 = tpu.matmul %28, %34, %cst_41 {dimension_numbers = #tpu.dot_dimension_numbers<[1], [0], [0], [1], [0, 0, 1, 1], [], []>} : vector<256x4xf32>, vector<4x8xf32>, vector<256x8xf32> -> vector<256x8xf32>
    %36 = arith.addf %26, %35 : vector<256x8xf32>
    %c0_42 = arith.constant 0 : index
    %c9_43 = arith.constant 9 : index
    %c0_44 = arith.constant 0 : index
    %37 = vector.load %arg9[%c0_42, %c9_43, %c0_44] : memref<18x32x4xf32, #tpu.memory_space<vmem>>, vector<16x16x4xf32>
    %38 = vector.shape_cast %37 : vector<16x16x4xf32> to vector<256x4xf32>
    %c2 = arith.constant 2 : index
    %c0_45 = arith.constant 0 : index
    %c0_46 = arith.constant 0 : index
    %39 = vector.load %arg2[%c2, %c0_45, %c0_46] : memref<9x4x8xf32, #tpu.memory_space<vmem>>, vector<1x4x8xf32>
    %40 = vector.shape_cast %39 : vector<1x4x8xf32> to vector<4x8xf32>
    %cst_47 = arith.constant dense<0.000000e+00> : vector<256x8xf32>
    %41 = tpu.matmul %38, %40, %cst_47 {dimension_numbers = #tpu.dot_dimension_numbers<[1], [0], [0], [1], [0, 0, 1, 1], [], []>} : vector<256x4xf32>, vector<4x8xf32>, vector<256x8xf32> -> vector<256x8xf32>
    %42 = arith.addf %32, %41 : vector<256x8xf32>
    %c2_48 = arith.constant 2 : index
    %c0_49 = arith.constant 0 : index
    %c0_50 = arith.constant 0 : index
    %43 = vector.load %arg4[%c2_48, %c0_49, %c0_50] : memref<9x4x8xf32, #tpu.memory_space<vmem>>, vector<1x4x8xf32>
    %44 = vector.shape_cast %43 : vector<1x4x8xf32> to vector<4x8xf32>
    %cst_51 = arith.constant dense<0.000000e+00> : vector<256x8xf32>
    %45 = tpu.matmul %38, %44, %cst_51 {dimension_numbers = #tpu.dot_dimension_numbers<[1], [0], [0], [1], [0, 0, 1, 1], [], []>} : vector<256x4xf32>, vector<4x8xf32>, vector<256x8xf32> -> vector<256x8xf32>
    %46 = arith.addf %36, %45 : vector<256x8xf32>
    %c1_52 = arith.constant 1 : index
    %c7_53 = arith.constant 7 : index
    %c0_54 = arith.constant 0 : index
    %47 = vector.load %arg9[%c1_52, %c7_53, %c0_54] : memref<18x32x4xf32, #tpu.memory_space<vmem>>, vector<16x16x4xf32>
    %48 = vector.shape_cast %47 : vector<16x16x4xf32> to vector<256x4xf32>
    %c3 = arith.constant 3 : index
    %c0_55 = arith.constant 0 : index
    %c0_56 = arith.constant 0 : index
    %49 = vector.load %arg2[%c3, %c0_55, %c0_56] : memref<9x4x8xf32, #tpu.memory_space<vmem>>, vector<1x4x8xf32>
    %50 = vector.shape_cast %49 : vector<1x4x8xf32> to vector<4x8xf32>
    %cst_57 = arith.constant dense<0.000000e+00> : vector<256x8xf32>
    %51 = tpu.matmul %48, %50, %cst_57 {dimension_numbers = #tpu.dot_dimension_numbers<[1], [0], [0], [1], [0, 0, 1, 1], [], []>} : vector<256x4xf32>, vector<4x8xf32>, vector<256x8xf32> -> vector<256x8xf32>
    %52 = arith.addf %42, %51 : vector<256x8xf32>
    %c3_58 = arith.constant 3 : index
    %c0_59 = arith.constant 0 : index
    %c0_60 = arith.constant 0 : index
    %53 = vector.load %arg4[%c3_58, %c0_59, %c0_60] : memref<9x4x8xf32, #tpu.memory_space<vmem>>, vector<1x4x8xf32>
    %54 = vector.shape_cast %53 : vector<1x4x8xf32> to vector<4x8xf32>
    %cst_61 = arith.constant dense<0.000000e+00> : vector<256x8xf32>
    %55 = tpu.matmul %48, %54, %cst_61 {dimension_numbers = #tpu.dot_dimension_numbers<[1], [0], [0], [1], [0, 0, 1, 1], [], []>} : vector<256x4xf32>, vector<4x8xf32>, vector<256x8xf32> -> vector<256x8xf32>
    %56 = arith.addf %46, %55 : vector<256x8xf32>
    %c1_62 = arith.constant 1 : index
    %c8_63 = arith.constant 8 : index
    %c0_64 = arith.constant 0 : index
    %57 = vector.load %arg9[%c1_62, %c8_63, %c0_64] : memref<18x32x4xf32, #tpu.memory_space<vmem>>, vector<16x16x4xf32>
    %58 = vector.shape_cast %57 : vector<16x16x4xf32> to vector<256x4xf32>
    %c4 = arith.constant 4 : index
    %c0_65 = arith.constant 0 : index
    %c0_66 = arith.constant 0 : index
    %59 = vector.load %arg2[%c4, %c0_65, %c0_66] : memref<9x4x8xf32, #tpu.memory_space<vmem>>, vector<1x4x8xf32>
    %60 = vector.shape_cast %59 : vector<1x4x8xf32> to vector<4x8xf32>
    %cst_67 = arith.constant dense<0.000000e+00> : vector<256x8xf32>
    %61 = tpu.matmul %58, %60, %cst_67 {dimension_numbers = #tpu.dot_dimension_numbers<[1], [0], [0], [1], [0, 0, 1, 1], [], []>} : vector<256x4xf32>, vector<4x8xf32>, vector<256x8xf32> -> vector<256x8xf32>
    %62 = arith.addf %52, %61 : vector<256x8xf32>
    %c4_68 = arith.constant 4 : index
    %c0_69 = arith.constant 0 : index
    %c0_70 = arith.constant 0 : index
    %63 = vector.load %arg4[%c4_68, %c0_69, %c0_70] : memref<9x4x8xf32, #tpu.memory_space<vmem>>, vector<1x4x8xf32>
    %64 = vector.shape_cast %63 : vector<1x4x8xf32> to vector<4x8xf32>
    %cst_71 = arith.constant dense<0.000000e+00> : vector<256x8xf32>
    %65 = tpu.matmul %58, %64, %cst_71 {dimension_numbers = #tpu.dot_dimension_numbers<[1], [0], [0], [1], [0, 0, 1, 1], [], []>} : vector<256x4xf32>, vector<4x8xf32>, vector<256x8xf32> -> vector<256x8xf32>
    %66 = arith.addf %56, %65 : vector<256x8xf32>
    %c1_72 = arith.constant 1 : index
    %c9_73 = arith.constant 9 : index
    %c0_74 = arith.constant 0 : index
    %67 = vector.load %arg9[%c1_72, %c9_73, %c0_74] : memref<18x32x4xf32, #tpu.memory_space<vmem>>, vector<16x16x4xf32>
    %68 = vector.shape_cast %67 : vector<16x16x4xf32> to vector<256x4xf32>
    %c5 = arith.constant 5 : index
    %c0_75 = arith.constant 0 : index
    %c0_76 = arith.constant 0 : index
    %69 = vector.load %arg2[%c5, %c0_75, %c0_76] : memref<9x4x8xf32, #tpu.memory_space<vmem>>, vector<1x4x8xf32>
    %70 = vector.shape_cast %69 : vector<1x4x8xf32> to vector<4x8xf32>
    %cst_77 = arith.constant dense<0.000000e+00> : vector<256x8xf32>
    %71 = tpu.matmul %68, %70, %cst_77 {dimension_numbers = #tpu.dot_dimension_numbers<[1], [0], [0], [1], [0, 0, 1, 1], [], []>} : vector<256x4xf32>, vector<4x8xf32>, vector<256x8xf32> -> vector<256x8xf32>
    %72 = arith.addf %62, %71 : vector<256x8xf32>
    %c5_78 = arith.constant 5 : index
    %c0_79 = arith.constant 0 : index
    %c0_80 = arith.constant 0 : index
    %73 = vector.load %arg4[%c5_78, %c0_79, %c0_80] : memref<9x4x8xf32, #tpu.memory_space<vmem>>, vector<1x4x8xf32>
    %74 = vector.shape_cast %73 : vector<1x4x8xf32> to vector<4x8xf32>
    %cst_81 = arith.constant dense<0.000000e+00> : vector<256x8xf32>
    %75 = tpu.matmul %68, %74, %cst_81 {dimension_numbers = #tpu.dot_dimension_numbers<[1], [0], [0], [1], [0, 0, 1, 1], [], []>} : vector<256x4xf32>, vector<4x8xf32>, vector<256x8xf32> -> vector<256x8xf32>
    %76 = arith.addf %66, %75 : vector<256x8xf32>
    %c2_82 = arith.constant 2 : index
    %c7_83 = arith.constant 7 : index
    %c0_84 = arith.constant 0 : index
    %77 = vector.load %arg9[%c2_82, %c7_83, %c0_84] : memref<18x32x4xf32, #tpu.memory_space<vmem>>, vector<16x16x4xf32>
    %78 = vector.shape_cast %77 : vector<16x16x4xf32> to vector<256x4xf32>
    %c6 = arith.constant 6 : index
    %c0_85 = arith.constant 0 : index
    %c0_86 = arith.constant 0 : index
    %79 = vector.load %arg2[%c6, %c0_85, %c0_86] : memref<9x4x8xf32, #tpu.memory_space<vmem>>, vector<1x4x8xf32>
    %80 = vector.shape_cast %79 : vector<1x4x8xf32> to vector<4x8xf32>
    %cst_87 = arith.constant dense<0.000000e+00> : vector<256x8xf32>
    %81 = tpu.matmul %78, %80, %cst_87 {dimension_numbers = #tpu.dot_dimension_numbers<[1], [0], [0], [1], [0, 0, 1, 1], [], []>} : vector<256x4xf32>, vector<4x8xf32>, vector<256x8xf32> -> vector<256x8xf32>
    %82 = arith.addf %72, %81 : vector<256x8xf32>
    %c6_88 = arith.constant 6 : index
    %c0_89 = arith.constant 0 : index
    %c0_90 = arith.constant 0 : index
    %83 = vector.load %arg4[%c6_88, %c0_89, %c0_90] : memref<9x4x8xf32, #tpu.memory_space<vmem>>, vector<1x4x8xf32>
    %84 = vector.shape_cast %83 : vector<1x4x8xf32> to vector<4x8xf32>
    %cst_91 = arith.constant dense<0.000000e+00> : vector<256x8xf32>
    %85 = tpu.matmul %78, %84, %cst_91 {dimension_numbers = #tpu.dot_dimension_numbers<[1], [0], [0], [1], [0, 0, 1, 1], [], []>} : vector<256x4xf32>, vector<4x8xf32>, vector<256x8xf32> -> vector<256x8xf32>
    %86 = arith.addf %76, %85 : vector<256x8xf32>
    %c2_92 = arith.constant 2 : index
    %c8_93 = arith.constant 8 : index
    %c0_94 = arith.constant 0 : index
    %87 = vector.load %arg9[%c2_92, %c8_93, %c0_94] : memref<18x32x4xf32, #tpu.memory_space<vmem>>, vector<16x16x4xf32>
    %88 = vector.shape_cast %87 : vector<16x16x4xf32> to vector<256x4xf32>
    %c7_95 = arith.constant 7 : index
    %c0_96 = arith.constant 0 : index
    %c0_97 = arith.constant 0 : index
    %89 = vector.load %arg2[%c7_95, %c0_96, %c0_97] : memref<9x4x8xf32, #tpu.memory_space<vmem>>, vector<1x4x8xf32>
    %90 = vector.shape_cast %89 : vector<1x4x8xf32> to vector<4x8xf32>
    %cst_98 = arith.constant dense<0.000000e+00> : vector<256x8xf32>
    %91 = tpu.matmul %88, %90, %cst_98 {dimension_numbers = #tpu.dot_dimension_numbers<[1], [0], [0], [1], [0, 0, 1, 1], [], []>} : vector<256x4xf32>, vector<4x8xf32>, vector<256x8xf32> -> vector<256x8xf32>
    %92 = arith.addf %82, %91 : vector<256x8xf32>
    %c7_99 = arith.constant 7 : index
    %c0_100 = arith.constant 0 : index
    %c0_101 = arith.constant 0 : index
    %93 = vector.load %arg4[%c7_99, %c0_100, %c0_101] : memref<9x4x8xf32, #tpu.memory_space<vmem>>, vector<1x4x8xf32>
    %94 = vector.shape_cast %93 : vector<1x4x8xf32> to vector<4x8xf32>
    %cst_102 = arith.constant dense<0.000000e+00> : vector<256x8xf32>
    %95 = tpu.matmul %88, %94, %cst_102 {dimension_numbers = #tpu.dot_dimension_numbers<[1], [0], [0], [1], [0, 0, 1, 1], [], []>} : vector<256x4xf32>, vector<4x8xf32>, vector<256x8xf32> -> vector<256x8xf32>
    %96 = arith.addf %86, %95 : vector<256x8xf32>
    %c2_103 = arith.constant 2 : index
    %c9_104 = arith.constant 9 : index
    %c0_105 = arith.constant 0 : index
    %97 = vector.load %arg9[%c2_103, %c9_104, %c0_105] : memref<18x32x4xf32, #tpu.memory_space<vmem>>, vector<16x16x4xf32>
    %98 = vector.shape_cast %97 : vector<16x16x4xf32> to vector<256x4xf32>
    %c8_106 = arith.constant 8 : index
    %c0_107 = arith.constant 0 : index
    %c0_108 = arith.constant 0 : index
    %99 = vector.load %arg2[%c8_106, %c0_107, %c0_108] : memref<9x4x8xf32, #tpu.memory_space<vmem>>, vector<1x4x8xf32>
    %100 = vector.shape_cast %99 : vector<1x4x8xf32> to vector<4x8xf32>
    %cst_109 = arith.constant dense<0.000000e+00> : vector<256x8xf32>
    %101 = tpu.matmul %98, %100, %cst_109 {dimension_numbers = #tpu.dot_dimension_numbers<[1], [0], [0], [1], [0, 0, 1, 1], [], []>} : vector<256x4xf32>, vector<4x8xf32>, vector<256x8xf32> -> vector<256x8xf32>
    %102 = arith.addf %92, %101 : vector<256x8xf32>
    %c8_110 = arith.constant 8 : index
    %c0_111 = arith.constant 0 : index
    %c0_112 = arith.constant 0 : index
    %103 = vector.load %arg4[%c8_110, %c0_111, %c0_112] : memref<9x4x8xf32, #tpu.memory_space<vmem>>, vector<1x4x8xf32>
    %104 = vector.shape_cast %103 : vector<1x4x8xf32> to vector<4x8xf32>
    %cst_113 = arith.constant dense<0.000000e+00> : vector<256x8xf32>
    %105 = tpu.matmul %98, %104, %cst_113 {dimension_numbers = #tpu.dot_dimension_numbers<[1], [0], [0], [1], [0, 0, 1, 1], [], []>} : vector<256x4xf32>, vector<4x8xf32>, vector<256x8xf32> -> vector<256x8xf32>
    %106 = arith.addf %96, %105 : vector<256x8xf32>
    %cst_114 = arith.constant 0.000000e+00 : f32
    %107 = vector.broadcast %cst_114 : f32 to vector<256x8xf32>
    %108 = arith.cmpf oge, %106, %107 : vector<256x8xf32>
    %cst_115 = arith.constant 2.000000e-01 : f32
    %109 = vector.broadcast %cst_115 : f32 to vector<256x8xf32>
    %110 = arith.mulf %109, %106 : vector<256x8xf32>
    %111 = arith.select %108, %106, %110 : vector<256x8xi1>, vector<256x8xf32>
    %112 = vector.shape_cast %111 : vector<256x8xf32> to vector<16x16x8xf32>
    %c1_116 = arith.constant 1 : index
    %c8_117 = arith.constant 8 : index
    %c0_118 = arith.constant 0 : index
    %113 = vector.load %arg10[%c1_116, %c8_117, %c0_118] : memref<18x32x8xf32, #tpu.memory_space<vmem>>, vector<16x16x8xf32>
    tpu.vector_store %arg10[%c1_116, %c8_117, %c0_118], %112 {strides = array<i32>} : memref<18x32x8xf32, #tpu.memory_space<vmem>>, vector<16x16x8xf32>,
    %114 = vector.extract_strided_slice %112 {offsets = [1, 0, 0], sizes = [1, 16, 8], strides = [1, 1, 1]} : vector<16x16x8xf32> to vector<1x16x8xf32>
    %c0_119 = arith.constant 0 : index
    %c8_120 = arith.constant 8 : index
    %c0_121 = arith.constant 0 : index
    %115 = vector.load %arg10[%c0_119, %c8_120, %c0_121] : memref<18x32x8xf32, #tpu.memory_space<vmem>>, vector<1x16x8xf32>
    tpu.vector_store %arg10[%c0_119, %c8_120, %c0_121], %114 {strides = array<i32>} : memref<18x32x8xf32, #tpu.memory_space<vmem>>, vector<1x16x8xf32>,
    %116 = vector.extract_strided_slice %112 {offsets = [14, 0, 0], sizes = [1, 16, 8], strides = [1, 1, 1]} : vector<16x16x8xf32> to vector<1x16x8xf32>
    %c17_122 = arith.constant 17 : index
    %c8_123 = arith.constant 8 : index
    %c0_124 = arith.constant 0 : index
    %117 = vector.load %arg10[%c17_122, %c8_123, %c0_124] : memref<18x32x8xf32, #tpu.memory_space<vmem>>, vector<1x16x8xf32>
    tpu.vector_store %arg10[%c17_122, %c8_123, %c0_124], %116 {strides = array<i32>} : memref<18x32x8xf32, #tpu.memory_space<vmem>>, vector<1x16x8xf32>,
    %c0_125 = arith.constant 0 : index
    %c9_126 = arith.constant 9 : index
    %c0_127 = arith.constant 0 : index
    %118 = vector.load %arg10[%c0_125, %c9_126, %c0_127] : memref<18x32x8xf32, #tpu.memory_space<vmem>>, vector<18x1x8xf32>
    %c0_128 = arith.constant 0 : index
    %c7_129 = arith.constant 7 : index
    %c0_130 = arith.constant 0 : index
    %119 = vector.load %arg10[%c0_128, %c7_129, %c0_130] : memref<18x32x8xf32, #tpu.memory_space<vmem>>, vector<18x1x8xf32>
    tpu.vector_store %arg10[%c0_128, %c7_129, %c0_130], %118 {strides = array<i32>} : memref<18x32x8xf32, #tpu.memory_space<vmem>>, vector<18x1x8xf32>,
    %c0_131 = arith.constant 0 : index
    %c22_132 = arith.constant 22 : index
    %c0_133 = arith.constant 0 : index
    %120 = vector.load %arg10[%c0_131, %c22_132, %c0_133] : memref<18x32x8xf32, #tpu.memory_space<vmem>>, vector<18x1x8xf32>
    %c0_134 = arith.constant 0 : index
    %c24_135 = arith.constant 24 : index
    %c0_136 = arith.constant 0 : index
    %121 = vector.load %arg10[%c0_134, %c24_135, %c0_136] : memref<18x32x8xf32, #tpu.memory_space<vmem>>, vector<18x1x8xf32>
    tpu.vector_store %arg10[%c0_134, %c24_135, %c0_136], %120 {strides = array<i32>} : memref<18x32x8xf32, #tpu.memory_space<vmem>>, vector<18x1x8xf32>,
    %c0_137 = arith.constant 0 : index
    %c0_138 = arith.constant 0 : index
    %122 = vector.load %arg7[%c0_137, %c0_138] : memref<1x8xf32, #tpu.memory_space<vmem>>, vector<1x8xf32>
    %123 = vector.shape_cast %122 : vector<1x8xf32> to vector<1x8xf32>
    %124 = vector.broadcast %123 : vector<1x8xf32> to vector<256x8xf32>
    %c0_139 = arith.constant 0 : index
    %c7_140 = arith.constant 7 : index
    %c0_141 = arith.constant 0 : index
    %125 = vector.load %arg10[%c0_139, %c7_140, %c0_141] : memref<18x32x8xf32, #tpu.memory_space<vmem>>, vector<16x16x8xf32>
    %126 = vector.shape_cast %125 : vector<16x16x8xf32> to vector<256x8xf32>
    %c0_142 = arith.constant 0 : index
    %c0_143 = arith.constant 0 : index
    %c0_144 = arith.constant 0 : index
    %127 = vector.load %arg6[%c0_142, %c0_143, %c0_144] : memref<9x8x8xf32, #tpu.memory_space<vmem>>, vector<1x8x8xf32>
    %128 = vector.shape_cast %127 : vector<1x8x8xf32> to vector<8x8xf32>
    %cst_145 = arith.constant dense<0.000000e+00> : vector<256x8xf32>
    %129 = tpu.matmul %126, %128, %cst_145 {dimension_numbers = #tpu.dot_dimension_numbers<[1], [0], [0], [1], [0, 0, 1, 1], [], []>} : vector<256x8xf32>, vector<8x8xf32>, vector<256x8xf32> -> vector<256x8xf32>
    %130 = arith.addf %124, %129 : vector<256x8xf32>
    %c0_146 = arith.constant 0 : index
    %c8_147 = arith.constant 8 : index
    %c0_148 = arith.constant 0 : index
    %131 = vector.load %arg10[%c0_146, %c8_147, %c0_148] : memref<18x32x8xf32, #tpu.memory_space<vmem>>, vector<16x16x8xf32>
    %132 = vector.shape_cast %131 : vector<16x16x8xf32> to vector<256x8xf32>
    %c1_149 = arith.constant 1 : index
    %c0_150 = arith.constant 0 : index
    %c0_151 = arith.constant 0 : index
    %133 = vector.load %arg6[%c1_149, %c0_150, %c0_151] : memref<9x8x8xf32, #tpu.memory_space<vmem>>, vector<1x8x8xf32>
    %134 = vector.shape_cast %133 : vector<1x8x8xf32> to vector<8x8xf32>
    %cst_152 = arith.constant dense<0.000000e+00> : vector<256x8xf32>
    %135 = tpu.matmul %132, %134, %cst_152 {dimension_numbers = #tpu.dot_dimension_numbers<[1], [0], [0], [1], [0, 0, 1, 1], [], []>} : vector<256x8xf32>, vector<8x8xf32>, vector<256x8xf32> -> vector<256x8xf32>
    %136 = arith.addf %130, %135 : vector<256x8xf32>
    %c0_153 = arith.constant 0 : index
    %c9_154 = arith.constant 9 : index
    %c0_155 = arith.constant 0 : index
    %137 = vector.load %arg10[%c0_153, %c9_154, %c0_155] : memref<18x32x8xf32, #tpu.memory_space<vmem>>, vector<16x16x8xf32>
    %138 = vector.shape_cast %137 : vector<16x16x8xf32> to vector<256x8xf32>
    %c2_156 = arith.constant 2 : index
    %c0_157 = arith.constant 0 : index
    %c0_158 = arith.constant 0 : index
    %139 = vector.load %arg6[%c2_156, %c0_157, %c0_158] : memref<9x8x8xf32, #tpu.memory_space<vmem>>, vector<1x8x8xf32>
    %140 = vector.shape_cast %139 : vector<1x8x8xf32> to vector<8x8xf32>
    %cst_159 = arith.constant dense<0.000000e+00> : vector<256x8xf32>
    %141 = tpu.matmul %138, %140, %cst_159 {dimension_numbers = #tpu.dot_dimension_numbers<[1], [0], [0], [1], [0, 0, 1, 1], [], []>} : vector<256x8xf32>, vector<8x8xf32>, vector<256x8xf32> -> vector<256x8xf32>
    %142 = arith.addf %136, %141 : vector<256x8xf32>
    %c1_160 = arith.constant 1 : index
    %c7_161 = arith.constant 7 : index
    %c0_162 = arith.constant 0 : index
    %143 = vector.load %arg10[%c1_160, %c7_161, %c0_162] : memref<18x32x8xf32, #tpu.memory_space<vmem>>, vector<16x16x8xf32>
    %144 = vector.shape_cast %143 : vector<16x16x8xf32> to vector<256x8xf32>
    %c3_163 = arith.constant 3 : index
    %c0_164 = arith.constant 0 : index
    %c0_165 = arith.constant 0 : index
    %145 = vector.load %arg6[%c3_163, %c0_164, %c0_165] : memref<9x8x8xf32, #tpu.memory_space<vmem>>, vector<1x8x8xf32>
    %146 = vector.shape_cast %145 : vector<1x8x8xf32> to vector<8x8xf32>
    %cst_166 = arith.constant dense<0.000000e+00> : vector<256x8xf32>
    %147 = tpu.matmul %144, %146, %cst_166 {dimension_numbers = #tpu.dot_dimension_numbers<[1], [0], [0], [1], [0, 0, 1, 1], [], []>} : vector<256x8xf32>, vector<8x8xf32>, vector<256x8xf32> -> vector<256x8xf32>
    %148 = arith.addf %142, %147 : vector<256x8xf32>
    %c1_167 = arith.constant 1 : index
    %c8_168 = arith.constant 8 : index
    %c0_169 = arith.constant 0 : index
    %149 = vector.load %arg10[%c1_167, %c8_168, %c0_169] : memref<18x32x8xf32, #tpu.memory_space<vmem>>, vector<16x16x8xf32>
    %150 = vector.shape_cast %149 : vector<16x16x8xf32> to vector<256x8xf32>
    %c4_170 = arith.constant 4 : index
    %c0_171 = arith.constant 0 : index
    %c0_172 = arith.constant 0 : index
    %151 = vector.load %arg6[%c4_170, %c0_171, %c0_172] : memref<9x8x8xf32, #tpu.memory_space<vmem>>, vector<1x8x8xf32>
    %152 = vector.shape_cast %151 : vector<1x8x8xf32> to vector<8x8xf32>
    %cst_173 = arith.constant dense<0.000000e+00> : vector<256x8xf32>
    %153 = tpu.matmul %150, %152, %cst_173 {dimension_numbers = #tpu.dot_dimension_numbers<[1], [0], [0], [1], [0, 0, 1, 1], [], []>} : vector<256x8xf32>, vector<8x8xf32>, vector<256x8xf32> -> vector<256x8xf32>
    %154 = arith.addf %148, %153 : vector<256x8xf32>
    %c1_174 = arith.constant 1 : index
    %c9_175 = arith.constant 9 : index
    %c0_176 = arith.constant 0 : index
    %155 = vector.load %arg10[%c1_174, %c9_175, %c0_176] : memref<18x32x8xf32, #tpu.memory_space<vmem>>, vector<16x16x8xf32>
    %156 = vector.shape_cast %155 : vector<16x16x8xf32> to vector<256x8xf32>
    %c5_177 = arith.constant 5 : index
    %c0_178 = arith.constant 0 : index
    %c0_179 = arith.constant 0 : index
    %157 = vector.load %arg6[%c5_177, %c0_178, %c0_179] : memref<9x8x8xf32, #tpu.memory_space<vmem>>, vector<1x8x8xf32>
    %158 = vector.shape_cast %157 : vector<1x8x8xf32> to vector<8x8xf32>
    %cst_180 = arith.constant dense<0.000000e+00> : vector<256x8xf32>
    %159 = tpu.matmul %156, %158, %cst_180 {dimension_numbers = #tpu.dot_dimension_numbers<[1], [0], [0], [1], [0, 0, 1, 1], [], []>} : vector<256x8xf32>, vector<8x8xf32>, vector<256x8xf32> -> vector<256x8xf32>
    %160 = arith.addf %154, %159 : vector<256x8xf32>
    %c2_181 = arith.constant 2 : index
    %c7_182 = arith.constant 7 : index
    %c0_183 = arith.constant 0 : index
    %161 = vector.load %arg10[%c2_181, %c7_182, %c0_183] : memref<18x32x8xf32, #tpu.memory_space<vmem>>, vector<16x16x8xf32>
    %162 = vector.shape_cast %161 : vector<16x16x8xf32> to vector<256x8xf32>
    %c6_184 = arith.constant 6 : index
    %c0_185 = arith.constant 0 : index
    %c0_186 = arith.constant 0 : index
    %163 = vector.load %arg6[%c6_184, %c0_185, %c0_186] : memref<9x8x8xf32, #tpu.memory_space<vmem>>, vector<1x8x8xf32>
    %164 = vector.shape_cast %163 : vector<1x8x8xf32> to vector<8x8xf32>
    %cst_187 = arith.constant dense<0.000000e+00> : vector<256x8xf32>
    %165 = tpu.matmul %162, %164, %cst_187 {dimension_numbers = #tpu.dot_dimension_numbers<[1], [0], [0], [1], [0, 0, 1, 1], [], []>} : vector<256x8xf32>, vector<8x8xf32>, vector<256x8xf32> -> vector<256x8xf32>
    %166 = arith.addf %160, %165 : vector<256x8xf32>
    %c2_188 = arith.constant 2 : index
    %c8_189 = arith.constant 8 : index
    %c0_190 = arith.constant 0 : index
    %167 = vector.load %arg10[%c2_188, %c8_189, %c0_190] : memref<18x32x8xf32, #tpu.memory_space<vmem>>, vector<16x16x8xf32>
    %168 = vector.shape_cast %167 : vector<16x16x8xf32> to vector<256x8xf32>
    %c7_191 = arith.constant 7 : index
    %c0_192 = arith.constant 0 : index
    %c0_193 = arith.constant 0 : index
    %169 = vector.load %arg6[%c7_191, %c0_192, %c0_193] : memref<9x8x8xf32, #tpu.memory_space<vmem>>, vector<1x8x8xf32>
    %170 = vector.shape_cast %169 : vector<1x8x8xf32> to vector<8x8xf32>
    %cst_194 = arith.constant dense<0.000000e+00> : vector<256x8xf32>
    %171 = tpu.matmul %168, %170, %cst_194 {dimension_numbers = #tpu.dot_dimension_numbers<[1], [0], [0], [1], [0, 0, 1, 1], [], []>} : vector<256x8xf32>, vector<8x8xf32>, vector<256x8xf32> -> vector<256x8xf32>
    %172 = arith.addf %166, %171 : vector<256x8xf32>
    %c2_195 = arith.constant 2 : index
    %c9_196 = arith.constant 9 : index
    %c0_197 = arith.constant 0 : index
    %173 = vector.load %arg10[%c2_195, %c9_196, %c0_197] : memref<18x32x8xf32, #tpu.memory_space<vmem>>, vector<16x16x8xf32>
    %174 = vector.shape_cast %173 : vector<16x16x8xf32> to vector<256x8xf32>
    %c8_198 = arith.constant 8 : index
    %c0_199 = arith.constant 0 : index
    %c0_200 = arith.constant 0 : index
    %175 = vector.load %arg6[%c8_198, %c0_199, %c0_200] : memref<9x8x8xf32, #tpu.memory_space<vmem>>, vector<1x8x8xf32>
    %176 = vector.shape_cast %175 : vector<1x8x8xf32> to vector<8x8xf32>
    %cst_201 = arith.constant dense<0.000000e+00> : vector<256x8xf32>
    %177 = tpu.matmul %174, %176, %cst_201 {dimension_numbers = #tpu.dot_dimension_numbers<[1], [0], [0], [1], [0, 0, 1, 1], [], []>} : vector<256x8xf32>, vector<8x8xf32>, vector<256x8xf32> -> vector<256x8xf32>
    %178 = arith.addf %172, %177 : vector<256x8xf32>
    %cst_202 = arith.constant 0.000000e+00 : f32
    %179 = vector.broadcast %cst_202 : f32 to vector<256x8xf32>
    %180 = arith.cmpf oge, %178, %179 : vector<256x8xf32>
    %cst_203 = arith.constant 2.000000e-01 : f32
    %181 = vector.broadcast %cst_203 : f32 to vector<256x8xf32>
    %182 = arith.mulf %181, %178 : vector<256x8xf32>
    %183 = arith.select %180, %178, %182 : vector<256x8xi1>, vector<256x8xf32>
    %184 = arith.addf %183, %102 : vector<256x8xf32>
    %185 = vector.shape_cast %184 : vector<256x8xf32> to vector<1x16x16x8xf32>
    %c0_204 = arith.constant 0 : index
    %c0_205 = arith.constant 0 : index
    %c0_206 = arith.constant 0 : index
    %c0_207 = arith.constant 0 : index
    %186 = vector.load %arg8[%c0_204, %c0_205, %c0_206, %c0_207] : memref<1x16x16x8xf32, #tpu.memory_space<vmem>>, vector<1x16x16x8xf32>
    tpu.vector_store %arg8[%c0_204, %c0_205, %c0_206, %c0_207], %185 {strides = array<i32>} : memref<1x16x16x8xf32, #tpu.memory_space<vmem>>, vector<1x16x16x8xf32>,
    return
  }
  func.func @transform_0(%arg0: i32) -> (i32, i32, i32, i32) {
    %c0_i32 = arith.constant 0 : i32
    %c0_i32_0 = arith.constant 0 : i32
    %c0_i32_1 = arith.constant 0 : i32
    %c0_i32_2 = arith.constant 0 : i32
    return %arg0, %c0_i32, %c0_i32_0, %c0_i32_1 : i32, i32, i32, i32
  }
  func.func @transform_1(%arg0: i32) -> (i32, i32, i32) {
    %c0_i32 = arith.constant 0 : i32
    %c0_i32_0 = arith.constant 0 : i32
    %c0_i32_1 = arith.constant 0 : i32
    %c0_i32_2 = arith.constant 0 : i32
    return %c0_i32, %c0_i32_0, %c0_i32_1 : i32, i32, i32
  }
  func.func @transform_2(%arg0: i32) -> (i32, i32) {
    %c0_i32 = arith.constant 0 : i32
    %c0_i32_0 = arith.constant 0 : i32
    %c0_i32_1 = arith.constant 0 : i32
    return %c0_i32, %c0_i32_0 : i32, i32
  }
  func.func @transform_3(%arg0: i32) -> (i32, i32, i32) {
    %c0_i32 = arith.constant 0 : i32
    %c0_i32_0 = arith.constant 0 : i32
    %c0_i32_1 = arith.constant 0 : i32
    %c0_i32_2 = arith.constant 0 : i32
    return %c0_i32, %c0_i32_0, %c0_i32_1 : i32, i32, i32
  }
  func.func @transform_4(%arg0: i32) -> (i32, i32) {
    %c0_i32 = arith.constant 0 : i32
    %c0_i32_0 = arith.constant 0 : i32
    %c0_i32_1 = arith.constant 0 : i32
    return %c0_i32, %c0_i32_0 : i32, i32
  }
  func.func @transform_5(%arg0: i32) -> (i32, i32, i32) {
    %c0_i32 = arith.constant 0 : i32
    %c0_i32_0 = arith.constant 0 : i32
    %c0_i32_1 = arith.constant 0 : i32
    %c0_i32_2 = arith.constant 0 : i32
    return %c0_i32, %c0_i32_0, %c0_i32_1 : i32, i32, i32
  }
  func.func @transform_6(%arg0: i32) -> (i32, i32) {
    %c0_i32 = arith.constant 0 : i32
    %c0_i32_0 = arith.constant 0 : i32
    %c0_i32_1 = arith.constant 0 : i32
    return %c0_i32, %c0_i32_0 : i32, i32
  }
  func.func @transform_7(%arg0: i32) -> (i32, i32, i32, i32) {
    %c0_i32 = arith.constant 0 : i32
    %c0_i32_0 = arith.constant 0 : i32
    %c0_i32_1 = arith.constant 0 : i32
    %c0_i32_2 = arith.constant 0 : i32
    return %arg0, %c0_i32, %c0_i32_0, %c0_i32_1 : i32, i32, i32, i32
  }
}

</mosaic_0001>

<bundles_post_ra>
// kernel: dis_res_down_block.1
= control target key start
LH: loop header
LB: loop body
LE: loop exit
PB: predicated region body
PF: predicated region fallthrough
CT: control target
= control target key end

     0   :  { %s14401_s24 = smov 0   ;;  %s17277_s0 = inlined_call_operand.vmem [shape: f32[2,16,16,4], index: 0, kind: input, shape index: {}]   ;;  %s17278_s1 = inlined_call_operand.vmem [shape: f32[9,4,8], index: 1, kind: input, shape index: {}]   ;;  %s17279_s2 = inlined_call_operand.vmem [shape: f32[1,8], index: 2, kind: input, shape index: {}]   ;;  %s17280_s3 = inlined_call_operand.vmem [shape: f32[9,4,8], index: 3, kind: input, shape index: {}]   ;;  %s17281_s4 = inlined_call_operand.vmem [shape: f32[1,8], index: 4, kind: input, shape index: {}]   ;;  %s17282_s5 = inlined_call_operand.vmem [shape: f32[9,8,8], index: 5, kind: input, shape index: {}]   ;;  %s17283_s6 = inlined_call_operand.vmem [shape: f32[1,8], index: 6, kind: input, shape index: {}]   ;;  %s17284_s7 = inlined_call_operand.vmem [shape: f32[2,16,16,8], index: 7, kind: output, shape index: {}]  }
   0x1 LB: > { %s10218_s25 = sadd.s32 4294967295, %s14359_s24   ;;  %p10222_p0 = scmp.ge.s32.totalorder %s14359_s24, 1  ;;  %s14359_s24 = sphi %s14401_s24, %s17_s24  }
   0x2   : > { %p237_p1 = scmp.lt.s32.totalorder %s14359_s24, 3 }
   0x4   : > { %p238_p2 = pnand %p10222_p0, %p237_p1 }
   0x6   : > { %241 = sbr.rel (%p238_p2) target bundleno = 1876 (0x754), region = 48 }
   0xd   : > { %v469_v0 = vld [vmem:[%s17278_s1] sm:$0xf]  ;;  %vm566_vm0 = vcmask 1043456   ;;  %p269_p3 = scmp.lt.s32.totalorder %s10218_s25, 1  ;;  %vm312_vm1 = vcmask 31744   ;;  %vm368_vm2 = vcmask 24576  }
   0xe   : > { %12031 = vmatprep.subr.msk.mxu1 %vm566_vm0, %v469_v0  ;;  %v14416_v1 = vld [vmem:[%s17280_s3] sm:$0xf]  ;;  %v14506_v43 = vld [vmem:[%s17278_s1 + $0x4] sm:$0xf]  ;;  %vm6402_vm4 = vcmask 64512   ;;  %vm6458_vm8 = vcmask 57344  }
   0xf   : > { %12032 = vmatpush3.msk.msra.mxu1 %vm566_vm0, %v469_v0  ;;  %s17612_s25 = smov (!%p269_p3, %s10218_s25), 1 }
  0x10   : > { %12081 = vmatprep.subr.msk.mxu1 %vm566_vm0, %v14416_v1  ;;  %s11138_s30 = sshll.u32 %s17612_s25, 8 }
  0x11   : > { %s14429_s10 = scalar_lea.vmem %s17277_s0, %s11138_s30  ;;  %s17146_s11 = scalar_lea.vmem %s17284_s7, %s11138_s30 }
  0x12   : > { %v281_v2 = vld [vmem:[%s14429_s10 + $0x10] sm:$0xff]  ;;  %v282_v3 = vld [vmem:[%s14429_s10 + $0x18] sm:$0xff]  ;;  %v279_v4 = vld [vmem:[%s14429_s10] sm:$0xff] }
  0x13   : > { %315 = vst.msk [vmem:[#allocation2 + $0x48] sm:$0xff] %vm312_vm1, %v281_v2  ;;  %345 = vst.msk [vmem:[#allocation2 + $0x8] sm:$0xff] %vm312_vm1, %v281_v2  ;;  %v280_v5 = vld [vmem:[%s14429_s10 + $0x8] sm:$0xff]  ;;  %v283_v6 = vld [vmem:[%s14429_s10 + $0x20] sm:$0xff] }
  0x14   : > { %346 = vst.msk [vmem:[#allocation2 + $0x10] sm:$0xff] %vm312_vm1, %v282_v3  ;;  %316 = vst.msk [vmem:[#allocation2 + $0x50] sm:$0xff] %vm312_vm1, %v282_v3  ;;  %v284_v7 = vld [vmem:[%s14429_s10 + $0x28] sm:$0xff]  ;;  %v285_v8 = vld [vmem:[%s14429_s10 + $0x30] sm:$0xff] }
  0x15   : > { %313 = vst.msk [vmem:[#allocation2 + $0x28] sm:$0xff] %vm312_vm1, %v279_v4  ;;  %314 = vst.msk [vmem:[#allocation2 + $0x30] sm:$0xff] %vm312_vm1, %v280_v5  ;;  %v286_v9 = vld [vmem:[%s14429_s10 + $0x38] sm:$0xff]  ;;  %v287_v10 = vld [vmem:[%s14429_s10 + $0x40] sm:$0xff] }
  0x16   : > { %317 = vst.msk [vmem:[#allocation2 + $0x68] sm:$0xff] %vm312_vm1, %v283_v6  ;;  %318 = vst.msk [vmem:[#allocation2 + $0x70] sm:$0xff] %vm312_vm1, %v284_v7  ;;  %v288_v11 = vld [vmem:[%s14429_s10 + $0x48] sm:$0xff]  ;;  %v289_v12 = vld [vmem:[%s14429_s10 + $0x50] sm:$0xff] }
  0x17   : > { %319 = vst.msk [vmem:[#allocation2 + $0x88] sm:$0xff] %vm312_vm1, %v285_v8  ;;  %320 = vst.msk [vmem:[#allocation2 + $0x90] sm:$0xff] %vm312_vm1, %v286_v9  ;;  %v290_v13 = vld [vmem:[%s14429_s10 + $0x58] sm:$0xff]  ;;  %v291_v14 = vld [vmem:[%s14429_s10 + $0x60] sm:$0xff] }
  0x18   : > { %321 = vst.msk [vmem:[#allocation2 + $0xa8] sm:$0xff] %vm312_vm1, %v287_v10  ;;  %322 = vst.msk [vmem:[#allocation2 + $0xb0] sm:$0xff] %vm312_vm1, %v288_v11  ;;  %v292_v15 = vld [vmem:[%s14429_s10 + $0x68] sm:$0xff]  ;;  %v293_v16 = vld [vmem:[%s14429_s10 + $0x70] sm:$0xff] }
  0x19   : > { %323 = vst.msk [vmem:[#allocation2 + $0xc8] sm:$0xff] %vm312_vm1, %v289_v12  ;;  %324 = vst.msk [vmem:[#allocation2 + $0xd0] sm:$0xff] %vm312_vm1, %v290_v13  ;;  %v294_v17 = vld [vmem:[%s14429_s10 + $0x78] sm:$0xff]  ;;  %v295_v18 = vld [vmem:[%s14429_s10 + $0x80] sm:$0xff] }
  0x1a   : > { %325 = vst.msk [vmem:[#allocation2 + $0xe8] sm:$0xff] %vm312_vm1, %v291_v14  ;;  %326 = vst.msk [vmem:[#allocation2 + $0xf0] sm:$0xff] %vm312_vm1, %v292_v15  ;;  %v296_v19 = vld [vmem:[%s14429_s10 + $0x88] sm:$0xff]  ;;  %v297_v20 = vld [vmem:[%s14429_s10 + $0x90] sm:$0xff] }
  0x1b   : > { %327 = vst.msk [vmem:[#allocation2 + $0x108] sm:$0xff] %vm312_vm1, %v293_v16  ;;  %328 = vst.msk [vmem:[#allocation2 + $0x110] sm:$0xff] %vm312_vm1, %v294_v17  ;;  %v298_v21 = vld [vmem:[%s14429_s10 + $0x98] sm:$0xff]  ;;  %v299_v22 = vld [vmem:[%s14429_s10 + $0xa0] sm:$0xff] }
  0x1c   : > { %329 = vst.msk [vmem:[#allocation2 + $0x128] sm:$0xff] %vm312_vm1, %v295_v18  ;;  %330 = vst.msk [vmem:[#allocation2 + $0x130] sm:$0xff] %vm312_vm1, %v296_v19  ;;  %v300_v23 = vld [vmem:[%s14429_s10 + $0xa8] sm:$0xff]  ;;  %v301_v24 = vld [vmem:[%s14429_s10 + $0xb0] sm:$0xff] }
  0x1d   : > { %331 = vst.msk [vmem:[#allocation2 + $0x148] sm:$0xff] %vm312_vm1, %v297_v20  ;;  %332 = vst.msk [vmem:[#allocation2 + $0x150] sm:$0xff] %vm312_vm1, %v298_v21  ;;  %v302_v25 = vld [vmem:[%s14429_s10 + $0xb8] sm:$0xff]  ;;  %v350_v26 = vld [vmem:[#allocation2 + $0x9] sm:$0x1] }
  0x1e   : > { %333 = vst.msk [vmem:[#allocation2 + $0x168] sm:$0xff] %vm312_vm1, %v299_v22  ;;  %v351_v27 = vld [vmem:[#allocation2 + $0x29] sm:$0x1]  ;;  %334 = vst.msk [vmem:[#allocation2 + $0x170] sm:$0xff] %vm312_vm1, %v300_v23  ;;  %v14490_v37 = vld [vmem:[#allocation2 + $0xf] sm:$0xff] }
  0x1f   : > { %335 = vst.msk [vmem:[#allocation2 + $0x188] sm:$0xff] %vm312_vm1, %v301_v24  ;;  %336 = vst.msk [vmem:[#allocation2 + $0x190] sm:$0xff] %vm312_vm1, %v302_v25  ;;  %v352_v28 = vld [vmem:[#allocation2 + $0x49] sm:$0x1]  ;;  %v303_v42 = vld [vmem:[%s14429_s10 + $0xc0] sm:$0xff] }
  0x20   : > { %369 = vst.msk [vmem:[#allocation2 + $0x7] sm:$0x1] %vm368_vm2, %v350_v26  ;;  %370 = vst.msk [vmem:[#allocation2 + $0x27] sm:$0x1] %vm368_vm2, %v351_v27  ;;  %v353_v29 = vld [vmem:[#allocation2 + $0x69] sm:$0x1] }
  0x21   : > { %371 = vst.msk [vmem:[#allocation2 + $0x47] sm:$0x1] %vm368_vm2, %v352_v28  ;;  %v354_v30 = vld [vmem:[#allocation2 + $0x89] sm:$0x1]  ;;  %372 = vst.msk [vmem:[#allocation2 + $0x67] sm:$0x1] %vm368_vm2, %v353_v29 }
  0x22   : > { %373 = vst.msk [vmem:[#allocation2 + $0x87] sm:$0x1] %vm368_vm2, %v354_v30  ;;  %v355_v31 = vld [vmem:[#allocation2 + $0xa9] sm:$0x1]  ;;  %v14516_v45 = vld [vmem:[#allocation2 + $0x2f] sm:$0xff]  ;;  %v306_v47 = vld [vmem:[%s14429_s10 + $0xd8] sm:$0xff] }
  0x23   : > { %374 = vst.msk [vmem:[#allocation2 + $0xa7] sm:$0x1] %vm368_vm2, %v355_v31  ;;  %v356_v32 = vld [vmem:[#allocation2 + $0xc9] sm:$0x1]  ;;  %v305_v46 = vld [vmem:[%s14429_s10 + $0xd0] sm:$0xff]  ;;  %v307_v49 = vld [vmem:[%s14429_s10 + $0xe0] sm:$0xff] }
  0x24   : > { %v357_v33 = vld [vmem:[#allocation2 + $0xe9] sm:$0x1]  ;;  %375 = vst.msk [vmem:[#allocation2 + $0xc7] sm:$0x1] %vm368_vm2, %v356_v32  ;;  %v14537_v51 = vld [vmem:[#allocation2 + $0x4f] sm:$0xff] }
  0x25   : > { %376 = vst.msk [vmem:[#allocation2 + $0xe7] sm:$0x1] %vm368_vm2, %v357_v33  ;;  %v358_v34 = vld [vmem:[#allocation2 + $0x109] sm:$0x1]  ;;  %v14550_v55 = vld [vmem:[#allocation2 + $0x6f] sm:$0xff] }
  0x26   : > { %377 = vst.msk [vmem:[#allocation2 + $0x107] sm:$0x1] %vm368_vm2, %v358_v34  ;;  %v359_v35 = vld [vmem:[#allocation2 + $0x129] sm:$0x1]  ;;  %v14560_v59 = vld [vmem:[#allocation2 + $0x8f] sm:$0xff] }
  0x27   : > { %v360_v36 = vld [vmem:[#allocation2 + $0x149] sm:$0x1]  ;;  %378 = vst.msk [vmem:[#allocation2 + $0x127] sm:$0x1] %vm368_vm2, %v359_v35  ;;  %v14568_v61 = vld [vmem:[#allocation2 + $0xaf] sm:$0xff] }
  0x28   : > { %379 = vst.msk [vmem:[#allocation2 + $0x147] sm:$0x1] %vm368_vm2, %v360_v36  ;;  %v361_v38 = vld [vmem:[#allocation2 + $0x169] sm:$0x1]  ;;  %v14576_v63 = vld [vmem:[#allocation2 + $0xcf] sm:$0xff] }
  0x29   : > { %v14494_v39 = vld [vmem:[#allocation2 + $0x7] sm:$0xff]  ;;  %380 = vst.msk [vmem:[#allocation2 + $0x167] sm:$0x1] %vm368_vm2, %v361_v38  ;;  %v14592_v3 = vld [vmem:[#allocation2 + $0x10f] sm:$0xff] }
  0x2a   : > { %v14496_v40 = vld [vmem:[#allocation2 + $0x27] sm:$0xff]  ;;  %12033 = vmatprep.mubr.msk.f32.mxu1 %vm312_vm1, %v14494_v39  ;;  %337 = vst.msk [vmem:[#allocation2 + $0x1a8] sm:$0xff] %vm312_vm1, %v303_v42  ;;  %339 = vst.msk [vmem:[#allocation2 + $0x1c8] sm:$0xff] %vm312_vm1, %v305_v46  ;;  %v14599_v5 = vld [vmem:[%s17278_s1 + $0x10] sm:$0xf] }
  0x2b   : > { %v362_v41 = vld [vmem:[#allocation2 + $0x189] sm:$0x1]  ;;  %12034 = vmatmul.mubr.msk.f32.vlgmr.msra.gmra.mrb[0].mxu1 %vm312_vm1, %v14490_v37  ;;  %340 = vst.msk [vmem:[#allocation2 + $0x1d0] sm:$0xff] %vm312_vm1, %v306_v47  ;;  %341 = vst.msk [vmem:[#allocation2 + $0x1e8] sm:$0xff] %vm312_vm1, %v307_v49  ;;  %12431 = vmatprep.subr.msk.mxu0 %vm566_vm0, %v14599_v5  ;;  %v14607_v6 = vld [vmem:[#allocation2 + $0x12f] sm:$0xff] }
  0x2c   : > { %381 = vst.msk [vmem:[#allocation2 + $0x187] sm:$0x1] %vm368_vm2, %v362_v41  ;;  %v304_v44 = vld [vmem:[%s14429_s10 + $0xc8] sm:$0xff]  ;;  %12082 = vmatpush3.msk.msra.mxu1 %vm566_vm0, %v14416_v1  ;;  %12036 = vmatprep.mubr.msk.f32.mxu1 %vm312_vm1, %v14496_v40  ;;  %17394 = vst [vmem:[#allocation4_spill] sm:$0xff] %v14599_v5  ;;  %v14609_v7 = vld [vmem:[#allocation2 + $0x30] sm:$0xff] }
  0x2d   : > { %338 = vst.msk [vmem:[#allocation2 + $0x1b0] sm:$0xff] %vm312_vm1, %v304_v44  ;;  %v14521_v48 = vld [vmem:[#allocation2 + $0x47] sm:$0xff]  ;;  %12131 = vmatprep.subr.msk.mxu1 %vm566_vm0, %v14506_v43  ;;  %348 = vst.msk [vmem:[#allocation2 + $0x228] sm:$0xff] %vm312_vm1, %v307_v49  ;;  %v14584_v1 = vld [vmem:[#allocation2 + $0xef] sm:$0xff]  ;;  %12432 = vmatpush3.msk.msra.mxu0 %vm566_vm0, %v14599_v5 }
  0x2e   : > { %v308_v50 = vld [vmem:[%s14429_s10 + $0xe8] sm:$0xff]  ;;  %v14627_v11 = vld [vmem:[#allocation2 + $0x50] sm:$0xff]  ;;  %v14728_v36 = vld [vmem:[%s17280_s3 + $0x4] sm:$0xf] }
  0x2f   : > { %12037 = vmatmul.mubr.msk.f32.gmra.mrb[2].mxu1 %vm312_vm1, %v14516_v45  ;;  %342 = vst.msk [vmem:[#allocation2 + $0x1f0] sm:$0xff] %vm312_vm1, %v308_v50  ;;  %349 = vst.msk [vmem:[#allocation2 + $0x230] sm:$0xff] %vm312_vm1, %v308_v50  ;;  %v14539_v52 = vld [vmem:[#allocation2 + $0x28] sm:$0xff]  ;;  %v14643_v15 = vld [vmem:[#allocation2 + $0x70] sm:$0xff] }
  0x30   : > { %12039 = vmatprep.mubr.msk.f32.mxu1 %vm312_vm1, %v14521_v48  ;;  %v14541_v53 = vld [vmem:[#allocation2 + $0x67] sm:$0xff]  ;;  %12433 = vmatprep.mubr.msk.f32.mxu0 %vm312_vm1, %v14539_v52  ;;  %v14625_v10 = vld [vmem:[#allocation2 + $0x14f] sm:$0xff] }
  0x31   : > { %v363_v54 = vld [vmem:[#allocation2 + $0x1a9] sm:$0x1]  ;;  %12434 = vmatmul.mubr.msk.f32.vlgmr.msra.gmra.mrb[0].mxu0 %vm312_vm1, %v14609_v7  ;;  %v14641_v14 = vld [vmem:[#allocation2 + $0x16f] sm:$0xff] }
  0x32   : > { %382 = vst.msk [vmem:[#allocation2 + $0x1a7] sm:$0x1] %vm368_vm2, %v363_v54  ;;  %v364_v56 = vld [vmem:[#allocation2 + $0x1c9] sm:$0x1]  ;;  %v14657_v18 = vld [vmem:[#allocation2 + $0x18f] sm:$0xff] }
  0x33   : > { %12040 = vmatmul.mubr.msk.f32.gmra.mrb[4].mxu1 %vm312_vm1, %v14537_v51  ;;  %v14552_v57 = vld [vmem:[#allocation2 + $0x87] sm:$0xff]  ;;  %383 = vst.msk [vmem:[#allocation2 + $0x1c7] sm:$0x1] %vm368_vm2, %v364_v56  ;;  %v14659_v19 = vld [vmem:[#allocation2 + $0x90] sm:$0xff] }
  0x34   : > { %12042 = vmatprep.mubr.msk.f32.mxu1 %vm312_vm1, %v14541_v53  ;;  %v365_v58 = vld [vmem:[#allocation2 + $0x1e9] sm:$0x1]  ;;  %v14673_v22 = vld [vmem:[#allocation2 + $0x1af] sm:$0xff] }
  0x35   : > { %384 = vst.msk [vmem:[#allocation2 + $0x1e7] sm:$0x1] %vm368_vm2, %v365_v58  ;;  %v14562_v60 = vld [vmem:[#allocation2 + $0xa7] sm:$0xff]  ;;  %v14675_v23 = vld [vmem:[#allocation2 + $0xb0] sm:$0xff] }
  0x36   : > { %v14570_v62 = vld [vmem:[#allocation2 + $0xc7] sm:$0xff]  ;;  %v14689_v26 = vld [vmem:[#allocation2 + $0x1cf] sm:$0xff] }
  0x37   : > { %12043 = vmatmul.mubr.msk.f32.gmra.mrb[6].mxu1 %vm312_vm1, %v14550_v55  ;;  %v14578_v0 = vld [vmem:[#allocation2 + $0xe7] sm:$0xff]  ;;  %v14691_v27 = vld [vmem:[#allocation2 + $0xd0] sm:$0xff] }
  0x38   : > { %12045 = vmatprep.mubr.msk.f32.mxu1 %vm312_vm1, %v14552_v57  ;;  %v14586_v2 = vld [vmem:[#allocation2 + $0x107] sm:$0xff]  ;;  %v14705_v30 = vld [vmem:[#allocation2 + $0x1ef] sm:$0xff] }
  0x39   : > { %v14594_v4 = vld [vmem:[#allocation2 + $0x127] sm:$0xff]  ;;  %v14707_v31 = vld [vmem:[#allocation2 + $0xf0] sm:$0xff] }
  0x3a   : > { %v14613_v8 = vld [vmem:[#allocation2 + $0x147] sm:$0xff]  ;;  %v388_v32 = vld [vmem:[#allocation2 + $0x36] sm:$0x1] }
  0x3b   : > { %12046 = vmatmul.mubr.msk.f32.gmra.mrb[8].mxu1 %vm312_vm1, %v14560_v59  ;;  %v14615_v9 = vld [vmem:[#allocation2 + $0x48] sm:$0xff]  ;;  %406 = vst.msk [vmem:[#allocation2 + $0x38] sm:$0x1] %vm368_vm2, %v388_v32  ;;  %v14720_v34 = vld [vmem:[#allocation2 + $0x110] sm:$0xff] }
  0x3c   : > { %12048 = vmatprep.mubr.msk.f32.mxu1 %vm312_vm1, %v14562_v60  ;;  %12436 = vmatprep.mubr.msk.f32.mxu0 %vm312_vm1, %v14615_v9  ;;  %v14629_v12 = vld [vmem:[#allocation2 + $0x167] sm:$0xff]  ;;  %v389_v35 = vld [vmem:[#allocation2 + $0x56] sm:$0x1] }
  0x3d   : > { %v14631_v13 = vld [vmem:[#allocation2 + $0x68] sm:$0xff]  ;;  %12437 = vmatmul.mubr.msk.f32.gmra.mrb[2].mxu0 %vm312_vm1, %v14627_v11  ;;  %407 = vst.msk [vmem:[#allocation2 + $0x58] sm:$0x1] %vm368_vm2, %v389_v35  ;;  %v10567_v38 = vld [vmem:[%s17278_s1 + $0x14] sm:$0xf] }
  0x3e   : > { %12439 = vmatprep.mubr.msk.f32.mxu0 %vm312_vm1, %v14631_v13  ;;  %v14645_v16 = vld [vmem:[#allocation2 + $0x187] sm:$0xff]  ;;  %12531 = vmatprep.subr.msk.mxu0 %vm566_vm0, %v10567_v38  ;;  %v390_v42 = vld [vmem:[#allocation2 + $0x76] sm:$0x1] }
  0x3f   : > { %12049 = vmatmul.mubr.msk.f32.gmra.mrb[10].mxu1 %vm312_vm1, %v14568_v61  ;;  %v14647_v17 = vld [vmem:[#allocation2 + $0x88] sm:$0xff]  ;;  %12532 = vmatpush3.msk.msra.mxu0 %vm566_vm0, %v10567_v38  ;;  %408 = vst.msk [vmem:[#allocation2 + $0x78] sm:$0x1] %vm368_vm2, %v390_v42  ;;  %v392_v46 = vld [vmem:[#allocation2 + $0xb6] sm:$0x1] }
  0x40   : > { %12051 = vmatprep.mubr.msk.f32.mxu1 %vm312_vm1, %v14570_v62  ;;  %v14661_v20 = vld [vmem:[#allocation2 + $0x1a7] sm:$0xff]  ;;  %410 = vst.msk [vmem:[#allocation2 + $0xb8] sm:$0x1] %vm368_vm2, %v392_v46  ;;  %v393_v50 = vld [vmem:[#allocation2 + $0xd6] sm:$0x1] }
  0x41   : > { %12440 = vmatmul.mubr.msk.f32.gmra.mrb[4].mxu0 %vm312_vm1, %v14643_v15  ;;  %v14663_v21 = vld [vmem:[#allocation2 + $0xa8] sm:$0xff]  ;;  %411 = vst.msk [vmem:[#allocation2 + $0xd8] sm:$0x1] %vm368_vm2, %v393_v50  ;;  %v394_v58 = vld [vmem:[#allocation2 + $0xf6] sm:$0x1] }
  0x42   : > { %12442 = vmatprep.mubr.msk.f32.mxu0 %vm312_vm1, %v14647_v17  ;;  %v14677_v24 = vld [vmem:[#allocation2 + $0x1c7] sm:$0xff]  ;;  %v14742_v41 = vld [vmem:[#allocation2 + $0x31] sm:$0xff]  ;;  %412 = vst.msk [vmem:[#allocation2 + $0xf8] sm:$0x1] %vm368_vm2, %v394_v58 }
  0x43   : > { %12052 = vmatmul.mubr.msk.f32.gmra.mrb[12].mxu1 %vm312_vm1, %v14576_v63  ;;  %v14679_v25 = vld [vmem:[#allocation2 + $0xc8] sm:$0xff]  ;;  %v395_v38 = vld [vmem:[#allocation2 + $0x116] sm:$0x1] }
  0x44   : > { %12054 = vmatprep.mubr.msk.f32.mxu1 %vm312_vm1, %v14578_v0  ;;  %v14693_v28 = vld [vmem:[#allocation2 + $0x1e7] sm:$0xff]  ;;  %413 = vst.msk [vmem:[#allocation2 + $0x118] sm:$0x1] %vm368_vm2, %v395_v38  ;;  %v396_v46 = vld [vmem:[#allocation2 + $0x136] sm:$0x1] }
  0x45   : > { %12443 = vmatmul.mubr.msk.f32.gmra.mrb[6].mxu0 %vm312_vm1, %v14659_v19  ;;  %v14695_v29 = vld [vmem:[#allocation2 + $0xe8] sm:$0xff]  ;;  %414 = vst.msk [vmem:[#allocation2 + $0x138] sm:$0x1] %vm368_vm2, %v396_v46  ;;  %v397_v38 = vld [vmem:[#allocation2 + $0x156] sm:$0x1] }
  0x46   : > { %12445 = vmatprep.mubr.msk.f32.mxu0 %vm312_vm1, %v14663_v21  ;;  %v14709_v33 = vld [vmem:[#allocation2 + $0x108] sm:$0xff]  ;;  %415 = vst.msk [vmem:[#allocation2 + $0x158] sm:$0x1] %vm368_vm2, %v397_v38 }
  0x47   : > { %12055 = vmatmul.mubr.msk.f32.gmra.mrb[14].mxu1 %vm312_vm1, %v14584_v1  ;;  %v14767_v44 = vld [vmem:[#allocation2 + $0x69] sm:$0xff]  ;;  %v14799_v56 = vld [vmem:[#allocation2 + $0xb1] sm:$0xff] }
  0x48   : > { %12057 = vmatprep.mubr.msk.f32.mxu1 %vm312_vm1, %v14586_v2  ;;  %v14780_v47 = vld [vmem:[#allocation2 + $0x89] sm:$0xff]  ;;  %v14812_v35 = vld [vmem:[#allocation2 + $0xd1] sm:$0xff] }
  0x49   : > { %12446 = vmatmul.mubr.msk.f32.gmra.mrb[8].mxu0 %vm312_vm1, %v14675_v23  ;;  %v14793_v54 = vld [vmem:[#allocation2 + $0xa9] sm:$0xff] }
  0x4a   : > { %12448 = vmatprep.mubr.msk.f32.mxu0 %vm312_vm1, %v14679_v25  ;;  %v14806_v32 = vld [vmem:[#allocation2 + $0xc9] sm:$0xff] }
  0x4b   : > { %12058 = vmatmul.mubr.msk.f32.gmra.mrb[16].mxu1 %vm312_vm1, %v14592_v3  ;;  %v14819_v42 = vld [vmem:[#allocation2 + $0xe9] sm:$0xff]  ;;  %v14838_v58 = vld [vmem:[#allocation2 + $0x111] sm:$0xff] }
  0x4c   : > { %12060 = vmatprep.mubr.msk.f32.mxu1 %vm312_vm1, %v14594_v4  ;;  %v14832_v50 = vld [vmem:[#allocation2 + $0x109] sm:$0xff]  ;;  %17397 = vst [vmem:[#allocation7_spill] sm:$0xff] %v14838_v58  ;;  %v14851_v5 = vld [vmem:[#allocation2 + $0x131] sm:$0xff] }
  0x4d   : > { %12449 = vmatmul.mubr.msk.f32.gmra.mrb[10].mxu0 %vm312_vm1, %v14691_v27  ;;  %17396 = vst [vmem:[#allocation6_spill] sm:$0xff] %v14832_v50  ;;  %v14845_v46 = vld [vmem:[#allocation2 + $0x129] sm:$0xff]  ;;  %17399 = vst [vmem:[#allocation9_spill] sm:$0xff] %v14851_v5 }
  0x4e   : > { %12451 = vmatprep.mubr.msk.f32.mxu0 %vm312_vm1, %v14695_v29  ;;  %17398 = vst [vmem:[#allocation8_spill] sm:$0xff] %v14845_v46  ;;  %v14858_v38 = vld [vmem:[#allocation2 + $0x149] sm:$0xff] }
  0x4f   : > { %12061 = vmatmul.mubr.msk.f32.gmra.mrb[18].mxu1 %vm312_vm1, %v14607_v6  ;;  %17400 = vst [vmem:[#allocation10_spill] sm:$0xff] %v14858_v38 }
  0x50   : > { %12063 = vmatprep.mubr.msk.f32.mxu1 %vm312_vm1, %v14613_v8 }
  0x51   : > { %12452 = vmatmul.mubr.msk.f32.gmra.mrb[12].mxu0 %vm312_vm1, %v14707_v31 }
  0x52   : > { %12454 = vmatprep.mubr.msk.f32.mxu0 %vm312_vm1, %v14709_v33 }
  0x53   : > { %12064 = vmatmul.mubr.msk.f32.gmra.mrb[20].mxu1 %vm312_vm1, %v14625_v10 }
  0x54   : > { %12066 = vmatprep.mubr.msk.f32.mxu1 %vm312_vm1, %v14629_v12 }
  0x55   : > { %12455 = vmatmul.mubr.msk.f32.gmra.mrb[14].mxu0 %vm312_vm1, %v14720_v34 }
  0x57   : > { %12067 = vmatmul.mubr.msk.f32.gmra.mrb[22].mxu1 %vm312_vm1, %v14641_v14 }
  0x58   : > { %12069 = vmatprep.mubr.msk.f32.mxu1 %vm312_vm1, %v14645_v16 }
  0x5b   : > { %12070 = vmatmul.mubr.msk.f32.gmra.mrb[24].mxu1 %vm312_vm1, %v14657_v18 }
  0x5c   : > { %12072 = vmatprep.mubr.msk.f32.mxu1 %vm312_vm1, %v14661_v20 }
  0x5f   : > { %12073 = vmatmul.mubr.msk.f32.gmra.mrb[26].mxu1 %vm312_vm1, %v14673_v22 }
  0x60   : > { %12075 = vmatprep.mubr.msk.f32.mxu1 %vm312_vm1, %v14677_v24 }
  0x63   : > { %12076 = vmatmul.mubr.msk.f32.gmra.mrb[28].mxu1 %vm312_vm1, %v14689_v26 }
  0x64   : > { %12078 = vmatprep.mubr.msk.f32.mxu1 %vm312_vm1, %v14693_v28 }
  0x67   : > { %12079 = vmatmul.mubr.msk.f32.gmra.mrb[30].mxu1 %vm312_vm1, %v14705_v30 }
  0x68   : > { %12083 = vmatprep.mubr.msk.f32.mxu1 %vm312_vm1, %v14494_v39  ;;  %v14736_v39 = vld [vmem:[#allocation2 + $0x29] sm:$0xff] }
  0x69   : > { %12533 = vmatprep.mubr.msk.f32.mxu0 %vm312_vm1, %v14736_v39 }
  0x6a   : > { %12534 = vmatmul.mubr.msk.f32.vlgmr.msra.gmra.mrb[0].mxu0 %vm312_vm1, %v14742_v41 }
  0x6b   : > { %12084 = vmatmul.mubr.msk.f32.vlgmr.msra.gmra.mrb[32].mxu1 %vm312_vm1, %v14490_v37  ;;  %v14754_v37 = vld [vmem:[#allocation2 + $0x49] sm:$0xff] }
  0x6c   : > { %12132 = vmatpush3.msk.msra.mxu1 %vm566_vm0, %v14506_v43  ;;  %12086 = vmatprep.mubr.msk.f32.mxu1 %vm312_vm1, %v14496_v40  ;;  %v14760_v40 = vld [vmem:[#allocation2 + $0x51] sm:$0xff] }
  0x6d   : > { %12181 = vmatprep.subr.msk.mxu1 %vm566_vm0, %v14728_v36  ;;  %12536 = vmatprep.mubr.msk.f32.mxu0 %vm312_vm1, %v14754_v37  ;;  %v391_v43 = vld [vmem:[#allocation2 + $0x96] sm:$0x1] }
  0x6e   : > { %409 = vst.msk [vmem:[#allocation2 + $0x98] sm:$0x1] %vm368_vm2, %v391_v43  ;;  %12537 = vmatmul.mubr.msk.f32.gmra.mrb[2].mxu0 %vm312_vm1, %v14760_v40  ;;  %v14825_v43 = vld [vmem:[#allocation2 + $0xf1] sm:$0xff] }
  0x6f   : > { %12087 = vmatmul.mubr.msk.f32.gmra.mrb[34].mxu1 %vm312_vm1, %v14516_v45  ;;  %12539 = vmatprep.mubr.msk.f32.mxu0 %vm312_vm1, %v14767_v44  ;;  %v14773_v45 = vld [vmem:[#allocation2 + $0x71] sm:$0xff]  ;;  %17395 = vst [vmem:[#allocation5_spill] sm:$0xff] %v14825_v43 }
  0x70   : > { %12089 = vmatprep.mubr.msk.f32.mxu1 %vm312_vm1, %v14521_v48 }
  0x72   : > { %12540 = vmatmul.mubr.msk.f32.gmra.mrb[4].mxu0 %vm312_vm1, %v14773_v45 }
  0x73   : > { %12090 = vmatmul.mubr.msk.f32.gmra.mrb[36].mxu1 %vm312_vm1, %v14537_v51  ;;  %12542 = vmatprep.mubr.msk.f32.mxu0 %vm312_vm1, %v14780_v47 }
  0x74   : > { %12092 = vmatprep.mubr.msk.f32.mxu1 %vm312_vm1, %v14541_v53 }
  0x75   : > { %v14786_v49 = vld [vmem:[#allocation2 + $0x91] sm:$0xff] }
  0x76   : > { %12543 = vmatmul.mubr.msk.f32.gmra.mrb[6].mxu0 %vm312_vm1, %v14786_v49 }
  0x77   : > { %12093 = vmatmul.mubr.msk.f32.gmra.mrb[38].mxu1 %vm312_vm1, %v14550_v55  ;;  %12545 = vmatprep.mubr.msk.f32.mxu0 %vm312_vm1, %v14793_v54 }
  0x78   : > { %12095 = vmatprep.mubr.msk.f32.mxu1 %vm312_vm1, %v14552_v57 }
  0x7a   : > { %12546 = vmatmul.mubr.msk.f32.gmra.mrb[8].mxu0 %vm312_vm1, %v14799_v56 }
  0x7b   : > { %12096 = vmatmul.mubr.msk.f32.gmra.mrb[40].mxu1 %vm312_vm1, %v14560_v59  ;;  %12548 = vmatprep.mubr.msk.f32.mxu0 %vm312_vm1, %v14806_v32 }
  0x7c   : > { %12098 = vmatprep.mubr.msk.f32.mxu1 %vm312_vm1, %v14562_v60 }
  0x7e   : > { %12549 = vmatmul.mubr.msk.f32.gmra.mrb[10].mxu0 %vm312_vm1, %v14812_v35 }
  0x7f   : > { %12099 = vmatmul.mubr.msk.f32.gmra.mrb[42].mxu1 %vm312_vm1, %v14568_v61  ;;  %12551 = vmatprep.mubr.msk.f32.mxu0 %vm312_vm1, %v14819_v42 }
  0x80   : > { %12101 = vmatprep.mubr.msk.f32.mxu1 %vm312_vm1, %v14570_v62 }
  0x82   : > { %12552 = vmatmul.mubr.msk.f32.gmra.mrb[12].mxu0 %vm312_vm1, %v14825_v43  ;;  %v310_v43 = vld [vmem:[%s14429_s10 + $0xf8] sm:$0xff] }
  0x83   : > { %12102 = vmatmul.mubr.msk.f32.gmra.mrb[44].mxu1 %vm312_vm1, %v14576_v63  ;;  %12554 = vmatprep.mubr.msk.f32.mxu0 %vm312_vm1, %v14832_v50  ;;  %v398_v50 = vld [vmem:[#allocation2 + $0x176] sm:$0x1]  ;;  %344 = vst.msk [vmem:[#allocation2 + $0x210] sm:$0xff] %vm312_vm1, %v310_v43  ;;  %v14912_v43 = vld [vmem:[#allocation2 + $0x1c9] sm:$0xff] }
  0x84   : > { %12104 = vmatprep.mubr.msk.f32.mxu1 %vm312_vm1, %v14578_v0  ;;  %416 = vst.msk [vmem:[#allocation2 + $0x178] sm:$0x1] %vm368_vm2, %v398_v50  ;;  %v14871_v50 = vld [vmem:[#allocation2 + $0x169] sm:$0xff]  ;;  %17408 = vst [vmem:[#allocation18_spill] sm:$0xff] %v14912_v43 }
  0x85   : > { %17402 = vst [vmem:[#allocation12_spill] sm:$0xff] %v14871_v50 }
  0x86   : > { %12555 = vmatmul.mubr.msk.f32.gmra.mrb[14].mxu0 %vm312_vm1, %v14838_v58  ;;  %v399_v58 = vld [vmem:[#allocation2 + $0x196] sm:$0x1] }
  0x87   : > { %12105 = vmatmul.mubr.msk.f32.gmra.mrb[46].mxu1 %vm312_vm1, %v14584_v1  ;;  %12557 = vmatprep.mubr.msk.f32.mxu0 %vm312_vm1, %v14845_v46  ;;  %v14864_v46 = vld [vmem:[#allocation2 + $0x151] sm:$0xff]  ;;  %417 = vst.msk [vmem:[#allocation2 + $0x198] sm:$0x1] %vm368_vm2, %v399_v58  ;;  %v14884_v58 = vld [vmem:[#allocation2 + $0x189] sm:$0xff] }
  0x88   : > { %12107 = vmatprep.mubr.msk.f32.mxu1 %vm312_vm1, %v14586_v2  ;;  %17401 = vst [vmem:[#allocation11_spill] sm:$0xff] %v14864_v46  ;;  %17404 = vst [vmem:[#allocation14_spill] sm:$0xff] %v14884_v58 }
  0x8a   : > { %12558 = vmatmul.mubr.msk.f32.gmra.mrb[16].mxu0 %vm312_vm1, %v14851_v5  ;;  %v400_v5 = vld [vmem:[#allocation2 + $0x1b6] sm:$0x1] }
  0x8b   : > { %12108 = vmatmul.mubr.msk.f32.gmra.mrb[48].mxu1 %vm312_vm1, %v14592_v3  ;;  %12560 = vmatprep.mubr.msk.f32.mxu0 %vm312_vm1, %v14858_v38  ;;  %v14877_v38 = vld [vmem:[#allocation2 + $0x171] sm:$0xff]  ;;  %418 = vst.msk [vmem:[#allocation2 + $0x1b8] sm:$0x1] %vm368_vm2, %v400_v5  ;;  %v14899_v5 = vld [vmem:[#allocation2 + $0x1a9] sm:$0xff] }
  0x8c   : > { %12110 = vmatprep.mubr.msk.f32.mxu1 %vm312_vm1, %v14594_v4  ;;  %17403 = vst [vmem:[#allocation13_spill] sm:$0xff] %v14877_v38  ;;  %17406 = vst [vmem:[#allocation16_spill] sm:$0xff] %v14899_v5 }
  0x8e   : > { %12561 = vmatmul.mubr.msk.f32.gmra.mrb[18].mxu0 %vm312_vm1, %v14864_v46  ;;  %v401_v46 = vld [vmem:[#allocation2 + $0x1d6] sm:$0x1] }
  0x8f   : > { %12111 = vmatmul.mubr.msk.f32.gmra.mrb[50].mxu1 %vm312_vm1, %v14607_v6  ;;  %12563 = vmatprep.mubr.msk.f32.mxu0 %vm312_vm1, %v14871_v50  ;;  %v14890_v50 = vld [vmem:[#allocation2 + $0x191] sm:$0xff]  ;;  %419 = vst.msk [vmem:[#allocation2 + $0x1d8] sm:$0x1] %vm368_vm2, %v401_v46 }
  0x90   : > { %12113 = vmatprep.mubr.msk.f32.mxu1 %vm312_vm1, %v14613_v8  ;;  %17405 = vst [vmem:[#allocation15_spill] sm:$0xff] %v14890_v50  ;;  %v309_v46 = vld [vmem:[%s14429_s10 + $0xf0] sm:$0xff] }
  0x91   : > { %343 = vst.msk [vmem:[#allocation2 + $0x208] sm:$0xff] %vm312_vm1, %v309_v46 }
  0x92   : > { %12564 = vmatmul.mubr.msk.f32.gmra.mrb[20].mxu0 %vm312_vm1, %v14877_v38  ;;  %v402_v38 = vld [vmem:[#allocation2 + $0x1f6] sm:$0x1] }
  0x93   : > { %12114 = vmatmul.mubr.msk.f32.gmra.mrb[52].mxu1 %vm312_vm1, %v14625_v10  ;;  %12566 = vmatprep.mubr.msk.f32.mxu0 %vm312_vm1, %v14884_v58  ;;  %v14905_v58 = vld [vmem:[#allocation2 + $0x1b1] sm:$0xff]  ;;  %420 = vst.msk [vmem:[#allocation2 + $0x1f8] sm:$0x1] %vm368_vm2, %v402_v38 }
  0x94   : > { %12116 = vmatprep.mubr.msk.f32.mxu1 %vm312_vm1, %v14629_v12  ;;  %17407 = vst [vmem:[#allocation17_spill] sm:$0xff] %v14905_v58  ;;  %v403_v38 = vld [vmem:[#allocation2 + $0x216] sm:$0x1] }
  0x95   : > { %421 = vst.msk [vmem:[#allocation2 + $0x218] sm:$0x1] %vm368_vm2, %v403_v38  ;;  %v14936_v38 = vld [vmem:[#allocation2 + $0x8] sm:$0xff] }
  0x96   : > { %12567 = vmatmul.mubr.msk.f32.gmra.mrb[22].mxu0 %vm312_vm1, %v14890_v50  ;;  %v387_v50 = vld [vmem:[#allocation2 + $0x16] sm:$0x1] }
  0x97   : > { %12117 = vmatmul.mubr.msk.f32.gmra.mrb[54].mxu1 %vm312_vm1, %v14641_v14  ;;  %12569 = vmatprep.mubr.msk.f32.mxu0 %vm312_vm1, %v14899_v5  ;;  %v14919_v5 = vld [vmem:[#allocation2 + $0x1d1] sm:$0xff]  ;;  %405 = vst.msk [vmem:[#allocation2 + $0x18] sm:$0x1] %vm368_vm2, %v387_v50 }
  0x98   : > { %12119 = vmatprep.mubr.msk.f32.mxu1 %vm312_vm1, %v14645_v16  ;;  %17409 = vst [vmem:[#allocation19_spill] sm:$0xff] %v14919_v5  ;;  %v14946_v50 = vld [vmem:[#allocation2 + $0x10] sm:$0xff] }
  0x9a   : > { %12570 = vmatmul.mubr.msk.f32.gmra.mrb[24].mxu0 %vm312_vm1, %v14905_v58  ;;  %v14927_v58 = vld [vmem:[#allocation2 + $0x1e9] sm:$0xff]  ;;  %v14934_v46 = vld [vmem:[#allocation2 + $0x1f1] sm:$0xff] }
  0x9b   : > { %12120 = vmatmul.mubr.msk.f32.gmra.mrb[56].mxu1 %vm312_vm1, %v14657_v18  ;;  %12572 = vmatprep.mubr.msk.f32.mxu0 %vm312_vm1, %v14912_v43  ;;  %17410 = vst [vmem:[#allocation20_spill] sm:$0xff] %v14927_v58  ;;  %17411 = vst [vmem:[#allocation21_spill] sm:$0xff] %v14934_v46  ;;  %v14955_v43 = vld [vmem:[%s17278_s1 + $0x8] sm:$0xf] }
  0x9c   : > { %12122 = vmatprep.mubr.msk.f32.mxu1 %vm312_vm1, %v14661_v20 }
  0x9e   : > { %12573 = vmatmul.mubr.msk.f32.gmra.mrb[26].mxu0 %vm312_vm1, %v14919_v5  ;;  %v14942_v5 = vld [vmem:[#allocation2 + $0x209] sm:$0xff] }
  0x9f   : > { %12123 = vmatmul.mubr.msk.f32.gmra.mrb[58].mxu1 %vm312_vm1, %v14673_v22  ;;  %12575 = vmatprep.mubr.msk.f32.mxu0 %vm312_vm1, %v14927_v58  ;;  %v14950_v58 = vld [vmem:[#allocation2 + $0x211] sm:$0xff] }
  0xa0   : > { %12125 = vmatprep.mubr.msk.f32.mxu1 %vm312_vm1, %v14677_v24 }
  0xa2   : > { %12576 = vmatmul.mubr.msk.f32.gmra.mrb[28].mxu0 %vm312_vm1, %v14934_v46  ;;  %v10635_v46 = vld [vmem:[%s17278_s1 + $0x18] sm:$0xf] }
  0xa3   : > { %12126 = vmatmul.mubr.msk.f32.gmra.mrb[60].mxu1 %vm312_vm1, %v14689_v26  ;;  %12578 = vmatprep.mubr.msk.f32.mxu0 %vm312_vm1, %v14942_v5 }
  0xa4   : > { %12128 = vmatprep.mubr.msk.f32.mxu1 %vm312_vm1, %v14693_v28  ;;  %12631 = vmatprep.subr.msk.mxu0 %vm566_vm0, %v10635_v46 }
  0xa5   : > { %12632 = vmatpush3.msk.msra.mxu0 %vm566_vm0, %v10635_v46  ;;  %v17428_v46 = vld [vmem:[#allocation21_spill] sm:$0xff] }
  0xa6   : > { %12579 = vmatmul.mubr.msk.f32.gmra.mrb[30].mxu0 %vm312_vm1, %v14950_v58 }
  0xa7   : > { %12129 = vmatmul.mubr.msk.f32.gmra.mrb[62].mxu1 %vm312_vm1, %v14705_v30  ;;  %12633 = vmatprep.mubr.msk.f32.mxu0 %vm312_vm1, %v14521_v48  ;;  %v15030_v48 = vld [vmem:[#allocation2 + $0x128] sm:$0xff] }
  0xa8   : > { %12133 = vmatprep.mubr.msk.f32.mxu1 %vm312_vm1, %v14936_v38 }
  0xaa   : > { %12634 = vmatmul.mubr.msk.f32.vlgmr.msra.gmra.mrb[0].mxu0 %vm312_vm1, %v14537_v51  ;;  %v15038_v51 = vld [vmem:[#allocation2 + $0x130] sm:$0xff] }
  0xab   : > { %12134 = vmatmul.mubr.msk.f32.vlgmr.msra.gmra.mrb[0].mxu1 %vm312_vm1, %v14946_v50  ;;  %12636 = vmatprep.mubr.msk.f32.mxu0 %vm312_vm1, %v14541_v53  ;;  %v15042_v53 = vld [vmem:[#allocation2 + $0x148] sm:$0xff] }
  0xac   : > { %12182 = vmatpush3.msk.msra.mxu1 %vm566_vm0, %v14728_v36  ;;  %12136 = vmatprep.mubr.msk.f32.mxu1 %vm312_vm1, %v14539_v52  ;;  %v17426_v36 = vld [vmem:[#allocation19_spill] sm:$0xff] }
  0xad   : > { %12231 = vmatprep.subr.msk.mxu1 %vm566_vm0, %v14955_v43 }
  0xae   : > { %12637 = vmatmul.mubr.msk.f32.gmra.mrb[2].mxu0 %vm312_vm1, %v14550_v55  ;;  %v15050_v55 = vld [vmem:[#allocation2 + $0x150] sm:$0xff] }
  0xaf   : > { %12137 = vmatmul.mubr.msk.f32.gmra.mrb[2].mxu1 %vm312_vm1, %v14609_v7  ;;  %12639 = vmatprep.mubr.msk.f32.mxu0 %vm312_vm1, %v14552_v57  ;;  %v15054_v57 = vld [vmem:[#allocation2 + $0x168] sm:$0xff] }
  0xb0   : > { %12139 = vmatprep.mubr.msk.f32.mxu1 %vm312_vm1, %v14615_v9 }
  0xb2   : > { %12640 = vmatmul.mubr.msk.f32.gmra.mrb[4].mxu0 %vm312_vm1, %v14560_v59  ;;  %v15062_v59 = vld [vmem:[#allocation2 + $0x170] sm:$0xff] }
  0xb3   : > { %12140 = vmatmul.mubr.msk.f32.gmra.mrb[4].mxu1 %vm312_vm1, %v14627_v11  ;;  %12642 = vmatprep.mubr.msk.f32.mxu0 %vm312_vm1, %v14562_v60  ;;  %v15066_v60 = vld [vmem:[#allocation2 + $0x188] sm:$0xff] }
  0xb4   : > { %12142 = vmatprep.mubr.msk.f32.mxu1 %vm312_vm1, %v14631_v13 }
  0xb6   : > { %12643 = vmatmul.mubr.msk.f32.gmra.mrb[6].mxu0 %vm312_vm1, %v14568_v61  ;;  %v15074_v61 = vld [vmem:[#allocation2 + $0x190] sm:$0xff] }
  0xb7   : > { %12143 = vmatmul.mubr.msk.f32.gmra.mrb[6].mxu1 %vm312_vm1, %v14643_v15  ;;  %12645 = vmatprep.mubr.msk.f32.mxu0 %vm312_vm1, %v14570_v62  ;;  %v15078_v62 = vld [vmem:[#allocation2 + $0x1a8] sm:$0xff] }
  0xb8   : > { %12145 = vmatprep.mubr.msk.f32.mxu1 %vm312_vm1, %v14647_v17 }
  0xba   : > { %12646 = vmatmul.mubr.msk.f32.gmra.mrb[8].mxu0 %vm312_vm1, %v14576_v63  ;;  %v366_v63 = vld [vmem:[#allocation2 + $0x209] sm:$0x1] }
  0xbb   : > { %12146 = vmatmul.mubr.msk.f32.gmra.mrb[8].mxu1 %vm312_vm1, %v14659_v19  ;;  %12648 = vmatprep.mubr.msk.f32.mxu0 %vm312_vm1, %v14578_v0  ;;  %v15086_v0 = vld [vmem:[#allocation2 + $0x1b0] sm:$0xff]  ;;  %385 = vst.msk [vmem:[#allocation2 + $0x207] sm:$0x1] %vm368_vm2, %v366_v63 }
  0xbc   : > { %12148 = vmatprep.mubr.msk.f32.mxu1 %vm312_vm1, %v14663_v21  ;;  %v2413_v63 = vld [vmem:[#allocation2 + $0x16f] sm:$0xff] }
  0xbe   : > { %12649 = vmatmul.mubr.msk.f32.gmra.mrb[10].mxu0 %vm312_vm1, %v14584_v1  ;;  %v15091_v1 = vld [vmem:[#allocation2 + $0x1c8] sm:$0xff] }
  0xbf   : > { %12149 = vmatmul.mubr.msk.f32.gmra.mrb[10].mxu1 %vm312_vm1, %v14675_v23  ;;  %12651 = vmatprep.mubr.msk.f32.mxu0 %vm312_vm1, %v14586_v2  ;;  %v367_v2 = vld [vmem:[#allocation2 + $0x229] sm:$0x1] }
  0xc0   : > { %12151 = vmatprep.mubr.msk.f32.mxu1 %vm312_vm1, %v14679_v25  ;;  %386 = vst.msk [vmem:[#allocation2 + $0x227] sm:$0x1] %vm368_vm2, %v367_v2  ;;  %v2416_v2 = vld [vmem:[#allocation2 + $0x1a7] sm:$0xff] }
  0xc2   : > { %12652 = vmatmul.mubr.msk.f32.gmra.mrb[12].mxu0 %vm312_vm1, %v14592_v3  ;;  %v15099_v3 = vld [vmem:[#allocation2 + $0x1d0] sm:$0xff] }
  0xc3   : > { %12152 = vmatmul.mubr.msk.f32.gmra.mrb[12].mxu1 %vm312_vm1, %v14691_v27  ;;  %12654 = vmatprep.mubr.msk.f32.mxu0 %vm312_vm1, %v14594_v4  ;;  %v15104_v4 = vld [vmem:[#allocation2 + $0x1e8] sm:$0xff] }
  0xc4   : > { %12154 = vmatprep.mubr.msk.f32.mxu1 %vm312_vm1, %v14695_v29 }
  0xc6   : > { %12655 = vmatmul.mubr.msk.f32.gmra.mrb[14].mxu0 %vm312_vm1, %v14607_v6  ;;  %v15110_v6 = vld [vmem:[#allocation2 + $0x207] sm:$0xff] }
  0xc7   : > { %12155 = vmatmul.mubr.msk.f32.gmra.mrb[14].mxu1 %vm312_vm1, %v14707_v31  ;;  %12657 = vmatprep.mubr.msk.f32.mxu0 %vm312_vm1, %v14613_v8  ;;  %v15114_v8 = vld [vmem:[#allocation2 + $0x1f0] sm:$0xff] }
  0xc8   : > { %12157 = vmatprep.mubr.msk.f32.mxu1 %vm312_vm1, %v14709_v33 }
  0xca   : > { %12658 = vmatmul.mubr.msk.f32.gmra.mrb[16].mxu0 %vm312_vm1, %v14625_v10  ;;  %v15118_v10 = vld [vmem:[#allocation2 + $0x20f] sm:$0xff] }
  0xcb   : > { %12158 = vmatmul.mubr.msk.f32.gmra.mrb[16].mxu1 %vm312_vm1, %v14720_v34  ;;  %12660 = vmatprep.mubr.msk.f32.mxu0 %vm312_vm1, %v14629_v12  ;;  %v4379_v12 = vld [vmem:[#allocation2 + $0x227] sm:$0xff] }
  0xcc   : > { %12160 = vmatprep.mubr.msk.f32.mxu1 %vm312_vm1, %v15030_v48 }
  0xce   : > { %12661 = vmatmul.mubr.msk.f32.gmra.mrb[18].mxu0 %vm312_vm1, %v14641_v14  ;;  %v4380_v14 = vld [vmem:[#allocation2 + $0x22f] sm:$0xff] }
  0xcf   : > { %12161 = vmatmul.mubr.msk.f32.gmra.mrb[18].mxu1 %vm312_vm1, %v15038_v51  ;;  %12663 = vmatprep.mubr.msk.f32.mxu0 %vm312_vm1, %v14645_v16  ;;  %v15130_v16 = vld [vmem:[%s17280_s3 + $0x8] sm:$0xf] }
  0xd0   : > { %12163 = vmatprep.mubr.msk.f32.mxu1 %vm312_vm1, %v15042_v53 }
  0xd2   : > { %12664 = vmatmul.mubr.msk.f32.gmra.mrb[20].mxu0 %vm312_vm1, %v14657_v18  ;;  %v10703_v18 = vld [vmem:[%s17278_s1 + $0x1c] sm:$0xf] }
  0xd3   : > { %12164 = vmatmul.mubr.msk.f32.gmra.mrb[20].mxu1 %vm312_vm1, %v15050_v55  ;;  %12666 = vmatprep.mubr.msk.f32.mxu0 %vm312_vm1, %v14661_v20  ;;  %v17412_v20 = vld [vmem:[#allocation5_spill] sm:$0xff] }
  0xd4   : > { %12166 = vmatprep.mubr.msk.f32.mxu1 %vm312_vm1, %v15054_v57  ;;  %12731 = vmatprep.subr.msk.mxu0 %vm566_vm0, %v10703_v18 }
  0xd5   : > { %12732 = vmatpush3.msk.msra.mxu0 %vm566_vm0, %v10703_v18  ;;  %v14255_v18 = vld [vmem:[%s17278_s1 + $0x10] sm:$0xf] }
  0xd6   : > { %12667 = vmatmul.mubr.msk.f32.gmra.mrb[22].mxu0 %vm312_vm1, %v14673_v22  ;;  %v17414_v22 = vld [vmem:[#allocation7_spill] sm:$0xff] }
  0xd7   : > { %12167 = vmatmul.mubr.msk.f32.gmra.mrb[22].mxu1 %vm312_vm1, %v15062_v59  ;;  %12669 = vmatprep.mubr.msk.f32.mxu0 %vm312_vm1, %v14677_v24  ;;  %v17416_v24 = vld [vmem:[#allocation9_spill] sm:$0xff] }
  0xd8   : > { %12169 = vmatprep.mubr.msk.f32.mxu1 %vm312_vm1, %v15066_v60 }
  0xda   : > { %12670 = vmatmul.mubr.msk.f32.gmra.mrb[24].mxu0 %vm312_vm1, %v14689_v26  ;;  %v17418_v26 = vld [vmem:[#allocation11_spill] sm:$0xff] }
  0xdb   : > { %12170 = vmatmul.mubr.msk.f32.gmra.mrb[24].mxu1 %vm312_vm1, %v15074_v61  ;;  %12672 = vmatprep.mubr.msk.f32.mxu0 %vm312_vm1, %v14693_v28  ;;  %v17420_v28 = vld [vmem:[#allocation13_spill] sm:$0xff] }
  0xdc   : > { %12172 = vmatprep.mubr.msk.f32.mxu1 %vm312_vm1, %v15078_v62 }
  0xde   : > { %12673 = vmatmul.mubr.msk.f32.gmra.mrb[26].mxu0 %vm312_vm1, %v14705_v30  ;;  %v17422_v30 = vld [vmem:[#allocation15_spill] sm:$0xff] }
  0xdf   : > { %12173 = vmatmul.mubr.msk.f32.gmra.mrb[26].mxu1 %vm312_vm1, %v15086_v0  ;;  %12675 = vmatprep.mubr.msk.f32.mxu0 %vm312_vm1, %v15110_v6 }
  0xe0   : > { %12175 = vmatprep.mubr.msk.f32.mxu1 %vm312_vm1, %v15091_v1 }
  0xe2   : > { %12676 = vmatmul.mubr.msk.f32.gmra.mrb[28].mxu0 %vm312_vm1, %v15118_v10 }
  0xe3   : > { %12176 = vmatmul.mubr.msk.f32.gmra.mrb[28].mxu1 %vm312_vm1, %v15099_v3  ;;  %12678 = vmatprep.mubr.msk.f32.mxu0 %vm312_vm1, %v4379_v12  ;;  %v2420_v12 = vld [vmem:[#allocation2 + $0x1e7] sm:$0xff] }
  0xe4   : > { %12178 = vmatprep.mubr.msk.f32.mxu1 %vm312_vm1, %v15104_v4 }
  0xe6   : > { %12679 = vmatmul.mubr.msk.f32.gmra.mrb[30].mxu0 %vm312_vm1, %v4380_v14  ;;  %v2421_v14 = vld [vmem:[#allocation2 + $0x1ef] sm:$0xff] }
  0xe7   : > { %12179 = vmatmul.mubr.msk.f32.gmra.mrb[30].mxu1 %vm312_vm1, %v15114_v8  ;;  %12733 = vmatprep.mubr.msk.f32.mxu0 %vm312_vm1, %v14615_v9 }
  0xe8   : > { %12183 = vmatprep.mubr.msk.f32.mxu1 %vm312_vm1, %v14936_v38  ;;  %v10465_v38 = vld [vmem:[%s17280_s3 + $0xc] sm:$0xf] }
  0xea   : > { %12734 = vmatmul.mubr.msk.f32.vlgmr.msra.gmra.mrb[0].mxu0 %vm312_vm1, %v14627_v11 }
  0xeb   : > { %12184 = vmatmul.mubr.msk.f32.vlgmr.msra.gmra.mrb[32].mxu1 %vm312_vm1, %v14946_v50  ;;  %12736 = vmatprep.mubr.msk.f32.mxu0 %vm312_vm1, %v14631_v13  ;;  %v404_v50 = vld [vmem:[#allocation2 + $0x236] sm:$0x1] }
  0xec   : > { %12232 = vmatpush3.msk.msra.mxu1 %vm566_vm0, %v14955_v43  ;;  %12186 = vmatprep.mubr.msk.f32.mxu1 %vm312_vm1, %v14539_v52  ;;  %v15256_v52 = vld [vmem:[#allocation2 + $0x208] sm:$0xff]  ;;  %v17427_v43 = vld [vmem:[#allocation20_spill] sm:$0xff]  ;;  %422 = vst.msk [vmem:[#allocation2 + $0x238] sm:$0x1] %vm368_vm2, %v404_v50 }
  0xed   : > { %12281 = vmatprep.subr.msk.mxu1 %vm566_vm0, %v15130_v16  ;;  %v15724_v50 = vld [vmem:[#allocation2 + $0xa8] sm:$0xff] }
  0xee   : > { %12737 = vmatmul.mubr.msk.f32.gmra.mrb[2].mxu0 %vm312_vm1, %v14643_v15 }
  0xef   : > { %12187 = vmatmul.mubr.msk.f32.gmra.mrb[34].mxu1 %vm312_vm1, %v14609_v7  ;;  %12739 = vmatprep.mubr.msk.f32.mxu0 %vm312_vm1, %v14647_v17  ;;  %v15262_v7 = vld [vmem:[#allocation2 + $0x210] sm:$0xff] }
  0xf0   : > { %12189 = vmatprep.mubr.msk.f32.mxu1 %vm312_vm1, %v14615_v9  ;;  %v15264_v9 = vld [vmem:[#allocation2 + $0x9] sm:$0xff] }
  0xf2   : > { %12740 = vmatmul.mubr.msk.f32.gmra.mrb[4].mxu0 %vm312_vm1, %v14659_v19 }
  0xf3   : > { %12190 = vmatmul.mubr.msk.f32.gmra.mrb[36].mxu1 %vm312_vm1, %v14627_v11  ;;  %12742 = vmatprep.mubr.msk.f32.mxu0 %vm312_vm1, %v14663_v21  ;;  %v5031_v11 = vld [vmem:[#allocation2 + $0x228] sm:$0xff] }
  0xf4   : > { %12192 = vmatprep.mubr.msk.f32.mxu1 %vm312_vm1, %v14631_v13  ;;  %v15272_v13 = vld [vmem:[#allocation2 + $0x11] sm:$0xff] }
  0xf6   : > { %12743 = vmatmul.mubr.msk.f32.gmra.mrb[6].mxu0 %vm312_vm1, %v14675_v23 }
  0xf7   : > { %12193 = vmatmul.mubr.msk.f32.gmra.mrb[38].mxu1 %vm312_vm1, %v14643_v15  ;;  %12745 = vmatprep.mubr.msk.f32.mxu0 %vm312_vm1, %v14679_v25  ;;  %v15275_v15 = vld [vmem:[#allocation2 + $0x230] sm:$0xff] }
  0xf8   : > { %12195 = vmatprep.mubr.msk.f32.mxu1 %vm312_vm1, %v14647_v17  ;;  %v15280_v17 = vld [vmem:[%s17278_s1 + $0xc] sm:$0xf] }
  0xfa   : > { %12746 = vmatmul.mubr.msk.f32.gmra.mrb[8].mxu0 %vm312_vm1, %v14691_v27 }
  0xfb   : > { %12196 = vmatmul.mubr.msk.f32.gmra.mrb[40].mxu1 %vm312_vm1, %v14659_v19  ;;  %12748 = vmatprep.mubr.msk.f32.mxu0 %vm312_vm1, %v14695_v29  ;;  %v10771_v19 = vld [vmem:[%s17278_s1 + $0x20] sm:$0xf] }
  0xfc   : > { %12198 = vmatprep.mubr.msk.f32.mxu1 %vm312_vm1, %v14663_v21  ;;  %12831 = vmatprep.subr.msk.mxu0 %vm566_vm0, %v10771_v19  ;;  %v17413_v21 = vld [vmem:[#allocation6_spill] sm:$0xff] }
  0xfd   : > { %12832 = vmatpush3.msk.msra.mxu0 %vm566_vm0, %v10771_v19 }
  0xfe   : > { %12749 = vmatmul.mubr.msk.f32.gmra.mrb[10].mxu0 %vm312_vm1, %v14707_v31 }
  0xff   : > { %12199 = vmatmul.mubr.msk.f32.gmra.mrb[42].mxu1 %vm312_vm1, %v14675_v23  ;;  %12751 = vmatprep.mubr.msk.f32.mxu0 %vm312_vm1, %v14709_v33  ;;  %v17415_v23 = vld [vmem:[#allocation8_spill] sm:$0xff] }
 0x100   : > { %12201 = vmatprep.mubr.msk.f32.mxu1 %vm312_vm1, %v14679_v25  ;;  %v17417_v25 = vld [vmem:[#allocation10_spill] sm:$0xff] }
 0x102   : > { %12752 = vmatmul.mubr.msk.f32.gmra.mrb[12].mxu0 %vm312_vm1, %v14720_v34 }
 0x103   : > { %12202 = vmatmul.mubr.msk.f32.gmra.mrb[44].mxu1 %vm312_vm1, %v14691_v27  ;;  %12754 = vmatprep.mubr.msk.f32.mxu0 %vm312_vm1, %v15030_v48  ;;  %v17419_v27 = vld [vmem:[#allocation12_spill] sm:$0xff] }
 0x104   : > { %12204 = vmatprep.mubr.msk.f32.mxu1 %vm312_vm1, %v14695_v29  ;;  %v17421_v29 = vld [vmem:[#allocation14_spill] sm:$0xff] }
 0x106   : > { %12755 = vmatmul.mubr.msk.f32.gmra.mrb[14].mxu0 %vm312_vm1, %v15038_v51 }
 0x107   : > { %12205 = vmatmul.mubr.msk.f32.gmra.mrb[46].mxu1 %vm312_vm1, %v14707_v31  ;;  %12757 = vmatprep.mubr.msk.f32.mxu0 %vm312_vm1, %v15042_v53  ;;  %v17423_v31 = vld [vmem:[#allocation16_spill] sm:$0xff] }
 0x108   : > { %12207 = vmatprep.mubr.msk.f32.mxu1 %vm312_vm1, %v14709_v33  ;;  %v17424_v33 = vld [vmem:[#allocation17_spill] sm:$0xff] }
 0x10a   : > { %12758 = vmatmul.mubr.msk.f32.gmra.mrb[16].mxu0 %vm312_vm1, %v15050_v55 }
 0x10b   : > { %12208 = vmatmul.mubr.msk.f32.gmra.mrb[48].mxu1 %vm312_vm1, %v14720_v34  ;;  %12760 = vmatprep.mubr.msk.f32.mxu0 %vm312_vm1, %v15054_v57  ;;  %v17425_v34 = vld [vmem:[#allocation18_spill] sm:$0xff] }
 0x10c   : > { %12210 = vmatprep.mubr.msk.f32.mxu1 %vm312_vm1, %v15030_v48  ;;  %v2406_v48 = vld [vmem:[#allocation2 + $0x107] sm:$0xff] }
 0x10e   : > { %12761 = vmatmul.mubr.msk.f32.gmra.mrb[18].mxu0 %vm312_vm1, %v15062_v59 }
 0x10f   : > { %12211 = vmatmul.mubr.msk.f32.gmra.mrb[50].mxu1 %vm312_vm1, %v15038_v51  ;;  %12763 = vmatprep.mubr.msk.f32.mxu0 %vm312_vm1, %v15066_v60  ;;  %v2407_v51 = vld [vmem:[#allocation2 + $0x10f] sm:$0xff] }
 0x110   : > { %12213 = vmatprep.mubr.msk.f32.mxu1 %vm312_vm1, %v15042_v53  ;;  %v2408_v53 = vld [vmem:[#allocation2 + $0x127] sm:$0xff] }
 0x112   : > { %12764 = vmatmul.mubr.msk.f32.gmra.mrb[20].mxu0 %vm312_vm1, %v15074_v61 }
 0x113   : > { %12214 = vmatmul.mubr.msk.f32.gmra.mrb[52].mxu1 %vm312_vm1, %v15050_v55  ;;  %12766 = vmatprep.mubr.msk.f32.mxu0 %vm312_vm1, %v15078_v62  ;;  %v15538_v55 = vld [vmem:[#allocation2 + $0x229] sm:$0xff] }
 0x114   : > { %12216 = vmatprep.mubr.msk.f32.mxu1 %vm312_vm1, %v15054_v57  ;;  %17430 = vst [vmem:[#allocation5_spill] sm:$0xff] %v15538_v55  ;;  %v2409_v57 = vld [vmem:[#allocation2 + $0x12f] sm:$0xff] }
 0x116   : > { %12767 = vmatmul.mubr.msk.f32.gmra.mrb[22].mxu0 %vm312_vm1, %v15086_v0 }
 0x117   : > { %12217 = vmatmul.mubr.msk.f32.gmra.mrb[54].mxu1 %vm312_vm1, %v15062_v59  ;;  %12769 = vmatprep.mubr.msk.f32.mxu0 %vm312_vm1, %v15091_v1  ;;  %v15543_v59 = vld [vmem:[#allocation2 + $0x231] sm:$0xff] }
 0x118   : > { %12219 = vmatprep.mubr.msk.f32.mxu1 %vm312_vm1, %v15066_v60  ;;  %17431 = vst [vmem:[#allocation6_spill] sm:$0xff] %v15543_v59  ;;  %v2410_v60 = vld [vmem:[#allocation2 + $0x147] sm:$0xff] }
 0x11a   : > { %12770 = vmatmul.mubr.msk.f32.gmra.mrb[24].mxu0 %vm312_vm1, %v15099_v3 }
 0x11b   : > { %12220 = vmatmul.mubr.msk.f32.gmra.mrb[56].mxu1 %vm312_vm1, %v15074_v61  ;;  %12772 = vmatprep.mubr.msk.f32.mxu0 %vm312_vm1, %v15104_v4  ;;  %v2411_v61 = vld [vmem:[#allocation2 + $0x14f] sm:$0xff] }
 0x11c   : > { %12222 = vmatprep.mubr.msk.f32.mxu1 %vm312_vm1, %v15078_v62  ;;  %v2412_v62 = vld [vmem:[#allocation2 + $0x167] sm:$0xff] }
 0x11e   : > { %12773 = vmatmul.mubr.msk.f32.gmra.mrb[26].mxu0 %vm312_vm1, %v15114_v8 }
 0x11f   : > { %12223 = vmatmul.mubr.msk.f32.gmra.mrb[58].mxu1 %vm312_vm1, %v15086_v0  ;;  %12775 = vmatprep.mubr.msk.f32.mxu0 %vm312_vm1, %v15256_v52  ;;  %v2414_v0 = vld [vmem:[#allocation2 + $0x187] sm:$0xff] }
 0x120   : > { %12225 = vmatprep.mubr.msk.f32.mxu1 %vm312_vm1, %v15091_v1  ;;  %v2415_v1 = vld [vmem:[#allocation2 + $0x18f] sm:$0xff] }
 0x122   : > { %12776 = vmatmul.mubr.msk.f32.gmra.mrb[28].mxu0 %vm312_vm1, %v15262_v7 }
 0x123   : > { %12226 = vmatmul.mubr.msk.f32.gmra.mrb[60].mxu1 %vm312_vm1, %v15099_v3  ;;  %12778 = vmatprep.mubr.msk.f32.mxu0 %vm312_vm1, %v5031_v11  ;;  %v2417_v3 = vld [vmem:[#allocation2 + $0x1af] sm:$0xff] }
 0x124   : > { %12228 = vmatprep.mubr.msk.f32.mxu1 %vm312_vm1, %v15104_v4  ;;  %v2418_v4 = vld [vmem:[#allocation2 + $0x1c7] sm:$0xff] }
 0x126   : > { %12779 = vmatmul.mubr.msk.f32.gmra.mrb[30].mxu0 %vm312_vm1, %v15275_v15 }
 0x127   : > { %12229 = vmatmul.mubr.msk.f32.gmra.mrb[62].mxu1 %vm312_vm1, %v15114_v8  ;;  %12833 = vmatprep.mubr.msk.f32.mxu0 %vm312_vm1, %v14754_v37  ;;  %v2419_v8 = vld [vmem:[#allocation2 + $0x1cf] sm:$0xff] }
 0x128   : > { %12233 = vmatprep.mubr.msk.f32.mxu1 %vm312_vm1, %v15264_v9 }
 0x12a   : > { %12834 = vmatmul.mubr.msk.f32.vlgmr.msra.gmra.mrb[0].mxu0 %vm312_vm1, %v14760_v40 }
 0x12b   : > { %12234 = vmatmul.mubr.msk.f32.vlgmr.msra.gmra.mrb[0].mxu1 %vm312_vm1, %v15272_v13  ;;  %12836 = vmatprep.mubr.msk.f32.mxu0 %vm312_vm1, %v14767_v44 }
 0x12c   : > { %12282 = vmatpush3.msk.msra.mxu1 %vm566_vm0, %v15130_v16  ;;  %12236 = vmatprep.mubr.msk.f32.mxu1 %vm312_vm1, %v14736_v39  ;;  %v10533_v16 = vld [vmem:[%s17280_s3 + $0x10] sm:$0xf] }
 0x12d   : > { %12331 = vmatprep.subr.msk.mxu1 %vm566_vm0, %v15280_v17 }
 0x12e   : > { %12837 = vmatmul.mubr.msk.f32.gmra.mrb[2].mxu0 %vm312_vm1, %v14773_v45 }
 0x12f   : > { %12237 = vmatmul.mubr.msk.f32.gmra.mrb[2].mxu1 %vm312_vm1, %v14742_v41  ;;  %12839 = vmatprep.mubr.msk.f32.mxu0 %vm312_vm1, %v14780_v47 }
 0x130   : > { %12239 = vmatprep.mubr.msk.f32.mxu1 %vm312_vm1, %v14754_v37 }
 0x132   : > { %12840 = vmatmul.mubr.msk.f32.gmra.mrb[4].mxu0 %vm312_vm1, %v14786_v49 }
 0x133   : > { %12240 = vmatmul.mubr.msk.f32.gmra.mrb[4].mxu1 %vm312_vm1, %v14760_v40  ;;  %12842 = vmatprep.mubr.msk.f32.mxu0 %vm312_vm1, %v14793_v54 }
 0x134   : > { %12242 = vmatprep.mubr.msk.f32.mxu1 %vm312_vm1, %v14767_v44 }
 0x136   : > { %12843 = vmatmul.mubr.msk.f32.gmra.mrb[6].mxu0 %vm312_vm1, %v14799_v56 }
 0x137   : > { %12243 = vmatmul.mubr.msk.f32.gmra.mrb[6].mxu1 %vm312_vm1, %v14773_v45  ;;  %12845 = vmatprep.mubr.msk.f32.mxu0 %vm312_vm1, %v14806_v32 }
 0x138   : > { %12245 = vmatprep.mubr.msk.f32.mxu1 %vm312_vm1, %v14780_v47 }
 0x13a   : > { %12846 = vmatmul.mubr.msk.f32.gmra.mrb[8].mxu0 %vm312_vm1, %v14812_v35 }
 0x13b   : > { %12246 = vmatmul.mubr.msk.f32.gmra.mrb[8].mxu1 %vm312_vm1, %v14786_v49  ;;  %12848 = vmatprep.mubr.msk.f32.mxu0 %vm312_vm1, %v14819_v42 }
 0x13c   : > { %12248 = vmatprep.mubr.msk.f32.mxu1 %vm312_vm1, %v14793_v54 }
 0x13e   : > { %12849 = vmatmul.mubr.msk.f32.gmra.mrb[10].mxu0 %vm312_vm1, %v17412_v20 }
 0x13f   : > { %12249 = vmatmul.mubr.msk.f32.gmra.mrb[10].mxu1 %vm312_vm1, %v14799_v56  ;;  %12851 = vmatprep.mubr.msk.f32.mxu0 %vm312_vm1, %v17413_v21 }
 0x140   : > { %12251 = vmatprep.mubr.msk.f32.mxu1 %vm312_vm1, %v14806_v32 }
 0x142   : > { %12852 = vmatmul.mubr.msk.f32.gmra.mrb[12].mxu0 %vm312_vm1, %v17414_v22 }
 0x143   : > { %12252 = vmatmul.mubr.msk.f32.gmra.mrb[12].mxu1 %vm312_vm1, %v14812_v35  ;;  %12854 = vmatprep.mubr.msk.f32.mxu0 %vm312_vm1, %v17415_v23 }
 0x144   : > { %12254 = vmatprep.mubr.msk.f32.mxu1 %vm312_vm1, %v14819_v42 }
 0x146   : > { %12855 = vmatmul.mubr.msk.f32.gmra.mrb[14].mxu0 %vm312_vm1, %v17416_v24 }
 0x147   : > { %12255 = vmatmul.mubr.msk.f32.gmra.mrb[14].mxu1 %vm312_vm1, %v17412_v20  ;;  %12857 = vmatprep.mubr.msk.f32.mxu0 %vm312_vm1, %v17417_v25 }
 0x148   : > { %12257 = vmatprep.mubr.msk.f32.mxu1 %vm312_vm1, %v17413_v21 }
 0x14a   : > { %12858 = vmatmul.mubr.msk.f32.gmra.mrb[16].mxu0 %vm312_vm1, %v17418_v26 }
 0x14b   : > { %12258 = vmatmul.mubr.msk.f32.gmra.mrb[16].mxu1 %vm312_vm1, %v17414_v22  ;;  %12860 = vmatprep.mubr.msk.f32.mxu0 %vm312_vm1, %v17419_v27 }
 0x14c   : > { %12260 = vmatprep.mubr.msk.f32.mxu1 %vm312_vm1, %v17415_v23 }
 0x14e   : > { %12861 = vmatmul.mubr.msk.f32.gmra.mrb[18].mxu0 %vm312_vm1, %v17420_v28 }
 0x14f   : > { %12261 = vmatmul.mubr.msk.f32.gmra.mrb[18].mxu1 %vm312_vm1, %v17416_v24  ;;  %12863 = vmatprep.mubr.msk.f32.mxu0 %vm312_vm1, %v17421_v29 }
 0x150   : > { %12263 = vmatprep.mubr.msk.f32.mxu1 %vm312_vm1, %v17417_v25 }
 0x152   : > { %12864 = vmatmul.mubr.msk.f32.gmra.mrb[20].mxu0 %vm312_vm1, %v17422_v30 }
 0x153   : > { %12264 = vmatmul.mubr.msk.f32.gmra.mrb[20].mxu1 %vm312_vm1, %v17418_v26  ;;  %12866 = vmatprep.mubr.msk.f32.mxu0 %vm312_vm1, %v17423_v31 }
 0x154   : > { %12266 = vmatprep.mubr.msk.f32.mxu1 %vm312_vm1, %v17419_v27 }
 0x156   : > { %12867 = vmatmul.mubr.msk.f32.gmra.mrb[22].mxu0 %vm312_vm1, %v17424_v33 }
 0x157   : > { %12267 = vmatmul.mubr.msk.f32.gmra.mrb[22].mxu1 %vm312_vm1, %v17420_v28  ;;  %12869 = vmatprep.mubr.msk.f32.mxu0 %vm312_vm1, %v17425_v34 }
 0x158   : > { %12269 = vmatprep.mubr.msk.f32.mxu1 %vm312_vm1, %v17421_v29 }
 0x15a   : > { %12870 = vmatmul.mubr.msk.f32.gmra.mrb[24].mxu0 %vm312_vm1, %v17426_v36 }
 0x15b   : > { %12270 = vmatmul.mubr.msk.f32.gmra.mrb[24].mxu1 %vm312_vm1, %v17422_v30  ;;  %12872 = vmatprep.mubr.msk.f32.mxu0 %vm312_vm1, %v17427_v43 }
 0x15c   : > { %12272 = vmatprep.mubr.msk.f32.mxu1 %vm312_vm1, %v17423_v31 }
 0x15e   : > { %12873 = vmatmul.mubr.msk.f32.gmra.mrb[26].mxu0 %vm312_vm1, %v17428_v46 }
 0x15f   : > { %12273 = vmatmul.mubr.msk.f32.gmra.mrb[26].mxu1 %vm312_vm1, %v17424_v33  ;;  %12875 = vmatprep.mubr.msk.f32.mxu0 %vm312_vm1, %v14942_v5  ;;  %v2405_v5 = vld [vmem:[#allocation2 + $0xef] sm:$0xff] }
 0x160   : > { %12275 = vmatprep.mubr.msk.f32.mxu1 %vm312_vm1, %v17425_v34 }
 0x162   : > { %12876 = vmatmul.mubr.msk.f32.gmra.mrb[28].mxu0 %vm312_vm1, %v14950_v58  ;;  %v2404_v58 = vld [vmem:[#allocation2 + $0xe7] sm:$0xff] }
 0x163   : > { %12276 = vmatmul.mubr.msk.f32.gmra.mrb[28].mxu1 %vm312_vm1, %v17426_v36  ;;  %12878 = vmatprep.mubr.msk.f32.mxu0 %vm312_vm1, %v15538_v55  ;;  %v14304_v55 = vld [vmem:[#allocation2 + $0x47] sm:$0xff] }
 0x164   : > { %12278 = vmatprep.mubr.msk.f32.mxu1 %vm312_vm1, %v17427_v43 }
 0x166   : > { %12879 = vmatmul.mubr.msk.f32.gmra.mrb[30].mxu0 %vm312_vm1, %v15543_v59  ;;  %v16008_v59 = vld [vmem:[#allocation2 + $0x211] sm:$0xff] }
 0x167   : > { %12279 = vmatmul.mubr.msk.f32.gmra.mrb[30].mxu1 %vm312_vm1, %v17428_v46  ;;  %17458 = vst [vmem:[#allocation32_spill] sm:$0xff] %v16008_v59 }
 0x168   : > { %12283 = vmatprep.mubr.msk.f32.mxu1 %vm312_vm1, %v15264_v9 }
 0x16b   : > { %12284 = vmatmul.mubr.msk.f32.vlgmr.msra.gmra.mrb[32].mxu1 %vm312_vm1, %v15272_v13 }
 0x16c   : > { %12332 = vmatpush3.msk.msra.mxu1 %vm566_vm0, %v15280_v17  ;;  %12286 = vmatprep.mubr.msk.f32.mxu1 %vm312_vm1, %v14736_v39  ;;  %v15483_v39 = vld [vmem:[#allocation2 + $0x27] sm:$0xff] }
 0x16d   : > { %12381 = vmatprep.subr.msk.mxu1 %vm566_vm0, %v10465_v38 }
 0x16f   : > { %12287 = vmatmul.mubr.msk.f32.gmra.mrb[34].mxu1 %vm312_vm1, %v14742_v41  ;;  %v15489_v41 = vld [vmem:[#allocation2 + $0x2f] sm:$0xff] }
 0x170   : > { %12289 = vmatprep.mubr.msk.f32.mxu1 %vm312_vm1, %v14754_v37  ;;  %v15491_v37 = vld [vmem:[#allocation2 + $0x47] sm:$0xff] }
 0x173   : > { %12290 = vmatmul.mubr.msk.f32.gmra.mrb[36].mxu1 %vm312_vm1, %v14760_v40  ;;  %v15498_v40 = vld [vmem:[#allocation2 + $0x4f] sm:$0xff] }
 0x174   : > { %12292 = vmatprep.mubr.msk.f32.mxu1 %vm312_vm1, %v14767_v44  ;;  %v15500_v44 = vld [vmem:[#allocation2 + $0x67] sm:$0xff] }
 0x177   : > { %12293 = vmatmul.mubr.msk.f32.gmra.mrb[38].mxu1 %vm312_vm1, %v14773_v45  ;;  %v17429_v45 = vld [vmem:[#allocation4_spill] sm:$0xff] }
 0x178   : > { %12295 = vmatprep.mubr.msk.f32.mxu1 %vm312_vm1, %v14780_v47  ;;  %v15508_v47 = vld [vmem:[#allocation2 + $0x6f] sm:$0xff] }
 0x17b   : > { %12296 = vmatmul.mubr.msk.f32.gmra.mrb[40].mxu1 %vm312_vm1, %v14786_v49  ;;  %v15510_v49 = vld [vmem:[#allocation2 + $0x87] sm:$0xff] }
 0x17c   : > { %12298 = vmatprep.mubr.msk.f32.mxu1 %vm312_vm1, %v14793_v54  ;;  %v15516_v54 = vld [vmem:[#allocation2 + $0x8f] sm:$0xff] }
 0x17f   : > { %12299 = vmatmul.mubr.msk.f32.gmra.mrb[42].mxu1 %vm312_vm1, %v14799_v56  ;;  %v15518_v56 = vld [vmem:[#allocation2 + $0xa7] sm:$0xff] }
 0x180   : > { %12301 = vmatprep.mubr.msk.f32.mxu1 %vm312_vm1, %v14806_v32  ;;  %v15524_v32 = vld [vmem:[#allocation2 + $0xaf] sm:$0xff] }
 0x183   : > { %12302 = vmatmul.mubr.msk.f32.gmra.mrb[44].mxu1 %vm312_vm1, %v14812_v35  ;;  %v15526_v35 = vld [vmem:[#allocation2 + $0xc7] sm:$0xff] }
 0x184   : > { %12304 = vmatprep.mubr.msk.f32.mxu1 %vm312_vm1, %v14819_v42  ;;  %v2403_v42 = vld [vmem:[#allocation2 + $0xcf] sm:$0xff] }
 0x187   : > { %12305 = vmatmul.mubr.msk.f32.gmra.mrb[46].mxu1 %vm312_vm1, %v17412_v20 }
 0x188   : > { %12307 = vmatprep.mubr.msk.f32.mxu1 %vm312_vm1, %v17413_v21 }
 0x18b   : > { %12308 = vmatmul.mubr.msk.f32.gmra.mrb[48].mxu1 %vm312_vm1, %v17414_v22 }
 0x18c   : > { %12310 = vmatprep.mubr.msk.f32.mxu1 %vm312_vm1, %v17415_v23 }
 0x18f   : > { %12311 = vmatmul.mubr.msk.f32.gmra.mrb[50].mxu1 %vm312_vm1, %v17416_v24 }
 0x190   : > { %12313 = vmatprep.mubr.msk.f32.mxu1 %vm312_vm1, %v17417_v25 }
 0x193   : > { %12314 = vmatmul.mubr.msk.f32.gmra.mrb[52].mxu1 %vm312_vm1, %v17418_v26 }
 0x194   : > { %12316 = vmatprep.mubr.msk.f32.mxu1 %vm312_vm1, %v17419_v27 }
 0x197   : > { %12317 = vmatmul.mubr.msk.f32.gmra.mrb[54].mxu1 %vm312_vm1, %v17420_v28 }
 0x198   : > { %12319 = vmatprep.mubr.msk.f32.mxu1 %vm312_vm1, %v17421_v29 }
 0x19b   : > { %12320 = vmatmul.mubr.msk.f32.gmra.mrb[56].mxu1 %vm312_vm1, %v17422_v30 }
 0x19c   : > { %12322 = vmatprep.mubr.msk.f32.mxu1 %vm312_vm1, %v17423_v31  ;;  %v15647_v31 = vld [vmem:[#allocation2 + $0x128] sm:$0xff] }
 0x19f   : > { %12323 = vmatmul.mubr.msk.f32.gmra.mrb[58].mxu1 %vm312_vm1, %v17424_v33  ;;  %v15653_v33 = vld [vmem:[#allocation2 + $0x130] sm:$0xff] }
 0x1a0   : > { %12325 = vmatprep.mubr.msk.f32.mxu1 %vm312_vm1, %v17425_v34  ;;  %v15655_v34 = vld [vmem:[#allocation2 + $0x148] sm:$0xff] }
 0x1a3   : > { %12326 = vmatmul.mubr.msk.f32.gmra.mrb[60].mxu1 %vm312_vm1, %v17426_v36  ;;  %v10601_v36 = vld [vmem:[%s17280_s3 + $0x14] sm:$0xf] }
 0x1a4   : > { %12328 = vmatprep.mubr.msk.f32.mxu1 %vm312_vm1, %v17427_v43  ;;  %v3065_v43 = vld [vmem:[#allocation2 + $0x170] sm:$0xff] }
 0x1a7   : > { %12329 = vmatmul.mubr.msk.f32.gmra.mrb[62].mxu1 %vm312_vm1, %v17428_v46  ;;  %v3066_v46 = vld [vmem:[#allocation2 + $0x188] sm:$0xff] }
 0x1a8   : > { %12333 = vmatprep.mubr.msk.f32.mxu1 %vm312_vm1, %v15483_v39 }
 0x1ab   : > { %12334 = vmatmul.mubr.msk.f32.vlgmr.msra.gmra.mrb[0].mxu1 %vm312_vm1, %v15489_v41 }
 0x1ac   : > { %12382 = vmatpush3.msk.msra.mxu1 %vm566_vm0, %v10465_v38  ;;  %12336 = vmatprep.mubr.msk.f32.mxu1 %vm312_vm1, %v15491_v37  ;;  %v3067_v38 = vld [vmem:[#allocation2 + $0x190] sm:$0xff] }
 0x1ad   : > { %13381 = vmatprep.subr.msk.mxu1 %vm566_vm0, %v17429_v45  ;;  %v15682_v45 = vld [vmem:[#allocation2 + $0x1f0] sm:$0xff] }
 0x1af   : > { %12337 = vmatmul.mubr.msk.f32.gmra.mrb[2].mxu1 %vm312_vm1, %v15498_v40 }
 0x1b0   : > { %12339 = vmatprep.mubr.msk.f32.mxu1 %vm312_vm1, %v15500_v44 }
 0x1b3   : > { %12340 = vmatmul.mubr.msk.f32.gmra.mrb[4].mxu1 %vm312_vm1, %v15508_v47 }
 0x1b4   : > { %12342 = vmatprep.mubr.msk.f32.mxu1 %vm312_vm1, %v15510_v49 }
 0x1b7   : > { %12343 = vmatmul.mubr.msk.f32.gmra.mrb[6].mxu1 %vm312_vm1, %v15516_v54 }
 0x1b8   : > { %12345 = vmatprep.mubr.msk.f32.mxu1 %vm312_vm1, %v15518_v56 }
 0x1bb   : > { %12346 = vmatmul.mubr.msk.f32.gmra.mrb[8].mxu1 %vm312_vm1, %v15524_v32 }
 0x1bc   : > { %12348 = vmatprep.mubr.msk.f32.mxu1 %vm312_vm1, %v15526_v35 }
 0x1bf   : > { %12349 = vmatmul.mubr.msk.f32.gmra.mrb[10].mxu1 %vm312_vm1, %v2403_v42 }
 0x1c0   : > { %12351 = vmatprep.mubr.msk.f32.mxu1 %vm312_vm1, %v2404_v58 }
 0x1c3   : > { %12352 = vmatmul.mubr.msk.f32.gmra.mrb[12].mxu1 %vm312_vm1, %v2405_v5 }
 0x1c4   : > { %12354 = vmatprep.mubr.msk.f32.mxu1 %vm312_vm1, %v2406_v48 }
 0x1c7   : > { %12355 = vmatmul.mubr.msk.f32.gmra.mrb[14].mxu1 %vm312_vm1, %v2407_v51 }
 0x1c8   : > { %12357 = vmatprep.mubr.msk.f32.mxu1 %vm312_vm1, %v2408_v53 }
 0x1cb   : > { %12358 = vmatmul.mubr.msk.f32.gmra.mrb[16].mxu1 %vm312_vm1, %v2409_v57 }
 0x1cc   : > { %12360 = vmatprep.mubr.msk.f32.mxu1 %vm312_vm1, %v2410_v60 }
 0x1cf   : > { %12361 = vmatmul.mubr.msk.f32.gmra.mrb[18].mxu1 %vm312_vm1, %v2411_v61 }
 0x1d0   : > { %12363 = vmatprep.mubr.msk.f32.mxu1 %vm312_vm1, %v2412_v62 }
 0x1d3   : > { %12364 = vmatmul.mubr.msk.f32.gmra.mrb[20].mxu1 %vm312_vm1, %v2413_v63 }
 0x1d4   : > { %12366 = vmatprep.mubr.msk.f32.mxu1 %vm312_vm1, %v2414_v0 }
 0x1d7   : > { %12367 = vmatmul.mubr.msk.f32.gmra.mrb[22].mxu1 %vm312_vm1, %v2415_v1 }
 0x1d8   : > { %12369 = vmatprep.mubr.msk.f32.mxu1 %vm312_vm1, %v2416_v2 }
 0x1db   : > { %12370 = vmatmul.mubr.msk.f32.gmra.mrb[24].mxu1 %vm312_vm1, %v2417_v3 }
 0x1dc   : > { %12372 = vmatprep.mubr.msk.f32.mxu1 %vm312_vm1, %v2418_v4 }
 0x1df   : > { %12373 = vmatmul.mubr.msk.f32.gmra.mrb[26].mxu1 %vm312_vm1, %v2419_v8 }
 0x1e0   : > { %12375 = vmatprep.mubr.msk.f32.mxu1 %vm312_vm1, %v2420_v12 }
 0x1e3   : > { %12376 = vmatmul.mubr.msk.f32.gmra.mrb[28].mxu1 %vm312_vm1, %v2421_v14 }
 0x1e4   : > { %12378 = vmatprep.mubr.msk.f32.mxu1 %vm312_vm1, %v15110_v6 }
 0x1e7   : > { %12379 = vmatmul.mubr.msk.f32.gmra.mrb[30].mxu1 %vm312_vm1, %v15118_v10 }
 0x1e8   : > { %12383 = vmatprep.mubr.msk.f32.mxu1 %vm312_vm1, %v15483_v39  ;;  %v3068_v39 = vld [vmem:[#allocation2 + $0x1a8] sm:$0xff] }
 0x1eb   : > { %12384 = vmatmul.mubr.msk.f32.vlgmr.msra.gmra.mrb[32].mxu1 %vm312_vm1, %v15489_v41  ;;  %v3069_v41 = vld [vmem:[#allocation2 + $0x1b0] sm:$0xff] }
 0x1ec   : > { %13382 = vmatpush3.msk.msra.mxu1 %vm566_vm0, %v14255_v18  ;;  %12386 = vmatprep.mubr.msk.f32.mxu1 %vm312_vm1, %v15491_v37  ;;  %v3070_v37 = vld [vmem:[#allocation2 + $0x1c8] sm:$0xff] }
 0x1ed   : > { %12481 = vmatprep.subr.msk.mxu1 %vm566_vm0, %v10533_v16 }
 0x1ef   : > { %12387 = vmatmul.mubr.msk.f32.gmra.mrb[34].mxu1 %vm312_vm1, %v15498_v40  ;;  %v3071_v40 = vld [vmem:[#allocation2 + $0x1d0] sm:$0xff] }
 0x1f0   : > { %12389 = vmatprep.mubr.msk.f32.mxu1 %vm312_vm1, %v15500_v44  ;;  %v3072_v44 = vld [vmem:[#allocation2 + $0x1e8] sm:$0xff] }
 0x1f3   : > { %12390 = vmatmul.mubr.msk.f32.gmra.mrb[36].mxu1 %vm312_vm1, %v15508_v47  ;;  %v14256_v47 = vld [vmem:[#allocation2 + $0x28] sm:$0xff] }
 0x1f4   : > { %12392 = vmatprep.mubr.msk.f32.mxu1 %vm312_vm1, %v15510_v49  ;;  %v15694_v49 = vld [vmem:[%s17280_s3 + $0x18] sm:$0xf] }
 0x1f7   : > { %12393 = vmatmul.mubr.msk.f32.gmra.mrb[38].mxu1 %vm312_vm1, %v15516_v54  ;;  %v14257_v54 = vld [vmem:[#allocation2 + $0x30] sm:$0xff] }
 0x1f8   : > { %12395 = vmatprep.mubr.msk.f32.mxu1 %vm312_vm1, %v15518_v56  ;;  %v15698_v56 = vld [vmem:[#allocation2 + $0x48] sm:$0xff] }
 0x1fb   : > { %12396 = vmatmul.mubr.msk.f32.gmra.mrb[40].mxu1 %vm312_vm1, %v15524_v32  ;;  %v15704_v32 = vld [vmem:[#allocation2 + $0x50] sm:$0xff] }
 0x1fc   : > { %12398 = vmatprep.mubr.msk.f32.mxu1 %vm312_vm1, %v15526_v35  ;;  %v15708_v35 = vld [vmem:[#allocation2 + $0x68] sm:$0xff] }
 0x1fd   : > { %v15596_v9 = vpop.f32.mrb[0].mxu0 }
 0x1fe   : > { %v15599_v11 = vpop.f32.mrb[1].mxu0 }
 0x1ff   : > { %12399 = vmatmul.mubr.msk.f32.gmra.mrb[42].mxu1 %vm312_vm1, %v2403_v42  ;;  %v15712_v42 = vld [vmem:[#allocation2 + $0x70] sm:$0xff] }
 0x200   : > { %12401 = vmatprep.mubr.msk.f32.mxu1 %vm312_vm1, %v2404_v58  ;;  %v15716_v58 = vld [vmem:[#allocation2 + $0x88] sm:$0xff] }
 0x201   : > { %v15602_v13 = vpop.f32.mrb[2].mxu0 }
 0x202   : > { %v15605_v17 = vpop.f32.mrb[3].mxu0 }
 0x203   : > { %12402 = vmatmul.mubr.msk.f32.gmra.mrb[44].mxu1 %vm312_vm1, %v2405_v5  ;;  %v15720_v5 = vld [vmem:[#allocation2 + $0x90] sm:$0xff] }
 0x204   : > { %12404 = vmatprep.mubr.msk.f32.mxu1 %vm312_vm1, %v2406_v48  ;;  %v15728_v48 = vld [vmem:[#allocation2 + $0xb0] sm:$0xff] }
 0x205   : > { %v15608_v19 = vpop.f32.mrb[4].mxu0 }
 0x206   : > { %v15611_v20 = vpop.f32.mrb[5].mxu0 }
 0x207   : > { %12405 = vmatmul.mubr.msk.f32.gmra.mrb[46].mxu1 %vm312_vm1, %v2407_v51  ;;  %v15732_v51 = vld [vmem:[#allocation2 + $0xc8] sm:$0xff] }
 0x208   : > { %12407 = vmatprep.mubr.msk.f32.mxu1 %vm312_vm1, %v2408_v53  ;;  %v15736_v53 = vld [vmem:[#allocation2 + $0xd0] sm:$0xff] }
 0x209   : > { %v15614_v21 = vpop.f32.mrb[6].mxu0 }
 0x20a   : > { %v15617_v22 = vpop.f32.mrb[7].mxu0 }
 0x20b   : > { %12408 = vmatmul.mubr.msk.f32.gmra.mrb[48].mxu1 %vm312_vm1, %v2409_v57  ;;  %v15740_v57 = vld [vmem:[#allocation2 + $0xe8] sm:$0xff] }
 0x20c   : > { %12410 = vmatprep.mubr.msk.f32.mxu1 %vm312_vm1, %v2410_v60  ;;  %v15744_v60 = vld [vmem:[#allocation2 + $0xf0] sm:$0xff] }
 0x20d   : > { %v15620_v23 = vpop.f32.mrb[8].mxu0 }
 0x20e   : > { %v15623_v24 = vpop.f32.mrb[9].mxu0 }
 0x20f   : > { %12411 = vmatmul.mubr.msk.f32.gmra.mrb[50].mxu1 %vm312_vm1, %v2411_v61  ;;  %v15748_v61 = vld [vmem:[#allocation2 + $0x108] sm:$0xff] }
 0x210   : > { %12413 = vmatprep.mubr.msk.f32.mxu1 %vm312_vm1, %v2412_v62  ;;  %v15752_v62 = vld [vmem:[#allocation2 + $0x110] sm:$0xff] }
 0x211   : > { %v15626_v25 = vpop.f32.mrb[10].mxu0 }
 0x212   : > { %v15629_v26 = vpop.f32.mrb[11].mxu0 }
 0x213   : > { %12414 = vmatmul.mubr.msk.f32.gmra.mrb[52].mxu1 %vm312_vm1, %v2413_v63  ;;  %v15774_v63 = vld [vmem:[%s17279_s2] ss:$0 sm:$0xff] }
 0x214   : > { %12416 = vmatprep.mubr.msk.f32.mxu1 %vm312_vm1, %v2414_v0 }
 0x215   : > { %v15632_v27 = vpop.f32.mrb[12].mxu0 }
 0x216   : > { %v15635_v28 = vpop.f32.mrb[13].mxu0 }
 0x217   : > { %12417 = vmatmul.mubr.msk.f32.gmra.mrb[54].mxu1 %vm312_vm1, %v2415_v1 }
 0x218   : > { %12419 = vmatprep.mubr.msk.f32.mxu1 %vm312_vm1, %v2416_v2 }
 0x219   : > { %v15638_v29 = vpop.f32.mrb[14].mxu0 }
 0x21a   : > { %v15641_v30 = vpop.f32.mrb[15].mxu0 }
 0x21b   : > { %12420 = vmatmul.mubr.msk.f32.gmra.mrb[56].mxu1 %vm312_vm1, %v2417_v3 }
 0x21c   : > { %12422 = vmatprep.mubr.msk.f32.mxu1 %vm312_vm1, %v2418_v4 }
 0x21d   : > { %v15781_v4 = vpop.f32.mrb[16].mxu0 }
 0x21f   : > { %12423 = vmatmul.mubr.msk.f32.gmra.mrb[58].mxu1 %vm312_vm1, %v2419_v8 }
 0x220   : > { %12425 = vmatprep.mubr.msk.f32.mxu1 %vm312_vm1, %v2420_v12  ;;  %v15786_v12 = vpop.f32.mrb[17].mxu0 }
 0x223   : > { %12426 = vmatmul.mubr.msk.f32.gmra.mrb[60].mxu1 %vm312_vm1, %v2421_v14 }
 0x224   : > { %12428 = vmatprep.mubr.msk.f32.mxu1 %vm312_vm1, %v15110_v6  ;;  %v15665_v6 = vld [vmem:[#allocation2 + $0x150] sm:$0xff] }
 0x227   : > { %12429 = vmatmul.mubr.msk.f32.gmra.mrb[62].mxu1 %vm312_vm1, %v15118_v10  ;;  %v15667_v10 = vld [vmem:[#allocation2 + $0x168] sm:$0xff] }
 0x228   : > { %12457 = vmatprep.mubr.msk.f32.mxu1 %vm312_vm1, %v15647_v31 }
 0x22b   : > { %12458 = vmatmul.mubr.msk.f32.vlgmr.msra.gmra.mrb[16].mxu1 %vm312_vm1, %v15653_v33 }
 0x22c   : > { %12482 = vmatpush3.msk.msra.mxu1 %vm566_vm0, %v10533_v16  ;;  %12460 = vmatprep.mubr.msk.f32.mxu1 %vm312_vm1, %v15655_v34 }
 0x22d   : > { %12581 = vmatprep.subr.msk.mxu1 %vm566_vm0, %v10601_v36 }
 0x22f   : > { %12461 = vmatmul.mubr.msk.f32.gmra.mrb[18].mxu1 %vm312_vm1, %v15665_v6 }
 0x230   : > { %12463 = vmatprep.mubr.msk.f32.mxu1 %vm312_vm1, %v15667_v10 }
 0x233   : > { %12464 = vmatmul.mubr.msk.f32.gmra.mrb[20].mxu1 %vm312_vm1, %v3065_v43 }
 0x234   : > { %12466 = vmatprep.mubr.msk.f32.mxu1 %vm312_vm1, %v3066_v46 }
 0x237   : > { %12467 = vmatmul.mubr.msk.f32.gmra.mrb[22].mxu1 %vm312_vm1, %v3067_v38 }
 0x238   : > { %12469 = vmatprep.mubr.msk.f32.mxu1 %vm312_vm1, %v3068_v39 }
 0x23b   : > { %12470 = vmatmul.mubr.msk.f32.gmra.mrb[24].mxu1 %vm312_vm1, %v3069_v41 }
 0x23c   : > { %12472 = vmatprep.mubr.msk.f32.mxu1 %vm312_vm1, %v3070_v37 }
 0x23f   : > { %12473 = vmatmul.mubr.msk.f32.gmra.mrb[26].mxu1 %vm312_vm1, %v3071_v40 }
 0x240   : > { %12475 = vmatprep.mubr.msk.f32.mxu1 %vm312_vm1, %v3072_v44 }
 0x243   : > { %12476 = vmatmul.mubr.msk.f32.gmra.mrb[28].mxu1 %vm312_vm1, %v15682_v45 }
 0x244   : > { %12478 = vmatprep.mubr.msk.f32.mxu1 %vm312_vm1, %v15256_v52 }
 0x247   : > { %12479 = vmatmul.mubr.msk.f32.gmra.mrb[30].mxu1 %vm312_vm1, %v15262_v7 }
 0x248   : > { %12483 = vmatprep.mubr.msk.f32.mxu1 %vm312_vm1, %v14256_v47 }
 0x24b   : > { %12484 = vmatmul.mubr.msk.f32.vlgmr.msra.gmra.mrb[32].mxu1 %vm312_vm1, %v14257_v54 }
 0x24c   : > { %12582 = vmatpush3.msk.msra.mxu1 %vm566_vm0, %v10601_v36  ;;  %12486 = vmatprep.mubr.msk.f32.mxu1 %vm312_vm1, %v15698_v56 }
 0x24d   : > { %12681 = vmatprep.subr.msk.mxu1 %vm566_vm0, %v15694_v49 }
 0x24f   : > { %12487 = vmatmul.mubr.msk.f32.gmra.mrb[34].mxu1 %vm312_vm1, %v15704_v32 }
 0x250   : > { %12489 = vmatprep.mubr.msk.f32.mxu1 %vm312_vm1, %v15708_v35 }
 0x253   : > { %12490 = vmatmul.mubr.msk.f32.gmra.mrb[36].mxu1 %vm312_vm1, %v15712_v42 }
 0x254   : > { %12492 = vmatprep.mubr.msk.f32.mxu1 %vm312_vm1, %v15716_v58 }
 0x257   : > { %12493 = vmatmul.mubr.msk.f32.gmra.mrb[38].mxu1 %vm312_vm1, %v15720_v5 }
 0x258   : > { %12495 = vmatprep.mubr.msk.f32.mxu1 %vm312_vm1, %v15724_v50 }
 0x25b   : > { %12496 = vmatmul.mubr.msk.f32.gmra.mrb[40].mxu1 %vm312_vm1, %v15728_v48 }
 0x25c   : > { %12498 = vmatprep.mubr.msk.f32.mxu1 %vm312_vm1, %v15732_v51 }
 0x25f   : > { %12499 = vmatmul.mubr.msk.f32.gmra.mrb[42].mxu1 %vm312_vm1, %v15736_v53 }
 0x260   : > { %12501 = vmatprep.mubr.msk.f32.mxu1 %vm312_vm1, %v15740_v57 }
 0x263   : > { %12502 = vmatmul.mubr.msk.f32.gmra.mrb[44].mxu1 %vm312_vm1, %v15744_v60 }
 0x264   : > { %12504 = vmatprep.mubr.msk.f32.mxu1 %vm312_vm1, %v15748_v61 }
 0x267   : > { %12505 = vmatmul.mubr.msk.f32.gmra.mrb[46].mxu1 %vm312_vm1, %v15752_v62 }
 0x268   : > { %12507 = vmatprep.mubr.msk.f32.mxu1 %vm312_vm1, %v15647_v31 }
 0x26b   : > { %12508 = vmatmul.mubr.msk.f32.gmra.mrb[48].mxu1 %vm312_vm1, %v15653_v33 }
 0x26c   : > { %12510 = vmatprep.mubr.msk.f32.mxu1 %vm312_vm1, %v15655_v34  ;;  %v15797_v34 = vpop.f32.mrb[18].mxu0 }
 0x26d   : > { %v15802_v36 = vpop.f32.mrb[19].mxu0 }
 0x26f   : > { %12511 = vmatmul.mubr.msk.f32.gmra.mrb[50].mxu1 %vm312_vm1, %v15665_v6 }
 0x270   : > { %12513 = vmatprep.mubr.msk.f32.mxu1 %vm312_vm1, %v15667_v10 }
 0x273   : > { %12514 = vmatmul.mubr.msk.f32.gmra.mrb[52].mxu1 %vm312_vm1, %v3065_v43 }
 0x274   : > { %12516 = vmatprep.mubr.msk.f32.mxu1 %vm312_vm1, %v3066_v46 }
 0x277   : > { %12517 = vmatmul.mubr.msk.f32.gmra.mrb[54].mxu1 %vm312_vm1, %v3067_v38  ;;  %v15812_v38 = vpop.f32.mrb[20].mxu0 }
 0x278   : > { %12519 = vmatprep.mubr.msk.f32.mxu1 %vm312_vm1, %v3068_v39  ;;  %v15817_v39 = vpop.f32.mrb[21].mxu0 }
 0x27b   : > { %12520 = vmatmul.mubr.msk.f32.gmra.mrb[56].mxu1 %vm312_vm1, %v3069_v41 }
 0x27c   : > { %12522 = vmatprep.mubr.msk.f32.mxu1 %vm312_vm1, %v3070_v37 }
 0x27e   : > { %v12335_v0 = vpop.f32.mrb[0].mxu1 }
 0x27f   : > { %v13383_v1 = vadd.f32 %v12335_v0, %v15774_v63  ;;  %v2591_v2 = vpop.f32.mrb[1].mxu1  ;;  %12523 = vmatmul.mubr.msk.f32.gmra.mrb[58].mxu1 %vm312_vm1, %v3071_v40 }
 0x280   : > { %v13385_v3 = vadd.f32 %v15774_v63, %v2591_v2  ;;  %12525 = vmatprep.mubr.msk.f32.mxu1 %vm312_vm1, %v3072_v44  ;;  %v14273_v44 = vld [vmem:[#allocation2 + $0x31] sm:$0xff] }
 0x281   : > { %v15784_v8 = vadd.f32 %v13383_v1, %v15596_v9 }
 0x282   : > { %v15789_v14 = vadd.f32 %v13385_v3, %v15599_v11  ;;  %v12338_v16 = vpop.f32.mrb[2].mxu1  ;;  %v15849_v3 = vld [vmem:[#allocation2 + $0x51] sm:$0xff] }
 0x283   : > { %17432 = vst [vmem:[#allocation7_spill] sm:$0xff] %v15784_v8  ;;  %v13387_v18 = vadd.f32 %v12338_v16, %v15774_v63  ;;  %v2601_v31 = vpop.f32.mrb[3].mxu1  ;;  %12526 = vmatmul.mubr.msk.f32.gmra.mrb[60].mxu1 %vm312_vm1, %v15682_v45  ;;  %v15832_v45 = vld [vmem:[#allocation2 + $0x49] sm:$0xff] }
 0x284   : > { %17433 = vst [vmem:[#allocation8_spill] sm:$0xff] %v15789_v14  ;;  %v13389_v33 = vadd.f32 %v15774_v63, %v2601_v31  ;;  %12528 = vmatprep.mubr.msk.f32.mxu1 %vm312_vm1, %v15256_v52  ;;  %v14272_v52 = vld [vmem:[#allocation2 + $0x29] sm:$0xff]  ;;  %v16000_v14 = vld [vmem:[#allocation2 + $0x1f1] sm:$0xff] }
 0x285   : > { %v15800_v9 = vadd.f32 %v13387_v18, %v15602_v13  ;;  %v15854_v16 = vld [vmem:[#allocation2 + $0x69] sm:$0xff]  ;;  %17456 = vst [vmem:[#allocation30_spill] sm:$0xff] %v16000_v14 }
 0x286   : > { %v15805_v11 = vadd.f32 %v13389_v33, %v15605_v17  ;;  %v12341_v6 = vpop.f32.mrb[4].mxu1  ;;  %v16004_v8 = vld [vmem:[#allocation2 + $0x209] sm:$0xff] }
 0x287   : > { %17434 = vst [vmem:[#allocation9_spill] sm:$0xff] %v15800_v9  ;;  %v13391_v10 = vadd.f32 %v12341_v6, %v15774_v63  ;;  %v2611_v43 = vpop.f32.mrb[5].mxu1  ;;  %12529 = vmatmul.mubr.msk.f32.gmra.mrb[62].mxu1 %vm312_vm1, %v15262_v7  ;;  %v15825_v7 = vld [vmem:[%s17280_s3 + $0x1c] sm:$0xf]  ;;  %v15996_v9 = vld [vmem:[#allocation2 + $0x1e9] sm:$0xff]  ;;  %17457 = vst [vmem:[#allocation31_spill] sm:$0xff] %v16004_v8 }
 0x288   : > { %17435 = vst [vmem:[#allocation10_spill] sm:$0xff] %v15805_v11  ;;  %v13393_v46 = vadd.f32 %v15774_v63, %v2611_v43  ;;  %12583 = vmatprep.mubr.msk.f32.mxu1 %vm312_vm1, %v14272_v52  ;;  %v15992_v11 = vld [vmem:[#allocation2 + $0x1d1] sm:$0xff]  ;;  %17455 = vst [vmem:[#allocation29_spill] sm:$0xff] %v15996_v9 }
 0x289   : > { %v15815_v13 = vadd.f32 %v13391_v10, %v15608_v19  ;;  %17454 = vst [vmem:[#allocation28_spill] sm:$0xff] %v15992_v11 }
 0x28a   : > { %v15820_v17 = vadd.f32 %v13393_v46, %v15611_v20  ;;  %v12344_v41 = vpop.f32.mrb[6].mxu1  ;;  %v15836_v20 = vpop.f32.mrb[22].mxu0  ;;  %v15869_v46 = vld [vmem:[#allocation2 + $0x71] sm:$0xff] }
 0x28b   : > { %17436 = vst [vmem:[#allocation11_spill] sm:$0xff] %v15815_v13  ;;  %v13395_v37 = vadd.f32 %v12344_v41, %v15774_v63  ;;  %v2621_v40 = vpop.f32.mrb[7].mxu1  ;;  %12584 = vmatmul.mubr.msk.f32.vlgmr.msra.gmra.mrb[32].mxu1 %vm312_vm1, %v14273_v44  ;;  %v15843_v54 = vpop.f32.mrb[23].mxu0  ;;  %v15874_v41 = vld [vmem:[#allocation2 + $0x89] sm:$0xff] }
 0x28c   : > { %17437 = vst [vmem:[#allocation12_spill] sm:$0xff] %v15820_v17  ;;  %v13397_v19 = vadd.f32 %v15774_v63, %v2621_v40  ;;  %12682 = vmatpush3.msk.msra.mxu1 %vm566_vm0, %v15694_v49  ;;  %12586 = vmatprep.mubr.msk.f32.mxu1 %vm312_vm1, %v15832_v45  ;;  %v15858_v18 = vpop.f32.mrb[24].mxu0  ;;  %v15984_v17 = vld [vmem:[#allocation2 + $0x1b1] sm:$0xff]  ;;  %v15988_v13 = vld [vmem:[#allocation2 + $0x1c9] sm:$0xff] }
 0x28d   : > { %v15839_v47 = vadd.f32 %v13395_v37, %v15614_v21  ;;  %12781 = vmatprep.subr.msk.mxu1 %vm566_vm0, %v15825_v7  ;;  %v15863_v31 = vpop.f32.mrb[25].mxu0  ;;  %17452 = vst [vmem:[#allocation26_spill] sm:$0xff] %v15984_v17  ;;  %17453 = vst [vmem:[#allocation27_spill] sm:$0xff] %v15988_v13 }
 0x28e   : > { %v15846_v0 = vadd.f32 %v13397_v19, %v15617_v22  ;;  %v12347_v1 = vpop.f32.mrb[8].mxu1 }
 0x28f   : > { %17438 = vst [vmem:[#allocation13_spill] sm:$0xff] %v15839_v47  ;;  %v13399_v49 = vadd.f32 %v12347_v1, %v15774_v63  ;;  %v2631_v2 = vpop.f32.mrb[9].mxu1  ;;  %12587 = vmatmul.mubr.msk.f32.gmra.mrb[34].mxu1 %vm312_vm1, %v15849_v3  ;;  %v15980_v47 = vld [vmem:[#allocation2 + $0x1a9] sm:$0xff] }
 0x290   : > { %17439 = vst [vmem:[#allocation14_spill] sm:$0xff] %v15846_v0  ;;  %v13401_v21 = vadd.f32 %v15774_v63, %v2631_v2  ;;  %12589 = vmatprep.mubr.msk.f32.mxu1 %vm312_vm1, %v15854_v16  ;;  %v15976_v0 = vld [vmem:[#allocation2 + $0x191] sm:$0xff]  ;;  %17451 = vst [vmem:[#allocation25_spill] sm:$0xff] %v15980_v47 }
 0x291   : > { %v15861_v22 = vadd.f32 %v13399_v49, %v15620_v23  ;;  %v15878_v23 = vpop.f32.mrb[26].mxu0  ;;  %v15889_v49 = vld [vmem:[#allocation2 + $0x91] sm:$0xff]  ;;  %17450 = vst [vmem:[#allocation24_spill] sm:$0xff] %v15976_v0 }
 0x292   : > { %v15866_v33 = vadd.f32 %v13401_v21, %v15623_v24  ;;  %v12350_v6 = vpop.f32.mrb[10].mxu1  ;;  %v15883_v37 = vpop.f32.mrb[27].mxu0  ;;  %v15894_v21 = vld [vmem:[#allocation2 + $0xa9] sm:$0xff] }
 0x293   : > { %17440 = vst [vmem:[#allocation15_spill] sm:$0xff] %v15861_v22  ;;  %v13403_v10 = vadd.f32 %v12350_v6, %v15774_v63  ;;  %v2641_v43 = vpop.f32.mrb[11].mxu1  ;;  %12590 = vmatmul.mubr.msk.f32.gmra.mrb[36].mxu1 %vm312_vm1, %v15869_v46  ;;  %v15972_v22 = vld [vmem:[#allocation2 + $0x189] sm:$0xff] }
 0x294   : > { %17441 = vst [vmem:[#allocation16_spill] sm:$0xff] %v15866_v33  ;;  %v13405_v52 = vadd.f32 %v15774_v63, %v2641_v43  ;;  %12592 = vmatprep.mubr.msk.f32.mxu1 %vm312_vm1, %v15874_v41  ;;  %v15968_v33 = vld [vmem:[#allocation2 + $0x171] sm:$0xff]  ;;  %17449 = vst [vmem:[#allocation23_spill] sm:$0xff] %v15972_v22 }
 0x295   : > { %v15881_v24 = vadd.f32 %v13403_v10, %v15626_v25  ;;  %v15898_v25 = vpop.f32.mrb[28].mxu0  ;;  %17448 = vst [vmem:[#allocation22_spill] sm:$0xff] %v15968_v33 }
 0x296   : > { %v15886_v40 = vadd.f32 %v13405_v52, %v15629_v26  ;;  %v12353_v44 = vpop.f32.mrb[12].mxu1  ;;  %v15903_v6 = vpop.f32.mrb[29].mxu0 }
 0x297   : > { %17442 = vst [vmem:[#allocation17_spill] sm:$0xff] %v15881_v24  ;;  %v13407_v19 = vadd.f32 %v12353_v44, %v15774_v63  ;;  %v2651_v1 = vpop.f32.mrb[13].mxu1  ;;  %12593 = vmatmul.mubr.msk.f32.gmra.mrb[38].mxu1 %vm312_vm1, %v15889_v49  ;;  %v15914_v24 = vld [vmem:[#allocation2 + $0xc9] sm:$0xff] }
 0x298   : > { %17443 = vst [vmem:[#allocation18_spill] sm:$0xff] %v15886_v40  ;;  %v13409_v2 = vadd.f32 %v15774_v63, %v2651_v1  ;;  %12595 = vmatprep.mubr.msk.f32.mxu1 %vm312_vm1, %v15894_v21  ;;  %v15909_v1 = vld [vmem:[#allocation2 + $0xb1] sm:$0xff] }
 0x299   : > { %v15901_v26 = vadd.f32 %v13407_v19, %v15632_v27  ;;  %v15918_v27 = vpop.f32.mrb[30].mxu0 }
 0x29a   : > { %v15906_v10 = vadd.f32 %v13409_v2, %v15635_v28  ;;  %v12356_v43 = vpop.f32.mrb[14].mxu1  ;;  %v15923_v19 = vpop.f32.mrb[31].mxu0 }
 0x29b   : > { %17444 = vst [vmem:[#allocation19_spill] sm:$0xff] %v15901_v26  ;;  %v13411_v52 = vadd.f32 %v12356_v43, %v15774_v63  ;;  %v2661_v44 = vpop.f32.mrb[15].mxu1  ;;  %12596 = vmatmul.mubr.msk.f32.gmra.mrb[40].mxu1 %vm312_vm1, %v15909_v1  ;;  %v15928_v43 = vld [vmem:[#allocation2 + $0xd1] sm:$0xff]  ;;  %v15964_v26 = vld [vmem:[#allocation2 + $0x169] sm:$0xff] }
 0x29c   : > { %17445 = vst [vmem:[#allocation20_spill] sm:$0xff] %v15906_v10  ;;  %v13413_v40 = vadd.f32 %v15774_v63, %v2661_v44  ;;  %12598 = vmatprep.mubr.msk.f32.mxu1 %vm312_vm1, %v15914_v24  ;;  %v15932_v44 = vld [vmem:[#allocation2 + $0xe9] sm:$0xff]  ;;  %v15936_v10 = vld [vmem:[#allocation2 + $0xf1] sm:$0xff] }
 0x29d   : > { %v15921_v28 = vadd.f32 %v13411_v52, %v15638_v29  ;;  %v15940_v29 = vld [vmem:[#allocation2 + $0x109] sm:$0xff]  ;;  %v15952_v52 = vld [vmem:[#allocation2 + $0x131] sm:$0xff] }
 0x29e   : > { %v15926_v2 = vadd.f32 %v13413_v40, %v15641_v30  ;;  %v15944_v30 = vld [vmem:[#allocation2 + $0x111] sm:$0xff]  ;;  %v15948_v40 = vld [vmem:[#allocation2 + $0x129] sm:$0xff] }
 0x29f   : > { %17446 = vst [vmem:[#allocation21_spill] sm:$0xff] %v15921_v28  ;;  %12599 = vmatmul.mubr.msk.f32.gmra.mrb[42].mxu1 %vm312_vm1, %v15928_v43  ;;  %v15960_v28 = vld [vmem:[#allocation2 + $0x151] sm:$0xff] }
 0x2a0   : > { %17447 = vst [vmem:[#allocation4_spill] sm:$0xff] %v15926_v2  ;;  %12601 = vmatprep.mubr.msk.f32.mxu1 %vm312_vm1, %v15932_v44  ;;  %v15956_v2 = vld [vmem:[#allocation2 + $0x149] sm:$0xff] }
 0x2a3   : > { %12602 = vmatmul.mubr.msk.f32.gmra.mrb[44].mxu1 %vm312_vm1, %v15936_v10 }
 0x2a4   : > { %12604 = vmatprep.mubr.msk.f32.mxu1 %vm312_vm1, %v15940_v29 }
 0x2a7   : > { %12605 = vmatmul.mubr.msk.f32.gmra.mrb[46].mxu1 %vm312_vm1, %v15944_v30 }
 0x2a8   : > { %12607 = vmatprep.mubr.msk.f32.mxu1 %vm312_vm1, %v15948_v40 }
 0x2ab   : > { %12608 = vmatmul.mubr.msk.f32.gmra.mrb[48].mxu1 %vm312_vm1, %v15952_v52 }
 0x2ac   : > { %12610 = vmatprep.mubr.msk.f32.mxu1 %vm312_vm1, %v15956_v2 }
 0x2af   : > { %12611 = vmatmul.mubr.msk.f32.gmra.mrb[50].mxu1 %vm312_vm1, %v15960_v28 }
 0x2b0   : > { %12613 = vmatprep.mubr.msk.f32.mxu1 %vm312_vm1, %v15964_v26 }
 0x2b3   : > { %12614 = vmatmul.mubr.msk.f32.gmra.mrb[52].mxu1 %vm312_vm1, %v15968_v33  ;;  %v14334_v33 = vld [vmem:[#allocation2 + $0x227] sm:$0xff] }
 0x2b4   : > { %12616 = vmatprep.mubr.msk.f32.mxu1 %vm312_vm1, %v15972_v22 }
 0x2b7   : > { %12617 = vmatmul.mubr.msk.f32.gmra.mrb[54].mxu1 %vm312_vm1, %v15976_v0  ;;  %v14332_v0 = vld [vmem:[#allocation2 + $0x207] sm:$0xff] }
 0x2b8   : > { %12619 = vmatprep.mubr.msk.f32.mxu1 %vm312_vm1, %v15980_v47 }
 0x2bb   : > { %12620 = vmatmul.mubr.msk.f32.gmra.mrb[56].mxu1 %vm312_vm1, %v15984_v17  ;;  %v14314_v17 = vld [vmem:[#allocation2 + $0xe7] sm:$0xff] }
 0x2bc   : > { %12622 = vmatprep.mubr.msk.f32.mxu1 %vm312_vm1, %v15988_v13  ;;  %v14310_v13 = vld [vmem:[#allocation2 + $0xa7] sm:$0xff] }
 0x2bf   : > { %12623 = vmatmul.mubr.msk.f32.gmra.mrb[58].mxu1 %vm312_vm1, %v15992_v11  ;;  %v14305_v11 = vld [vmem:[#allocation2 + $0x4f] sm:$0xff] }
 0x2c0   : > { %12625 = vmatprep.mubr.msk.f32.mxu1 %vm312_vm1, %v15996_v9  ;;  %v16016_v9 = vld [vmem:[%s17280_s3 + $0x20] sm:$0xf] }
 0x2c3   : > { %12626 = vmatmul.mubr.msk.f32.gmra.mrb[60].mxu1 %vm312_vm1, %v16000_v14  ;;  %v14309_v14 = vld [vmem:[#allocation2 + $0x8f] sm:$0xff] }
 0x2c4   : > { %12628 = vmatprep.mubr.msk.f32.mxu1 %vm312_vm1, %v16004_v8  ;;  %v14306_v8 = vld [vmem:[#allocation2 + $0x67] sm:$0xff] }
 0x2c7   : > { %12629 = vmatmul.mubr.msk.f32.gmra.mrb[62].mxu1 %vm312_vm1, %v16008_v59  ;;  %v14307_v59 = vld [vmem:[#allocation2 + $0x6f] sm:$0xff] }
 0x2c8   : > { %12683 = vmatprep.mubr.msk.f32.mxu1 %vm312_vm1, %v14304_v55  ;;  %v14308_v55 = vld [vmem:[#allocation2 + $0x87] sm:$0xff] }
 0x2cb   : > { %12684 = vmatmul.mubr.msk.f32.vlgmr.msra.gmra.mrb[32].mxu1 %vm312_vm1, %v14305_v11  ;;  %v14311_v11 = vld [vmem:[#allocation2 + $0xaf] sm:$0xff] }
 0x2cc   : > { %12782 = vmatpush3.msk.msra.mxu1 %vm566_vm0, %v15825_v7  ;;  %12686 = vmatprep.mubr.msk.f32.mxu1 %vm312_vm1, %v14306_v8  ;;  %v14312_v7 = vld [vmem:[#allocation2 + $0xc7] sm:$0xff]  ;;  %v14313_v8 = vld [vmem:[#allocation2 + $0xcf] sm:$0xff] }
 0x2cd   : > { %12881 = vmatprep.subr.msk.mxu1 %vm566_vm0, %v16016_v9 }
 0x2cf   : > { %12687 = vmatmul.mubr.msk.f32.gmra.mrb[34].mxu1 %vm312_vm1, %v14307_v59  ;;  %v14315_v59 = vld [vmem:[#allocation2 + $0xef] sm:$0xff] }
 0x2d0   : > { %12689 = vmatprep.mubr.msk.f32.mxu1 %vm312_vm1, %v14308_v55  ;;  %v14316_v55 = vld [vmem:[#allocation2 + $0x107] sm:$0xff] }
 0x2d3   : > { %12690 = vmatmul.mubr.msk.f32.gmra.mrb[36].mxu1 %vm312_vm1, %v14309_v14  ;;  %v14317_v14 = vld [vmem:[#allocation2 + $0x10f] sm:$0xff] }
 0x2d4   : > { %12692 = vmatprep.mubr.msk.f32.mxu1 %vm312_vm1, %v14310_v13  ;;  %v14318_v13 = vld [vmem:[#allocation2 + $0x127] sm:$0xff] }
 0x2d7   : > { %12693 = vmatmul.mubr.msk.f32.gmra.mrb[38].mxu1 %vm312_vm1, %v14311_v11  ;;  %v14319_v11 = vld [vmem:[#allocation2 + $0x12f] sm:$0xff] }
 0x2d8   : > { %12695 = vmatprep.mubr.msk.f32.mxu1 %vm312_vm1, %v14312_v7  ;;  %v14320_v7 = vld [vmem:[#allocation2 + $0x147] sm:$0xff] }
 0x2db   : > { %12696 = vmatmul.mubr.msk.f32.gmra.mrb[40].mxu1 %vm312_vm1, %v14313_v8  ;;  %v14321_v8 = vld [vmem:[#allocation2 + $0x14f] sm:$0xff] }
 0x2dc   : > { %12698 = vmatprep.mubr.msk.f32.mxu1 %vm312_vm1, %v14314_v17  ;;  %v14322_v17 = vld [vmem:[#allocation2 + $0x167] sm:$0xff] }
 0x2df   : > { %12699 = vmatmul.mubr.msk.f32.gmra.mrb[42].mxu1 %vm312_vm1, %v14315_v59  ;;  %v14323_v59 = vld [vmem:[#allocation2 + $0x16f] sm:$0xff] }
 0x2e0   : > { %12701 = vmatprep.mubr.msk.f32.mxu1 %vm312_vm1, %v14316_v55  ;;  %v14324_v55 = vld [vmem:[#allocation2 + $0x187] sm:$0xff] }
 0x2e3   : > { %12702 = vmatmul.mubr.msk.f32.gmra.mrb[44].mxu1 %vm312_vm1, %v14317_v14  ;;  %v14325_v14 = vld [vmem:[#allocation2 + $0x18f] sm:$0xff] }
 0x2e4   : > { %12704 = vmatprep.mubr.msk.f32.mxu1 %vm312_vm1, %v14318_v13  ;;  %v14326_v13 = vld [vmem:[#allocation2 + $0x1a7] sm:$0xff] }
 0x2e7   : > { %12705 = vmatmul.mubr.msk.f32.gmra.mrb[46].mxu1 %vm312_vm1, %v14319_v11  ;;  %v14327_v11 = vld [vmem:[#allocation2 + $0x1af] sm:$0xff] }
 0x2e8   : > { %12707 = vmatprep.mubr.msk.f32.mxu1 %vm312_vm1, %v14320_v7  ;;  %v14328_v7 = vld [vmem:[#allocation2 + $0x1c7] sm:$0xff] }
 0x2eb   : > { %12708 = vmatmul.mubr.msk.f32.gmra.mrb[48].mxu1 %vm312_vm1, %v14321_v8  ;;  %v14329_v8 = vld [vmem:[#allocation2 + $0x1cf] sm:$0xff] }
 0x2ec   : > { %12710 = vmatprep.mubr.msk.f32.mxu1 %vm312_vm1, %v14322_v17  ;;  %v14330_v17 = vld [vmem:[#allocation2 + $0x1e7] sm:$0xff] }
 0x2ef   : > { %12711 = vmatmul.mubr.msk.f32.gmra.mrb[50].mxu1 %vm312_vm1, %v14323_v59 }
 0x2f0   : > { %12713 = vmatprep.mubr.msk.f32.mxu1 %vm312_vm1, %v14324_v55 }
 0x2f3   : > { %12714 = vmatmul.mubr.msk.f32.gmra.mrb[52].mxu1 %vm312_vm1, %v14325_v14  ;;  %v14331_v14 = vld [vmem:[#allocation2 + $0x1ef] sm:$0xff] }
 0x2f4   : > { %12716 = vmatprep.mubr.msk.f32.mxu1 %vm312_vm1, %v14326_v13 }
 0x2f7   : > { %12717 = vmatmul.mubr.msk.f32.gmra.mrb[54].mxu1 %vm312_vm1, %v14327_v11 }
 0x2f8   : > { %12719 = vmatprep.mubr.msk.f32.mxu1 %vm312_vm1, %v14328_v7 }
 0x2fb   : > { %12720 = vmatmul.mubr.msk.f32.gmra.mrb[56].mxu1 %vm312_vm1, %v14329_v8 }
 0x2fc   : > { %12722 = vmatprep.mubr.msk.f32.mxu1 %vm312_vm1, %v14330_v17 }
 0x2fe   : > { %v12459_v59 = vpop.f32.mrb[16].mxu1 }
 0x2ff   : > { %v13415_v55 = vadd.f32 %v12459_v59, %v15774_v63  ;;  %v3323_v47 = vpop.f32.mrb[17].mxu1  ;;  %12723 = vmatmul.mubr.msk.f32.gmra.mrb[58].mxu1 %vm312_vm1, %v14331_v14  ;;  %v14333_v59 = vld [vmem:[#allocation2 + $0x20f] sm:$0xff] }
 0x300   : > { %v13417_v13 = vadd.f32 %v15774_v63, %v3323_v47  ;;  %12725 = vmatprep.mubr.msk.f32.mxu1 %vm312_vm1, %v14332_v0 }
 0x301   : > { %v16053_v11 = vadd.f32 %v13415_v55, %v15781_v4 }
 0x302   : > { %v16056_v7 = vadd.f32 %v13417_v13, %v15786_v12  ;;  %v12462_v8 = vpop.f32.mrb[18].mxu1  ;;  %v14335_v13 = vld [vmem:[#allocation2 + $0x22f] sm:$0xff] }
 0x303   : > { %17459 = vst [vmem:[#allocation33_spill] sm:$0xff] %v16053_v11  ;;  %v13419_v17 = vadd.f32 %v12462_v8, %v15774_v63  ;;  %v3333_v22 = vpop.f32.mrb[19].mxu1  ;;  %12726 = vmatmul.mubr.msk.f32.gmra.mrb[60].mxu1 %vm312_vm1, %v14333_v59  ;;  %v16610_v11 = vld [vmem:[%s17282_s5 + $0x20] sm:$0xff] }
 0x304   : > { %17460 = vst [vmem:[#allocation34_spill] sm:$0xff] %v16056_v7  ;;  %v13421_v14 = vadd.f32 %v15774_v63, %v3333_v22  ;;  %12728 = vmatprep.mubr.msk.f32.mxu1 %vm312_vm1, %v14334_v33  ;;  %v6552_v22 = vld [vmem:[%s17282_s5] sm:$0xff] }
 0x305   : > { %v16063_v47 = vadd.f32 %v13419_v17, %v15797_v34  ;;  %12931 = vmatprep.subr.mxu0 %v6552_v22 }
 0x306   : > { %v16066_v4 = vadd.f32 %v13421_v14, %v15802_v36  ;;  %v12465_v12 = vpop.f32.mrb[20].mxu1  ;;  %12932 = vmatpush3.msra.mxu0 %v6552_v22 }
 0x307   : > { %17461 = vst [vmem:[#allocation35_spill] sm:$0xff] %v16063_v47  ;;  %v13423_v0 = vadd.f32 %v12465_v12, %v15774_v63  ;;  %v3343_v55 = vpop.f32.mrb[21].mxu1  ;;  %12729 = vmatmul.mubr.msk.f32.gmra.mrb[62].mxu1 %vm312_vm1, %v14335_v13 }
 0x308   : > { %17462 = vst [vmem:[#allocation36_spill] sm:$0xff] %v16066_v4  ;;  %v13425_v8 = vadd.f32 %v15774_v63, %v3343_v55  ;;  %12783 = vmatprep.mubr.msk.f32.mxu1 %vm312_vm1, %v15698_v56 }
 0x309   : > { %v16077_v34 = vadd.f32 %v13423_v0, %v15812_v38 }
 0x30a   : > { %v16080_v36 = vadd.f32 %v13425_v8, %v15817_v39  ;;  %v12468_v33 = vpop.f32.mrb[22].mxu1 }
 0x30b   : > { %17463 = vst [vmem:[#allocation37_spill] sm:$0xff] %v16077_v34  ;;  %v13427_v17 = vadd.f32 %v12468_v33, %v15774_v63  ;;  %v3353_v59 = vpop.f32.mrb[23].mxu1  ;;  %12784 = vmatmul.mubr.msk.f32.vlgmr.msra.gmra.mrb[32].mxu1 %vm312_vm1, %v15704_v32 }
 0x30c   : > { %17464 = vst [vmem:[#allocation38_spill] sm:$0xff] %v16080_v36  ;;  %v13429_v14 = vadd.f32 %v15774_v63, %v3353_v59  ;;  %12882 = vmatpush3.msk.msra.mxu1 %vm566_vm0, %v16016_v9  ;;  %12786 = vmatprep.mubr.msk.f32.mxu1 %vm312_vm1, %v15708_v35  ;;  %v14346_v59 = vld [vmem:[#allocation2 + $0x1c8] sm:$0xff] }
 0x30d   : > { %v16091_v56 = vadd.f32 %v13427_v17, %v15836_v20  ;;  %v14345_v17 = vld [vmem:[#allocation2 + $0x1b0] sm:$0xff] }
 0x30e   : > { %v16094_v38 = vadd.f32 %v13429_v14, %v15843_v54  ;;  %v12471_v39 = vpop.f32.mrb[24].mxu1  ;;  %v14347_v14 = vld [vmem:[#allocation2 + $0x1d0] sm:$0xff] }
 0x30f   : > { %17465 = vst [vmem:[#allocation39_spill] sm:$0xff] %v16091_v56  ;;  %v13431_v12 = vadd.f32 %v12471_v39, %v15774_v63  ;;  %v3363_v0 = vpop.f32.mrb[25].mxu1  ;;  %12787 = vmatmul.mubr.msk.f32.gmra.mrb[34].mxu1 %vm312_vm1, %v15712_v42  ;;  %v14348_v39 = vld [vmem:[#allocation2 + $0x1e8] sm:$0xff] }
 0x310   : > { %17466 = vst [vmem:[#allocation40_spill] sm:$0xff] %v16094_v38  ;;  %v13433_v32 = vadd.f32 %v15774_v63, %v3363_v0  ;;  %12789 = vmatprep.mubr.msk.f32.mxu1 %vm312_vm1, %v15716_v58  ;;  %v14350_v0 = vld [vmem:[#allocation2 + $0x208] sm:$0xff] }
 0x311   : > { %v16103_v35 = vadd.f32 %v13431_v12, %v15858_v18  ;;  %v14349_v12 = vld [vmem:[#allocation2 + $0x1f0] sm:$0xff] }
 0x312   : > { %v16106_v9 = vadd.f32 %v13433_v32, %v15863_v31  ;;  %v12474_v20 = vpop.f32.mrb[26].mxu1  ;;  %v14351_v32 = vld [vmem:[#allocation2 + $0x210] sm:$0xff] }
 0x313   : > { %17467 = vst [vmem:[#allocation41_spill] sm:$0xff] %v16103_v35  ;;  %v13435_v54 = vadd.f32 %v12474_v20, %v15774_v63  ;;  %v3373_v55 = vpop.f32.mrb[27].mxu1  ;;  %12790 = vmatmul.mubr.msk.f32.gmra.mrb[36].mxu1 %vm312_vm1, %v15720_v5  ;;  %v14352_v20 = vld [vmem:[#allocation2 + $0x228] sm:$0xff] }
 0x314   : > { %17468 = vst [vmem:[#allocation42_spill] sm:$0xff] %v16106_v9  ;;  %v13437_v42 = vadd.f32 %v15774_v63, %v3373_v55  ;;  %12792 = vmatprep.mubr.msk.f32.mxu1 %vm312_vm1, %v15724_v50 }
 0x315   : > { %v16115_v58 = vadd.f32 %v13435_v54, %v15878_v23 }
 0x316   : > { %v16118_v18 = vadd.f32 %v13437_v42, %v15883_v37  ;;  %v12477_v31 = vpop.f32.mrb[28].mxu1 }
 0x317   : > { %17469 = vst [vmem:[#allocation43_spill] sm:$0xff] %v16115_v58  ;;  %v13439_v13 = vadd.f32 %v12477_v31, %v15774_v63  ;;  %v3383_v22 = vpop.f32.mrb[29].mxu1  ;;  %12793 = vmatmul.mubr.msk.f32.gmra.mrb[38].mxu1 %vm312_vm1, %v15728_v48 }
 0x318   : > { %17470 = vst [vmem:[#allocation44_spill] sm:$0xff] %v16118_v18  ;;  %v13441_v5 = vadd.f32 %v15774_v63, %v3383_v22  ;;  %12795 = vmatprep.mubr.msk.f32.mxu1 %vm312_vm1, %v15732_v51 }
 0x319   : > { %v16127_v50 = vadd.f32 %v13439_v13, %v15898_v25 }
 0x31a   : > { %v16130_v23 = vadd.f32 %v13441_v5, %v15903_v6  ;;  %v12480_v37 = vpop.f32.mrb[30].mxu1  ;;  %v14339_v6 = vld [vmem:[#allocation2 + $0x150] sm:$0xff] }
 0x31b   : > { %17471 = vst [vmem:[#allocation45_spill] sm:$0xff] %v16127_v50  ;;  %v13443_v8 = vadd.f32 %v12480_v37, %v15774_v63  ;;  %v3393_v33 = vpop.f32.mrb[31].mxu1  ;;  %12796 = vmatmul.mubr.msk.f32.gmra.mrb[40].mxu1 %vm312_vm1, %v15736_v53  ;;  %v14336_v53 = vld [vmem:[#allocation2 + $0x128] sm:$0xff] }
 0x31c   : > { %17472 = vst [vmem:[#allocation46_spill] sm:$0xff] %v16130_v23  ;;  %v13445_v48 = vadd.f32 %v15774_v63, %v3393_v33  ;;  %12798 = vmatprep.mubr.msk.f32.mxu1 %vm312_vm1, %v15740_v57  ;;  %v14337_v63 = vld [vmem:[#allocation2 + $0x130] sm:$0xff]  ;;  %v14338_v57 = vld [vmem:[#allocation2 + $0x148] sm:$0xff] }
 0x31d   : > { %v16139_v51 = vadd.f32 %v13443_v8, %v15918_v27  ;;  %v14340_v27 = vld [vmem:[#allocation2 + $0x168] sm:$0xff] }
 0x31e   : > { %v16142_v25 = vadd.f32 %v13445_v48, %v15923_v19  ;;  %v14344_v19 = vld [vmem:[#allocation2 + $0x1a8] sm:$0xff] }
 0x31f   : > { %17473 = vst [vmem:[#allocation47_spill] sm:$0xff] %v16139_v51  ;;  %12799 = vmatmul.mubr.msk.f32.gmra.mrb[42].mxu1 %vm312_vm1, %v15744_v60  ;;  %v14341_v60 = vld [vmem:[#allocation2 + $0x170] sm:$0xff] }
 0x320   : > { %17474 = vst [vmem:[#allocation48_spill] sm:$0xff] %v16142_v25  ;;  %12801 = vmatprep.mubr.msk.f32.mxu1 %vm312_vm1, %v15748_v61  ;;  %v14342_v61 = vld [vmem:[#allocation2 + $0x188] sm:$0xff] }
 0x323   : > { %12802 = vmatmul.mubr.msk.f32.gmra.mrb[44].mxu1 %vm312_vm1, %v15752_v62  ;;  %v14343_v62 = vld [vmem:[#allocation2 + $0x190] sm:$0xff] }
 0x324   : > { %12804 = vmatprep.mubr.msk.f32.mxu1 %vm312_vm1, %v14336_v53 }
 0x327   : > { %12805 = vmatmul.mubr.msk.f32.gmra.mrb[46].mxu1 %vm312_vm1, %v14337_v63 }
 0x328   : > { %12807 = vmatprep.mubr.msk.f32.mxu1 %vm312_vm1, %v14338_v57 }
 0x32b   : > { %12808 = vmatmul.mubr.msk.f32.gmra.mrb[48].mxu1 %vm312_vm1, %v14339_v6 }
 0x32c   : > { %12810 = vmatprep.mubr.msk.f32.mxu1 %vm312_vm1, %v14340_v27 }
 0x32f   : > { %12811 = vmatmul.mubr.msk.f32.gmra.mrb[50].mxu1 %vm312_vm1, %v14341_v60 }
 0x330   : > { %12813 = vmatprep.mubr.msk.f32.mxu1 %vm312_vm1, %v14342_v61 }
 0x333   : > { %12814 = vmatmul.mubr.msk.f32.gmra.mrb[52].mxu1 %vm312_vm1, %v14343_v62 }
 0x334   : > { %12816 = vmatprep.mubr.msk.f32.mxu1 %vm312_vm1, %v14344_v19 }
 0x337   : > { %12817 = vmatmul.mubr.msk.f32.gmra.mrb[54].mxu1 %vm312_vm1, %v14345_v17 }
 0x338   : > { %12819 = vmatprep.mubr.msk.f32.mxu1 %vm312_vm1, %v14346_v59 }
 0x33b   : > { %12820 = vmatmul.mubr.msk.f32.gmra.mrb[56].mxu1 %vm312_vm1, %v14347_v14 }
 0x33c   : > { %12822 = vmatprep.mubr.msk.f32.mxu1 %vm312_vm1, %v14348_v39 }
 0x33f   : > { %12823 = vmatmul.mubr.msk.f32.gmra.mrb[58].mxu1 %vm312_vm1, %v14349_v12 }
 0x340   : > { %12825 = vmatprep.mubr.msk.f32.mxu1 %vm312_vm1, %v14350_v0 }
 0x343   : > { %12826 = vmatmul.mubr.msk.f32.gmra.mrb[60].mxu1 %vm312_vm1, %v14351_v32 }
 0x344   : > { %12828 = vmatprep.mubr.msk.f32.mxu1 %vm312_vm1, %v14352_v20 }
 0x347   : > { %12829 = vmatmul.mubr.msk.f32.gmra.mrb[62].mxu1 %vm312_vm1, %v15275_v15  ;;  %v17475_v15 = vld [vmem:[#allocation22_spill] sm:$0xff] }
 0x348   : > { %12883 = vmatprep.mubr.msk.f32.mxu1 %vm312_vm1, %v15832_v45  ;;  %v17476_v45 = vld [vmem:[#allocation23_spill] sm:$0xff] }
 0x34b   : > { %12884 = vmatmul.mubr.msk.f32.vlgmr.msra.gmra.mrb[32].mxu1 %vm312_vm1, %v15849_v3  ;;  %v17477_v3 = vld [vmem:[#allocation24_spill] sm:$0xff] }
 0x34c   : > { %12886 = vmatprep.mubr.msk.f32.mxu1 %vm312_vm1, %v15854_v16  ;;  %v17478_v16 = vld [vmem:[#allocation25_spill] sm:$0xff] }
 0x34f   : > { %12887 = vmatmul.mubr.msk.f32.gmra.mrb[34].mxu1 %vm312_vm1, %v15869_v46  ;;  %v17479_v46 = vld [vmem:[#allocation26_spill] sm:$0xff] }
 0x350   : > { %12889 = vmatprep.mubr.msk.f32.mxu1 %vm312_vm1, %v15874_v41  ;;  %v17480_v41 = vld [vmem:[#allocation27_spill] sm:$0xff] }
 0x353   : > { %12890 = vmatmul.mubr.msk.f32.gmra.mrb[36].mxu1 %vm312_vm1, %v15889_v49  ;;  %v17482_v49 = vld [vmem:[#allocation29_spill] sm:$0xff] }
 0x354   : > { %12892 = vmatprep.mubr.msk.f32.mxu1 %vm312_vm1, %v15894_v21  ;;  %v17483_v21 = vld [vmem:[#allocation30_spill] sm:$0xff] }
 0x357   : > { %12893 = vmatmul.mubr.msk.f32.gmra.mrb[38].mxu1 %vm312_vm1, %v15909_v1  ;;  %v17486_v1 = vld [vmem:[#allocation5_spill] sm:$0xff] }
 0x358   : > { %12895 = vmatprep.mubr.msk.f32.mxu1 %vm312_vm1, %v15914_v24  ;;  %v17481_v24 = vld [vmem:[#allocation28_spill] sm:$0xff] }
 0x35b   : > { %12896 = vmatmul.mubr.msk.f32.gmra.mrb[40].mxu1 %vm312_vm1, %v15928_v43  ;;  %v16242_v43 = vld [vmem:[%s17281_s4] ss:$0 sm:$0xff] }
 0x35c   : > { %12898 = vmatprep.mubr.msk.f32.mxu1 %vm312_vm1, %v15932_v44 }
 0x35f   : > { %12899 = vmatmul.mubr.msk.f32.gmra.mrb[42].mxu1 %vm312_vm1, %v15936_v10  ;;  %v17485_v10 = vld [vmem:[#allocation32_spill] sm:$0xff] }
 0x360   : > { %12901 = vmatprep.mubr.msk.f32.mxu1 %vm312_vm1, %v15940_v29 }
 0x363   : > { %12902 = vmatmul.mubr.msk.f32.gmra.mrb[44].mxu1 %vm312_vm1, %v15944_v30 }
 0x364   : > { %12904 = vmatprep.mubr.msk.f32.mxu1 %vm312_vm1, %v15948_v40 }
 0x367   : > { %12905 = vmatmul.mubr.msk.f32.gmra.mrb[46].mxu1 %vm312_vm1, %v15952_v52 }
 0x368   : > { %12907 = vmatprep.mubr.msk.f32.mxu1 %vm312_vm1, %v15956_v2  ;;  %v16236_v2 = vld [vmem:[%s17282_s5 + $0x8] sm:$0xff] }
 0x369   : > { %12981 = vmatprep.subr.mxu0 %v16236_v2 }
 0x36b   : > { %12908 = vmatmul.mubr.msk.f32.gmra.mrb[48].mxu1 %vm312_vm1, %v15960_v28  ;;  %v17487_v28 = vld [vmem:[#allocation6_spill] sm:$0xff] }
 0x36c   : > { %12910 = vmatprep.mubr.msk.f32.mxu1 %vm312_vm1, %v15964_v26  ;;  %v17484_v26 = vld [vmem:[#allocation31_spill] sm:$0xff] }
 0x36f   : > { %12911 = vmatmul.mubr.msk.f32.gmra.mrb[50].mxu1 %vm312_vm1, %v17475_v15 }
 0x370   : > { %12913 = vmatprep.mubr.msk.f32.mxu1 %vm312_vm1, %v17476_v45 }
 0x373   : > { %12914 = vmatmul.mubr.msk.f32.gmra.mrb[52].mxu1 %vm312_vm1, %v17477_v3 }
 0x374   : > { %12916 = vmatprep.mubr.msk.f32.mxu1 %vm312_vm1, %v17478_v16 }
 0x377   : > { %12917 = vmatmul.mubr.msk.f32.gmra.mrb[54].mxu1 %vm312_vm1, %v17479_v46 }
 0x378   : > { %12919 = vmatprep.mubr.msk.f32.mxu1 %vm312_vm1, %v17480_v41 }
 0x37b   : > { %12920 = vmatmul.mubr.msk.f32.gmra.mrb[56].mxu1 %vm312_vm1, %v17481_v24 }
 0x37c   : > { %12922 = vmatprep.mubr.msk.f32.mxu1 %vm312_vm1, %v17482_v49 }
 0x37f   : > { %12923 = vmatmul.mubr.msk.f32.gmra.mrb[58].mxu1 %vm312_vm1, %v17483_v21 }
 0x380   : > { %12925 = vmatprep.mubr.msk.f32.mxu1 %vm312_vm1, %v17484_v26 }
 0x383   : > { %12926 = vmatmul.mubr.msk.f32.gmra.mrb[60].mxu1 %vm312_vm1, %v17485_v10 }
 0x384   : > { %12928 = vmatprep.mubr.msk.f32.mxu1 %vm312_vm1, %v17486_v1 }
 0x387   : > { %12929 = vmatmul.mubr.msk.f32.gmra.mrb[62].mxu1 %vm312_vm1, %v17487_v28 }
 0x41e   : > { %v12885_v44 = vpop.f32.mrb[32].mxu1 }
 0x41f   : > { %v13447_v29 = vadd.f32 %v12885_v44, %v16242_v43  ;;  %v6114_v30 = vpop.f32.mrb[33].mxu1 }
 0x420   : > { %v13448_v40 = vadd.f32 %v16242_v43, %v6114_v30 }
 0x421   : > { %vm6306_vm3 = vcmp.ge.f32.partialorder %v13447_v29, 0.0  ;;  %v6338_v52 = vmul.f32 0.2, %v13447_v29 }
 0x422   : > { %vm6305_vm5 = vcmp.ge.f32.partialorder %v13448_v40, 0.0  ;;  %v6337_v54 = vmul.f32 0.2, %v13448_v40  ;;  %v12888_v55 = vpop.f32.mrb[34].mxu1 }
 0x423   : > { %v6370_v42 = vsel %vm6306_vm3, %v13447_v29, %v6338_v52  ;;  %v13449_v31 = vadd.f32 %v12888_v55, %v16242_v43  ;;  %v6124_v13 = vpop.f32.mrb[35].mxu1 }
 0x424   : > { %6404 = vst.msk [vmem:[#allocation3 + $0x30] sm:$0xff] %vm6402_vm4, %v6370_v42  ;;  %v6369_v22 = vsel %vm6305_vm5, %v13448_v40, %v6337_v54  ;;  %v13450_v5 = vadd.f32 %v16242_v43, %v6124_v13 }
 0x425   : > { %6403 = vst.msk [vmem:[#allocation3 + $0x28] sm:$0xff] %vm6402_vm4, %v6369_v22  ;;  %vm6308_vm6 = vcmp.ge.f32.partialorder %v13449_v31, 0.0  ;;  %v6340_v37 = vmul.f32 0.2, %v13449_v31 }
 0x426   : > { %vm6307_vm7 = vcmp.ge.f32.partialorder %v13450_v5, 0.0  ;;  %v6339_v8 = vmul.f32 0.2, %v13450_v5  ;;  %v12891_v33 = vpop.f32.mrb[36].mxu1 }
 0x427   : > { %v6372_v48 = vsel %vm6308_vm6, %v13449_v31, %v6340_v37  ;;  %v13451_v53 = vadd.f32 %v12891_v33, %v16242_v43  ;;  %v6134_v63 = vpop.f32.mrb[37].mxu1 }
 0x428   : > { %6406 = vst.msk [vmem:[#allocation3 + $0x50] sm:$0xff] %vm6402_vm4, %v6372_v48  ;;  %6436 = vst.msk [vmem:[#allocation3 + $0x10] sm:$0xff] %vm6402_vm4, %v6372_v48  ;;  %v6371_v57 = vsel %vm6307_vm7, %v13450_v5, %v6339_v8  ;;  %v13452_v6 = vadd.f32 %v16242_v43, %v6134_v63 }
 0x429   : > { %6405 = vst.msk [vmem:[#allocation3 + $0x48] sm:$0xff] %vm6402_vm4, %v6371_v57  ;;  %6435 = vst.msk [vmem:[#allocation3 + $0x8] sm:$0xff] %vm6402_vm4, %v6371_v57  ;;  %vm6310_vm9 = vcmp.ge.f32.partialorder %v13451_v53, 0.0  ;;  %v6342_v27 = vmul.f32 0.2, %v13451_v53 }
 0x42a   : > { %vm6309_vm10 = vcmp.ge.f32.partialorder %v13452_v6, 0.0  ;;  %v6341_v60 = vmul.f32 0.2, %v13452_v6  ;;  %v12894_v61 = vpop.f32.mrb[38].mxu1 }
 0x42b   : > { %v6374_v62 = vsel %vm6310_vm9, %v13451_v53, %v6342_v27  ;;  %v13453_v19 = vadd.f32 %v12894_v61, %v16242_v43  ;;  %v6144_v17 = vpop.f32.mrb[39].mxu1  ;;  %v6478_v59 = vld [vmem:[#allocation3 + $0x36] sm:$0x1] }
 0x42c   : > { %6408 = vst.msk [vmem:[#allocation3 + $0x70] sm:$0xff] %vm6402_vm4, %v6374_v62  ;;  %v6373_v14 = vsel %vm6309_vm10, %v13452_v6, %v6341_v60  ;;  %v13454_v39 = vadd.f32 %v16242_v43, %v6144_v17  ;;  %v6441_v12 = vld [vmem:[#allocation3 + $0x29] sm:$0x1]  ;;  %v16287_v6 = vld [vmem:[%s17282_s5 + $0x10] sm:$0xff] }
 0x42d   : > { %6496 = vst.msk [vmem:[#allocation3 + $0x38] sm:$0x1] %vm6458_vm8, %v6478_v59  ;;  %vm6312_vm11 = vcmp.ge.f32.partialorder %v13453_v19, 0.0  ;;  %v6344_v0 = vmul.f32 0.2, %v13453_v19 }
 0x42e   : > { %6407 = vst.msk [vmem:[#allocation3 + $0x68] sm:$0xff] %vm6402_vm4, %v6373_v14  ;;  %vm6311_vm12 = vcmp.ge.f32.partialorder %v13454_v39, 0.0  ;;  %v6343_v32 = vmul.f32 0.2, %v13454_v39  ;;  %v12897_v20 = vpop.f32.mrb[40].mxu1 }
 0x42f   : > { %6460 = vst.msk [vmem:[#allocation3 + $0x27] sm:$0x1] %vm6458_vm8, %v6441_v12  ;;  %v6477_v15 = vld [vmem:[#allocation3 + $0x16] sm:$0x1]  ;;  %v6376_v45 = vsel %vm6312_vm11, %v13453_v19, %v6344_v0  ;;  %v13455_v3 = vadd.f32 %v12897_v20, %v16242_v43  ;;  %v6154_v16 = vpop.f32.mrb[41].mxu1 }
 0x430   : > { %6495 = vst.msk [vmem:[#allocation3 + $0x18] sm:$0x1] %vm6458_vm8, %v6477_v15  ;;  %v6375_v46 = vsel %vm6311_vm12, %v13454_v39, %v6343_v32  ;;  %v13456_v41 = vadd.f32 %v16242_v43, %v6154_v16  ;;  %v6440_v24 = vld [vmem:[#allocation3 + $0x9] sm:$0x1]  ;;  %v6479_v29 = vld [vmem:[#allocation3 + $0x56] sm:$0x1] }
 0x431   : > { %6410 = vst.msk [vmem:[#allocation3 + $0x90] sm:$0xff] %vm6402_vm4, %v6376_v45  ;;  %v6442_v49 = vld [vmem:[#allocation3 + $0x49] sm:$0x1]  ;;  %6409 = vst.msk [vmem:[#allocation3 + $0x88] sm:$0xff] %vm6402_vm4, %v6375_v46  ;;  %vm6314_vm13 = vcmp.ge.f32.partialorder %v13455_v3, 0.0  ;;  %v6521_v63 = vld [vmem:[#allocation3 + $0xf] sm:$0xff] }
 0x432   : > { %v6346_v21 = vmul.f32 0.2, %v13455_v3  ;;  %6459 = vst.msk [vmem:[#allocation3 + $0x7] sm:$0x1] %vm6458_vm8, %v6440_v24  ;;  %6461 = vst.msk [vmem:[#allocation3 + $0x47] sm:$0x1] %vm6458_vm8, %v6442_v49 }
 0x433   : > { %vm6313_vm14 = vcmp.ge.f32.partialorder %v13456_v41, 0.0  ;;  %v6345_v26 = vmul.f32 0.2, %v13456_v41  ;;  %v12900_v10 = vpop.f32.mrb[42].mxu1  ;;  %6497 = vst.msk [vmem:[#allocation3 + $0x58] sm:$0x1] %vm6458_vm8, %v6479_v29 }
 0x434   : > { %v6378_v1 = vsel %vm6314_vm13, %v13455_v3, %v6346_v21  ;;  %v13457_v28 = vadd.f32 %v12900_v10, %v16242_v43  ;;  %v6164_v44 = vpop.f32.mrb[43].mxu1  ;;  %v6480_v31 = vld [vmem:[#allocation3 + $0x76] sm:$0x1]  ;;  %v7293_v47 = vld [vmem:[#allocation3 + $0x9] sm:$0xff] }
 0x435   : > { %6412 = vst.msk [vmem:[#allocation3 + $0xb0] sm:$0xff] %vm6402_vm4, %v6378_v1  ;;  %v6377_v30 = vsel %vm6313_vm14, %v13456_v41, %v6345_v26  ;;  %v13458_v40 = vadd.f32 %v16242_v43, %v6164_v44  ;;  %v6443_v52 = vld [vmem:[#allocation3 + $0x69] sm:$0x1]  ;;  %v16300_v0 = vld [vmem:[#allocation3 + $0x2f] sm:$0xff] }
 0x436   : > { %6411 = vst.msk [vmem:[#allocation3 + $0xa8] sm:$0xff] %vm6402_vm4, %v6377_v30  ;;  %vm6316_vm15 = vcmp.ge.f32.partialorder %v13457_v28, 0.0  ;;  %v6348_v54 = vmul.f32 0.2, %v13457_v28  ;;  %v12903_v42 = vpop.f32.mrb[44].mxu1  ;;  %v16281_v57 = vld [vmem:[#allocation3 + $0x27] sm:$0xff] }
 0x437   : > { %6462 = vst.msk [vmem:[#allocation3 + $0x67] sm:$0x1] %vm6458_vm8, %v6443_v52  ;;  %vm6315_vm0 = vcmp.ge.f32.partialorder %v13458_v40, 0.0  ;;  %v6347_v55 = vmul.f32 0.2, %v13458_v40  ;;  %v13459_v22 = vadd.f32 %v12903_v42, %v16242_v43  ;;  %v6174_v5 = vpop.f32.mrb[45].mxu1 }
 0x438   : > { %v6380_v13 = vsel %vm6316_vm15, %v13457_v28, %v6348_v54  ;;  %6498 = vst.msk [vmem:[#allocation3 + $0x78] sm:$0x1] %vm6458_vm8, %v6480_v31  ;;  %v13460_v8 = vadd.f32 %v16242_v43, %v6174_v5  ;;  %v6444_v48 = vld [vmem:[#allocation3 + $0x89] sm:$0x1]  ;;  %v6481_v61 = vld [vmem:[#allocation3 + $0x96] sm:$0x1] }
 0x439   : > { %6414 = vst.msk [vmem:[#allocation3 + $0xd0] sm:$0xff] %vm6402_vm4, %v6380_v13  ;;  %v6379_v37 = vsel %vm6315_vm0, %v13458_v40, %v6347_v55  ;;  %v6520_v33 = vld [vmem:[#allocation3 + $0x7] sm:$0xff]  ;;  %vm6318_vm1 = vcmp.ge.f32.partialorder %v13459_v22, 0.0  ;;  %v6350_v53 = vmul.f32 0.2, %v13459_v22  ;;  %v16314_v26 = vld [vmem:[#allocation3 + $0x4f] sm:$0xff] }
 0x43a   : > { %6413 = vst.msk [vmem:[#allocation3 + $0xc8] sm:$0xff] %vm6402_vm4, %v6379_v37  ;;  %12933 = vmatprep.mubr.msk.f32.mxu0 %vm6402_vm4, %v6520_v33  ;;  %vm6317_vm2 = vcmp.ge.f32.partialorder %v13460_v8, 0.0  ;;  %v6349_v27 = vmul.f32 0.2, %v13460_v8  ;;  %v12906_v60 = vpop.f32.mrb[46].mxu1  ;;  %v16305_v15 = vld [vmem:[#allocation3 + $0x47] sm:$0xff] }
 0x43b   : > { %6463 = vst.msk [vmem:[#allocation3 + $0x87] sm:$0x1] %vm6458_vm8, %v6444_v48  ;;  %12934 = vmatmul.mubr.msk.f32.vlgmr.msra.gmra.mrb[32].mxu0 %vm6402_vm4, %v6521_v63  ;;  %v6382_v62 = vsel %vm6318_vm1, %v13459_v22, %v6350_v53  ;;  %v13461_v19 = vadd.f32 %v12906_v60, %v16242_v43  ;;  %v6184_v17 = vpop.f32.mrb[47].mxu1  ;;  %6499 = vst.msk [vmem:[#allocation3 + $0x98] sm:$0x1] %vm6458_vm8, %v6481_v61  ;;  %v16328_v31 = vld [vmem:[#allocation3 + $0x6f] sm:$0xff] }
 0x43c   : > { %12982 = vmatpush3.msra.mxu0 %v16236_v2  ;;  %12936 = vmatprep.mubr.msk.f32.mxu0 %vm6402_vm4, %v16281_v57  ;;  %v6482_v59 = vld [vmem:[#allocation3 + $0xb6] sm:$0x1]  ;;  %6416 = vst.msk [vmem:[#allocation3 + $0xf0] sm:$0xff] %vm6402_vm4, %v6382_v62  ;;  %v6381_v14 = vsel %vm6317_vm2, %v13460_v8, %v6349_v27  ;;  %v13462_v39 = vadd.f32 %v16242_v43, %v6184_v17 }
 0x43d   : > { %v6445_v12 = vld [vmem:[#allocation3 + $0xa9] sm:$0x1]  ;;  %13031 = vmatprep.subr.mxu0 %v16287_v6  ;;  %6500 = vst.msk [vmem:[#allocation3 + $0xb8] sm:$0x1] %vm6458_vm8, %v6482_v59  ;;  %vm6320_vm3 = vcmp.ge.f32.partialorder %v13461_v19, 0.0  ;;  %v16342_v61 = vld [vmem:[#allocation3 + $0x8f] sm:$0xff] }
 0x43e   : > { %6415 = vst.msk [vmem:[#allocation3 + $0xe8] sm:$0xff] %vm6402_vm4, %v6381_v14  ;;  %v6352_v2 = vmul.f32 0.2, %v13461_v19  ;;  %vm6319_vm5 = vcmp.ge.f32.partialorder %v13462_v39, 0.0  ;;  %v6351_v32 = vmul.f32 0.2, %v13462_v39 }
 0x43f   : > { %6464 = vst.msk [vmem:[#allocation3 + $0xa7] sm:$0x1] %vm6458_vm8, %v6445_v12  ;;  %v12909_v20 = vpop.f32.mrb[48].mxu1  ;;  %12937 = vmatmul.mubr.msk.f32.gmra.mrb[34].mxu0 %vm6402_vm4, %v16300_v0  ;;  %v16319_v28 = vld [vmem:[#allocation3 + $0x67] sm:$0xff]  ;;  %v7294_v7 = vld [vmem:[#allocation3 + $0x11] sm:$0xff] }
 0x440   : > { %v6384_v45 = vsel %vm6320_vm3, %v13461_v19, %v6352_v2  ;;  %v13463_v3 = vadd.f32 %v12909_v20, %v16242_v43  ;;  %v6194_v16 = vpop.f32.mrb[49].mxu1  ;;  %12939 = vmatprep.mubr.msk.f32.mxu0 %vm6402_vm4, %v16305_v15  ;;  %v6483_v46 = vld [vmem:[#allocation3 + $0xd6] sm:$0x1]  ;;  %v6383_v41 = vsel %vm6319_vm5, %v13462_v39, %v6351_v32 }
 0x441   : > { %6418 = vst.msk [vmem:[#allocation3 + $0x110] sm:$0xff] %vm6402_vm4, %v6384_v45  ;;  %v13464_v24 = vadd.f32 %v16242_v43, %v6194_v16  ;;  %v6446_v49 = vld [vmem:[#allocation3 + $0xc9] sm:$0x1]  ;;  %6417 = vst.msk [vmem:[#allocation3 + $0x108] sm:$0xff] %vm6402_vm4, %v6383_v41 }
 0x442   : > { %6501 = vst.msk [vmem:[#allocation3 + $0xd8] sm:$0x1] %vm6458_vm8, %v6483_v46  ;;  %vm6322_vm6 = vcmp.ge.f32.partialorder %v13463_v3, 0.0  ;;  %v6354_v21 = vmul.f32 0.2, %v13463_v3  ;;  %v12912_v1 = vpop.f32.mrb[50].mxu1 }
 0x443   : > { %6465 = vst.msk [vmem:[#allocation3 + $0xc7] sm:$0x1] %vm6458_vm8, %v6446_v49  ;;  %vm6321_vm7 = vcmp.ge.f32.partialorder %v13464_v24, 0.0  ;;  %v6353_v10 = vmul.f32 0.2, %v13464_v24  ;;  %12940 = vmatmul.mubr.msk.f32.gmra.mrb[36].mxu0 %vm6402_vm4, %v16314_v26  ;;  %v13465_v29 = vadd.f32 %v12912_v1, %v16242_v43  ;;  %v6204_v30 = vpop.f32.mrb[51].mxu1 }
 0x444   : > { %v6386_v44 = vsel %vm6322_vm6, %v13463_v3, %v6354_v21  ;;  %12942 = vmatprep.mubr.msk.f32.mxu0 %vm6402_vm4, %v16319_v28  ;;  %v6484_v40 = vld [vmem:[#allocation3 + $0xf6] sm:$0x1]  ;;  %v13466_v54 = vadd.f32 %v16242_v43, %v6204_v30  ;;  %v16333_v5 = vld [vmem:[#allocation3 + $0x87] sm:$0xff] }
 0x445   : > { %6420 = vst.msk [vmem:[#allocation3 + $0x130] sm:$0xff] %vm6402_vm4, %v6386_v44  ;;  %v6385_v52 = vsel %vm6321_vm7, %v13464_v24, %v6353_v10  ;;  %v6447_v55 = vld [vmem:[#allocation3 + $0xe9] sm:$0x1]  ;;  %vm6324_vm9 = vcmp.ge.f32.partialorder %v13465_v29, 0.0  ;;  %v6356_v42 = vmul.f32 0.2, %v13465_v29 }
 0x446   : > { %6502 = vst.msk [vmem:[#allocation3 + $0xf8] sm:$0x1] %vm6458_vm8, %v6484_v40  ;;  %6466 = vst.msk [vmem:[#allocation3 + $0xe7] sm:$0x1] %vm6458_vm8, %v6447_v55  ;;  %vm6323_vm10 = vcmp.ge.f32.partialorder %v13466_v54, 0.0  ;;  %v12915_v22 = vpop.f32.mrb[52].mxu1 }
 0x447   : > { %6419 = vst.msk [vmem:[#allocation3 + $0x128] sm:$0xff] %vm6402_vm4, %v6385_v52  ;;  %v6355_v13 = vmul.f32 0.2, %v13466_v54  ;;  %12943 = vmatmul.mubr.msk.f32.gmra.mrb[38].mxu0 %vm6402_vm4, %v16328_v31  ;;  %v6388_v37 = vsel %vm6324_vm9, %v13465_v29, %v6356_v42  ;;  %v13467_v8 = vadd.f32 %v12915_v22, %v16242_v43  ;;  %v6214_v33 = vpop.f32.mrb[53].mxu1  ;;  %v16347_v17 = vld [vmem:[#allocation3 + $0xa7] sm:$0xff]  ;;  %v16356_v3 = vld [vmem:[#allocation3 + $0xaf] sm:$0xff] }
 0x448   : > { %12945 = vmatprep.mubr.msk.f32.mxu0 %vm6402_vm4, %v16333_v5  ;;  %v6485_v48 = vld [vmem:[#allocation3 + $0x116] sm:$0x1]  ;;  %6422 = vst.msk [vmem:[#allocation3 + $0x150] sm:$0xff] %vm6402_vm4, %v6388_v37  ;;  %v13468_v63 = vadd.f32 %v16242_v43, %v6214_v33  ;;  %v6448_v27 = vld [vmem:[#allocation3 + $0x109] sm:$0x1] }
 0x449   : > { %v6387_v53 = vsel %vm6323_vm10, %v13466_v54, %v6355_v13  ;;  %6503 = vst.msk [vmem:[#allocation3 + $0x118] sm:$0x1] %vm6458_vm8, %v6485_v48  ;;  %vm6326_vm11 = vcmp.ge.f32.partialorder %v13467_v8, 0.0  ;;  %v6358_v60 = vmul.f32 0.2, %v13467_v8  ;;  %v16370_v40 = vld [vmem:[#allocation3 + $0xcf] sm:$0xff] }
 0x44a   : > { %6421 = vst.msk [vmem:[#allocation3 + $0x148] sm:$0xff] %vm6402_vm4, %v6387_v53  ;;  %vm6325_vm12 = vcmp.ge.f32.partialorder %v13468_v63, 0.0  ;;  %v6357_v62 = vmul.f32 0.2, %v13468_v63  ;;  %v12918_v19 = vpop.f32.mrb[54].mxu1  ;;  %v16361_v41 = vld [vmem:[#allocation3 + $0xc7] sm:$0xff] }
 0x44b   : > { %6467 = vst.msk [vmem:[#allocation3 + $0x107] sm:$0x1] %vm6458_vm8, %v6448_v27  ;;  %12946 = vmatmul.mubr.msk.f32.gmra.mrb[40].mxu0 %vm6402_vm4, %v16342_v61  ;;  %v6390_v59 = vsel %vm6326_vm11, %v13467_v8, %v6358_v60  ;;  %v13469_v14 = vadd.f32 %v12918_v19, %v16242_v43  ;;  %v6224_v39 = vpop.f32.mrb[55].mxu1 }
 0x44c   : > { %12948 = vmatprep.mubr.msk.f32.mxu0 %vm6402_vm4, %v16347_v17  ;;  %v6486_v12 = vld [vmem:[#allocation3 + $0x136] sm:$0x1]  ;;  %6424 = vst.msk [vmem:[#allocation3 + $0x170] sm:$0xff] %vm6402_vm4, %v6390_v59  ;;  %v6389_v2 = vsel %vm6325_vm12, %v13468_v63, %v6357_v62  ;;  %v13470_v32 = vadd.f32 %v16242_v43, %v6224_v39 }
 0x44d   : > { %6504 = vst.msk [vmem:[#allocation3 + $0x138] sm:$0x1] %vm6458_vm8, %v6486_v12  ;;  %vm6328_vm13 = vcmp.ge.f32.partialorder %v13469_v14, 0.0  ;;  %v6360_v45 = vmul.f32 0.2, %v13469_v14  ;;  %v16375_v55 = vld [vmem:[#allocation3 + $0xe7] sm:$0xff] }
 0x44e   : > { %v6449_v20 = vld [vmem:[#allocation3 + $0x129] sm:$0x1]  ;;  %6423 = vst.msk [vmem:[#allocation3 + $0x168] sm:$0xff] %vm6402_vm4, %v6389_v2  ;;  %vm6327_vm14 = vcmp.ge.f32.partialorder %v13470_v32, 0.0  ;;  %v6359_v16 = vmul.f32 0.2, %v13470_v32 }
 0x44f   : > { %6468 = vst.msk [vmem:[#allocation3 + $0x127] sm:$0x1] %vm6458_vm8, %v6449_v20  ;;  %v12921_v46 = vpop.f32.mrb[56].mxu1  ;;  %12949 = vmatmul.mubr.msk.f32.gmra.mrb[42].mxu0 %vm6402_vm4, %v16356_v3  ;;  %v6392_v24 = vsel %vm6328_vm13, %v13469_v14, %v6360_v45  ;;  %v6487_v10 = vld [vmem:[#allocation3 + $0x156] sm:$0x1] }
 0x450   : > { %v13471_v49 = vadd.f32 %v12921_v46, %v16242_v43  ;;  %v6234_v21 = vpop.f32.mrb[57].mxu1  ;;  %12951 = vmatprep.mubr.msk.f32.mxu0 %vm6402_vm4, %v16361_v41  ;;  %6426 = vst.msk [vmem:[#allocation3 + $0x190] sm:$0xff] %vm6402_vm4, %v6392_v24  ;;  %v6391_v1 = vsel %vm6327_vm14, %v13470_v32, %v6359_v16  ;;  %v16384_v63 = vld [vmem:[#allocation3 + $0xef] sm:$0xff] }
 0x451   : > { %v13472_v44 = vadd.f32 %v16242_v43, %v6234_v21  ;;  %v6450_v29 = vld [vmem:[#allocation3 + $0x149] sm:$0x1]  ;;  %6505 = vst.msk [vmem:[#allocation3 + $0x158] sm:$0x1] %vm6458_vm8, %v6487_v10  ;;  %v16398_v45 = vld [vmem:[#allocation3 + $0x10f] sm:$0xff] }
 0x452   : > { %6425 = vst.msk [vmem:[#allocation3 + $0x188] sm:$0xff] %vm6402_vm4, %v6391_v1  ;;  %vm6330_vm15 = vcmp.ge.f32.partialorder %v13471_v49, 0.0  ;;  %v6362_v30 = vmul.f32 0.2, %v13471_v49  ;;  %v12924_v54 = vpop.f32.mrb[58].mxu1  ;;  %v16389_v62 = vld [vmem:[#allocation3 + $0x107] sm:$0xff] }
 0x453   : > { %6469 = vst.msk [vmem:[#allocation3 + $0x147] sm:$0x1] %vm6458_vm8, %v6450_v29  ;;  %vm6329_vm0 = vcmp.ge.f32.partialorder %v13472_v44, 0.0  ;;  %v6361_v52 = vmul.f32 0.2, %v13472_v44  ;;  %12952 = vmatmul.mubr.msk.f32.gmra.mrb[44].mxu0 %vm6402_vm4, %v16370_v40  ;;  %v13473_v13 = vadd.f32 %v12924_v54, %v16242_v43  ;;  %v6244_v22 = vpop.f32.mrb[59].mxu1 }
 0x454   : > { %v6394_v42 = vsel %vm6330_vm15, %v13471_v49, %v6362_v30  ;;  %12954 = vmatprep.mubr.msk.f32.mxu0 %vm6402_vm4, %v16375_v55  ;;  %v6488_v37 = vld [vmem:[#allocation3 + $0x176] sm:$0x1]  ;;  %v13474_v33 = vadd.f32 %v16242_v43, %v6244_v22  ;;  %v16558_v51 = vld [vmem:[#allocation3 + $0x148] sm:$0xff] }
 0x455   : > { %6428 = vst.msk [vmem:[#allocation3 + $0x1b0] sm:$0xff] %vm6402_vm4, %v6394_v42  ;;  %v6393_v8 = vsel %vm6329_vm0, %v13472_v44, %v6361_v52  ;;  %v6451_v48 = vld [vmem:[#allocation3 + $0x169] sm:$0x1]  ;;  %vm6332_vm1 = vcmp.ge.f32.partialorder %v13473_v13, 0.0  ;;  %v6364_v53 = vmul.f32 0.2, %v13473_v13 }
 0x456   : > { %6506 = vst.msk [vmem:[#allocation3 + $0x178] sm:$0x1] %vm6458_vm8, %v6488_v37  ;;  %6470 = vst.msk [vmem:[#allocation3 + $0x167] sm:$0x1] %vm6458_vm8, %v6451_v48  ;;  %vm6331_vm2 = vcmp.ge.f32.partialorder %v13474_v33, 0.0  ;;  %v12927_v60 = vpop.f32.mrb[60].mxu1 }
 0x457   : > { %6427 = vst.msk [vmem:[#allocation3 + $0x1a8] sm:$0xff] %vm6402_vm4, %v6393_v8  ;;  %v6363_v27 = vmul.f32 0.2, %v13474_v33  ;;  %12955 = vmatmul.mubr.msk.f32.gmra.mrb[46].mxu0 %vm6402_vm4, %v16384_v63  ;;  %v6396_v19 = vsel %vm6332_vm1, %v13473_v13, %v6364_v53  ;;  %v13475_v59 = vadd.f32 %v12927_v60, %v16242_v43  ;;  %v6254_v14 = vpop.f32.mrb[61].mxu1  ;;  %v6489_v39 = vld [vmem:[#allocation3 + $0x196] sm:$0x1] }
 0x458   : > { %12957 = vmatprep.mubr.msk.f32.mxu0 %vm6402_vm4, %v16389_v62  ;;  %6430 = vst.msk [vmem:[#allocation3 + $0x1d0] sm:$0xff] %vm6402_vm4, %v6396_v19  ;;  %v13476_v2 = vadd.f32 %v16242_v43, %v6254_v14  ;;  %v16403_v24 = vld [vmem:[#allocation3 + $0x127] sm:$0xff]  ;;  %v16414_v54 = vld [vmem:[#allocation3 + $0x12f] sm:$0xff] }
 0x459   : > { %v6395_v12 = vsel %vm6331_vm2, %v13474_v33, %v6363_v27  ;;  %v6452_v32 = vld [vmem:[#allocation3 + $0x189] sm:$0x1]  ;;  %6507 = vst.msk [vmem:[#allocation3 + $0x198] sm:$0x1] %vm6458_vm8, %v6489_v39  ;;  %vm6334_vm3 = vcmp.ge.f32.partialorder %v13475_v59, 0.0  ;;  %v16426_v33 = vld [vmem:[#allocation3 + $0x14f] sm:$0xff] }
 0x45a   : > { %6429 = vst.msk [vmem:[#allocation3 + $0x1c8] sm:$0xff] %vm6402_vm4, %v6395_v12  ;;  %v6366_v20 = vmul.f32 0.2, %v13475_v59  ;;  %vm6333_vm5 = vcmp.ge.f32.partialorder %v13476_v2, 0.0  ;;  %v6365_v16 = vmul.f32 0.2, %v13476_v2 }
 0x45b   : > { %6471 = vst.msk [vmem:[#allocation3 + $0x187] sm:$0x1] %vm6458_vm8, %v6452_v32  ;;  %v12930_v46 = vpop.f32.mrb[62].mxu1  ;;  %12958 = vmatmul.mubr.msk.f32.gmra.mrb[48].mxu0 %vm6402_vm4, %v16398_v45  ;;  %v16419_v13 = vld [vmem:[#allocation3 + $0x147] sm:$0xff]  ;;  %v16436_v60 = vld [vmem:[#allocation3 + $0x16f] sm:$0xff] }
 0x45c   : > { %v6398_v49 = vsel %vm6334_vm3, %v13475_v59, %v6366_v20  ;;  %v13477_v21 = vadd.f32 %v12930_v46, %v16242_v43  ;;  %v6264_v10 = vpop.f32.mrb[63].mxu1  ;;  %12960 = vmatprep.mubr.msk.f32.mxu0 %vm6402_vm4, %v16403_v24  ;;  %v6490_v1 = vld [vmem:[#allocation3 + $0x1b6] sm:$0x1]  ;;  %v6397_v44 = vsel %vm6333_vm5, %v13476_v2, %v6365_v16  ;;  %v16566_v50 = vld [vmem:[#allocation3 + $0x168] sm:$0xff] }
 0x45d   : > { %6432 = vst.msk [vmem:[#allocation3 + $0x1f0] sm:$0xff] %vm6402_vm4, %v6398_v49  ;;  %6439 = vst.msk [vmem:[#allocation3 + $0x230] sm:$0xff] %vm6402_vm4, %v6398_v49  ;;  %v13478_v29 = vadd.f32 %v16242_v43, %v6264_v10  ;;  %v16431_v48 = vld [vmem:[#allocation3 + $0x167] sm:$0xff]  ;;  %v16447_v12 = vld [vmem:[#allocation3 + $0x18f] sm:$0xff] }
 0x45e   : > { %v6453_v30 = vld [vmem:[#allocation3 + $0x1a9] sm:$0x1]  ;;  %6508 = vst.msk [vmem:[#allocation3 + $0x1b8] sm:$0x1] %vm6458_vm8, %v6490_v1  ;;  %vm6336_vm6 = vcmp.ge.f32.partialorder %v13477_v21, 0.0  ;;  %v16457_v20 = vld [vmem:[#allocation3 + $0x1af] sm:$0xff] }
 0x45f   : > { %6431 = vst.msk [vmem:[#allocation3 + $0x1e8] sm:$0xff] %vm6402_vm4, %v6397_v44  ;;  %6438 = vst.msk [vmem:[#allocation3 + $0x228] sm:$0xff] %vm6402_vm4, %v6397_v44  ;;  %v6368_v52 = vmul.f32 0.2, %v13477_v21  ;;  %vm6335_vm7 = vcmp.ge.f32.partialorder %v13478_v29, 0.0  ;;  %12961 = vmatmul.mubr.msk.f32.gmra.mrb[50].mxu0 %vm6402_vm4, %v16414_v54  ;;  %v6906_v10 = vld [vmem:[#allocation3 + $0x8] sm:$0xff] }
 0x460   : > { %6472 = vst.msk [vmem:[#allocation3 + $0x1a7] sm:$0x1] %vm6458_vm8, %v6453_v30  ;;  %v6367_v42 = vmul.f32 0.2, %v13478_v29  ;;  %12963 = vmatprep.mubr.msk.f32.mxu0 %vm6402_vm4, %v16419_v13  ;;  %v6491_v22 = vld [vmem:[#allocation3 + $0x1d6] sm:$0x1] }
 0x461   : > { %v6400_v43 = vsel %vm6336_vm6, %v13477_v21, %v6368_v52  ;;  %v6454_v8 = vld [vmem:[#allocation3 + $0x1c9] sm:$0x1]  ;;  %6509 = vst.msk [vmem:[#allocation3 + $0x1d8] sm:$0x1] %vm6458_vm8, %v6491_v22  ;;  %v16465_v46 = vld [vmem:[#allocation3 + $0x1cf] sm:$0xff]  ;;  %v16481_v44 = vld [vmem:[%s17282_s5 + $0x18] sm:$0xff] }
 0x462   : > { %6434 = vst.msk [vmem:[#allocation3 + $0x210] sm:$0xff] %vm6402_vm4, %v6400_v43  ;;  %v6399_v37 = vsel %vm6335_vm7, %v13478_v29, %v6367_v42  ;;  %v16441_v59 = vld [vmem:[#allocation3 + $0x187] sm:$0xff]  ;;  %v6907_v1 = vld [vmem:[#allocation3 + $0x10] sm:$0xff] }
 0x463   : > { %6433 = vst.msk [vmem:[#allocation3 + $0x208] sm:$0xff] %vm6402_vm4, %v6399_v37  ;;  %12964 = vmatmul.mubr.msk.f32.gmra.mrb[52].mxu0 %vm6402_vm4, %v16426_v33  ;;  %v16484_v29 = vld [vmem:[#allocation3 + $0x28] sm:$0xff]  ;;  %v16490_v30 = vld [vmem:[#allocation3 + $0x30] sm:$0xff] }
 0x464   : > { %6473 = vst.msk [vmem:[#allocation3 + $0x1c7] sm:$0x1] %vm6458_vm8, %v6454_v8  ;;  %12966 = vmatprep.mubr.msk.f32.mxu0 %vm6402_vm4, %v16431_v48  ;;  %v6492_v53 = vld [vmem:[#allocation3 + $0x1f6] sm:$0x1]  ;;  %v16494_v52 = vld [vmem:[#allocation3 + $0x48] sm:$0xff] }
 0x465   : > { %6510 = vst.msk [vmem:[#allocation3 + $0x1f8] sm:$0x1] %vm6458_vm8, %v6492_v53  ;;  %v6494_v32 = vld [vmem:[#allocation3 + $0x236] sm:$0x1]  ;;  %v16510_v22 = vld [vmem:[#allocation3 + $0x88] sm:$0xff] }
 0x466   : > { %v6455_v27 = vld [vmem:[#allocation3 + $0x1e9] sm:$0x1]  ;;  %6512 = vst.msk [vmem:[#allocation3 + $0x238] sm:$0x1] %vm6458_vm8, %v6494_v32  ;;  %v16473_v21 = vld [vmem:[#allocation3 + $0x1ef] sm:$0xff] }
 0x467   : > { %6474 = vst.msk [vmem:[#allocation3 + $0x1e7] sm:$0x1] %vm6458_vm8, %v6455_v27  ;;  %v6457_v19 = vld [vmem:[#allocation3 + $0x229] sm:$0x1]  ;;  %12967 = vmatmul.mubr.msk.f32.gmra.mrb[54].mxu0 %vm6402_vm4, %v16436_v60  ;;  %v16498_v42 = vld [vmem:[#allocation3 + $0x50] sm:$0xff] }
 0x468   : > { %6476 = vst.msk [vmem:[#allocation3 + $0x227] sm:$0x1] %vm6458_vm8, %v6457_v19  ;;  %12969 = vmatprep.mubr.msk.f32.mxu0 %vm6402_vm4, %v16441_v59  ;;  %v16452_v2 = vld [vmem:[#allocation3 + $0x1a7] sm:$0xff]  ;;  %v16506_v43 = vld [vmem:[#allocation3 + $0x70] sm:$0xff] }
 0x469   : > { %v6493_v14 = vld [vmem:[#allocation3 + $0x216] sm:$0x1]  ;;  %v16518_v8 = vld [vmem:[#allocation3 + $0xa8] sm:$0xff] }
 0x46a   : > { %v6456_v39 = vld [vmem:[#allocation3 + $0x209] sm:$0x1]  ;;  %6511 = vst.msk [vmem:[#allocation3 + $0x218] sm:$0x1] %vm6458_vm8, %v6493_v14  ;;  %v16514_v37 = vld [vmem:[#allocation3 + $0x90] sm:$0xff] }
 0x46b   : > { %6475 = vst.msk [vmem:[#allocation3 + $0x207] sm:$0x1] %vm6458_vm8, %v6456_v39  ;;  %12970 = vmatmul.mubr.msk.f32.gmra.mrb[56].mxu0 %vm6402_vm4, %v16447_v12  ;;  %v16461_v16 = vld [vmem:[#allocation3 + $0x1c7] sm:$0xff]  ;;  %v16522_v53 = vld [vmem:[#allocation3 + $0xb0] sm:$0xff] }
 0x46c   : > { %12972 = vmatprep.mubr.msk.f32.mxu0 %vm6402_vm4, %v16452_v2  ;;  %v16526_v27 = vld [vmem:[#allocation3 + $0xc8] sm:$0xff]  ;;  %v16530_v19 = vld [vmem:[#allocation3 + $0xd0] sm:$0xff] }
 0x46d   : > { %v16534_v14 = vld [vmem:[#allocation3 + $0xe8] sm:$0xff]  ;;  %v16538_v39 = vld [vmem:[#allocation3 + $0xf0] sm:$0xff] }
 0x46e   : > { %v16469_v49 = vld [vmem:[#allocation3 + $0x1e7] sm:$0xff]  ;;  %v16554_v25 = vld [vmem:[#allocation3 + $0x130] sm:$0xff] }
 0x46f   : > { %12973 = vmatmul.mubr.msk.f32.gmra.mrb[58].mxu0 %vm6402_vm4, %v16457_v20  ;;  %v16542_v32 = vld [vmem:[#allocation3 + $0x108] sm:$0xff]  ;;  %v16562_v23 = vld [vmem:[#allocation3 + $0x150] sm:$0xff] }
 0x470   : > { %12975 = vmatprep.mubr.msk.f32.mxu0 %vm6402_vm4, %v16461_v16  ;;  %v16570_v18 = vld [vmem:[#allocation3 + $0x170] sm:$0xff]  ;;  %v16574_v58 = vld [vmem:[#allocation3 + $0x188] sm:$0xff] }
 0x471   : > { %v16578_v9 = vld [vmem:[#allocation3 + $0x190] sm:$0xff]  ;;  %v16582_v35 = vld [vmem:[#allocation3 + $0x1a8] sm:$0xff] }
 0x472   : > { %v16586_v38 = vld [vmem:[#allocation3 + $0x1b0] sm:$0xff]  ;;  %v16590_v56 = vld [vmem:[#allocation3 + $0x1c8] sm:$0xff] }
 0x473   : > { %12976 = vmatmul.mubr.msk.f32.gmra.mrb[60].mxu0 %vm6402_vm4, %v16465_v46  ;;  %v16594_v36 = vld [vmem:[#allocation3 + $0x1d0] sm:$0xff]  ;;  %v16598_v34 = vld [vmem:[#allocation3 + $0x1e8] sm:$0xff] }
 0x474   : > { %12978 = vmatprep.mubr.msk.f32.mxu0 %vm6402_vm4, %v16469_v49  ;;  %17488 = vst [vmem:[#allocation22_spill] sm:$0xff] %v16594_v36  ;;  %17489 = vst [vmem:[#allocation23_spill] sm:$0xff] %v16598_v34  ;;  %v16602_v4 = vld [vmem:[#allocation3 + $0x1f0] sm:$0xff] }
 0x475   : > { %17490 = vst [vmem:[#allocation24_spill] sm:$0xff] %v16602_v4 }
 0x477   : > { %12979 = vmatmul.mubr.msk.f32.gmra.mrb[62].mxu0 %vm6402_vm4, %v16473_v21 }
 0x478   : > { %12983 = vmatprep.mubr.msk.f32.mxu0 %vm6402_vm4, %v6906_v10  ;;  %v16546_v10 = vld [vmem:[#allocation3 + $0x110] sm:$0xff] }
 0x47b   : > { %12984 = vmatmul.mubr.msk.f32.vlgmr.msra.gmra.mrb[32].mxu0 %vm6402_vm4, %v6907_v1  ;;  %v16550_v1 = vld [vmem:[#allocation3 + $0x128] sm:$0xff] }
 0x47c   : > { %13032 = vmatpush3.msra.mxu0 %v16287_v6  ;;  %12986 = vmatprep.mubr.msk.f32.mxu0 %vm6402_vm4, %v16484_v29  ;;  %v16502_v6 = vld [vmem:[#allocation3 + $0x68] sm:$0xff] }
 0x47d   : > { %13081 = vmatprep.subr.mxu0 %v16481_v44 }
 0x47f   : > { %12987 = vmatmul.mubr.msk.f32.gmra.mrb[34].mxu0 %vm6402_vm4, %v16490_v30 }
 0x480   : > { %12989 = vmatprep.mubr.msk.f32.mxu0 %vm6402_vm4, %v16494_v52 }
 0x483   : > { %12990 = vmatmul.mubr.msk.f32.gmra.mrb[36].mxu0 %vm6402_vm4, %v16498_v42 }
 0x484   : > { %12992 = vmatprep.mubr.msk.f32.mxu0 %vm6402_vm4, %v16502_v6 }
 0x487   : > { %12993 = vmatmul.mubr.msk.f32.gmra.mrb[38].mxu0 %vm6402_vm4, %v16506_v43 }
 0x488   : > { %12995 = vmatprep.mubr.msk.f32.mxu0 %vm6402_vm4, %v16510_v22 }
 0x48b   : > { %12996 = vmatmul.mubr.msk.f32.gmra.mrb[40].mxu0 %vm6402_vm4, %v16514_v37 }
 0x48c   : > { %12998 = vmatprep.mubr.msk.f32.mxu0 %vm6402_vm4, %v16518_v8 }
 0x48f   : > { %12999 = vmatmul.mubr.msk.f32.gmra.mrb[42].mxu0 %vm6402_vm4, %v16522_v53 }
 0x490   : > { %13001 = vmatprep.mubr.msk.f32.mxu0 %vm6402_vm4, %v16526_v27 }
 0x493   : > { %13002 = vmatmul.mubr.msk.f32.gmra.mrb[44].mxu0 %vm6402_vm4, %v16530_v19 }
 0x494   : > { %13004 = vmatprep.mubr.msk.f32.mxu0 %vm6402_vm4, %v16534_v14 }
 0x497   : > { %13005 = vmatmul.mubr.msk.f32.gmra.mrb[46].mxu0 %vm6402_vm4, %v16538_v39 }
 0x498   : > { %13007 = vmatprep.mubr.msk.f32.mxu0 %vm6402_vm4, %v16542_v32 }
 0x49b   : > { %13008 = vmatmul.mubr.msk.f32.gmra.mrb[48].mxu0 %vm6402_vm4, %v16546_v10 }
 0x49c   : > { %13010 = vmatprep.mubr.msk.f32.mxu0 %vm6402_vm4, %v16550_v1 }
 0x49f   : > { %13011 = vmatmul.mubr.msk.f32.gmra.mrb[50].mxu0 %vm6402_vm4, %v16554_v25 }
 0x4a0   : > { %13013 = vmatprep.mubr.msk.f32.mxu0 %vm6402_vm4, %v16558_v51 }
 0x4a3   : > { %13014 = vmatmul.mubr.msk.f32.gmra.mrb[52].mxu0 %vm6402_vm4, %v16562_v23 }
 0x4a4   : > { %13016 = vmatprep.mubr.msk.f32.mxu0 %vm6402_vm4, %v16566_v50 }
 0x4a7   : > { %13017 = vmatmul.mubr.msk.f32.gmra.mrb[54].mxu0 %vm6402_vm4, %v16570_v18 }
 0x4a8   : > { %13019 = vmatprep.mubr.msk.f32.mxu0 %vm6402_vm4, %v16574_v58 }
 0x4ab   : > { %13020 = vmatmul.mubr.msk.f32.gmra.mrb[56].mxu0 %vm6402_vm4, %v16578_v9 }
 0x4ac   : > { %13022 = vmatprep.mubr.msk.f32.mxu0 %vm6402_vm4, %v16582_v35 }
 0x4af   : > { %13023 = vmatmul.mubr.msk.f32.gmra.mrb[58].mxu0 %vm6402_vm4, %v16586_v38 }
 0x4b0   : > { %13025 = vmatprep.mubr.msk.f32.mxu0 %vm6402_vm4, %v16590_v56 }
 0x4b3   : > { %13026 = vmatmul.mubr.msk.f32.gmra.mrb[60].mxu0 %vm6402_vm4, %v16594_v36  ;;  %v16613_v36 = vld [vmem:[#allocation3 + $0x29] sm:$0xff] }
 0x4b4   : > { %13028 = vmatprep.mubr.msk.f32.mxu0 %vm6402_vm4, %v16598_v34  ;;  %17491 = vst [vmem:[#allocation25_spill] sm:$0xff] %v16613_v36 }
 0x4b7   : > { %13029 = vmatmul.mubr.msk.f32.gmra.mrb[62].mxu0 %vm6402_vm4, %v16602_v4  ;;  %v16619_v4 = vld [vmem:[#allocation3 + $0x31] sm:$0xff] }
 0x4b8   : > { %13033 = vmatprep.mubr.msk.f32.mxu0 %vm6402_vm4, %v7293_v47  ;;  %17492 = vst [vmem:[#allocation26_spill] sm:$0xff] %v16619_v4  ;;  %v16623_v47 = vld [vmem:[#allocation3 + $0x49] sm:$0xff] }
 0x4b9   : > { %17493 = vst [vmem:[#allocation27_spill] sm:$0xff] %v16623_v47 }
 0x4bb   : > { %13034 = vmatmul.mubr.msk.f32.vlgmr.msra.gmra.mrb[32].mxu0 %vm6402_vm4, %v7294_v7  ;;  %v16627_v7 = vld [vmem:[#allocation3 + $0x51] sm:$0xff] }
 0x4bc   : > { %13082 = vmatpush3.msra.mxu0 %v16481_v44  ;;  %13036 = vmatprep.mubr.msk.f32.mxu0 %vm6402_vm4, %v16613_v36  ;;  %17494 = vst [vmem:[#allocation28_spill] sm:$0xff] %v16627_v7  ;;  %v16631_v44 = vld [vmem:[#allocation3 + $0x69] sm:$0xff]  ;;  %v16635_v36 = vld [vmem:[#allocation3 + $0x71] sm:$0xff] }
 0x4bd   : > { %13131 = vmatprep.subr.mxu0 %v16610_v11  ;;  %17495 = vst [vmem:[#allocation29_spill] sm:$0xff] %v16631_v44  ;;  %17496 = vst [vmem:[#allocation30_spill] sm:$0xff] %v16635_v36 }
 0x4bf   : > { %13037 = vmatmul.mubr.msk.f32.gmra.mrb[34].mxu0 %vm6402_vm4, %v16619_v4  ;;  %v16639_v4 = vld [vmem:[#allocation3 + $0x89] sm:$0xff] }
 0x4c0   : > { %13039 = vmatprep.mubr.msk.f32.mxu0 %vm6402_vm4, %v16623_v47  ;;  %17497 = vst [vmem:[#allocation31_spill] sm:$0xff] %v16639_v4  ;;  %v16643_v47 = vld [vmem:[#allocation3 + $0x91] sm:$0xff] }
 0x4c1   : > { %17498 = vst [vmem:[#allocation32_spill] sm:$0xff] %v16643_v47 }
 0x4c3   : > { %13040 = vmatmul.mubr.msk.f32.gmra.mrb[36].mxu0 %vm6402_vm4, %v16627_v7  ;;  %v16647_v7 = vld [vmem:[#allocation3 + $0xa9] sm:$0xff] }
 0x4c4   : > { %13042 = vmatprep.mubr.msk.f32.mxu0 %vm6402_vm4, %v16631_v44  ;;  %17499 = vst [vmem:[#allocation5_spill] sm:$0xff] %v16647_v7  ;;  %v16651_v44 = vld [vmem:[#allocation3 + $0xb1] sm:$0xff] }
 0x4c5   : > { %17500 = vst [vmem:[#allocation6_spill] sm:$0xff] %v16651_v44 }
 0x4c7   : > { %13043 = vmatmul.mubr.msk.f32.gmra.mrb[38].mxu0 %vm6402_vm4, %v16635_v36  ;;  %v16655_v36 = vld [vmem:[#allocation3 + $0xc9] sm:$0xff] }
 0x4c8   : > { %13045 = vmatprep.mubr.msk.f32.mxu0 %vm6402_vm4, %v16639_v4  ;;  %17501 = vst [vmem:[#allocation49_spill] sm:$0xff] %v16655_v36  ;;  %v16659_v4 = vld [vmem:[#allocation3 + $0xd1] sm:$0xff] }
 0x4c9   : > { %17502 = vst [vmem:[#allocation50_spill] sm:$0xff] %v16659_v4 }
 0x4cb   : > { %13046 = vmatmul.mubr.msk.f32.gmra.mrb[40].mxu0 %vm6402_vm4, %v16643_v47  ;;  %v16663_v47 = vld [vmem:[#allocation3 + $0xe9] sm:$0xff] }
 0x4cc   : > { %13048 = vmatprep.mubr.msk.f32.mxu0 %vm6402_vm4, %v16647_v7  ;;  %17503 = vst [vmem:[#allocation51_spill] sm:$0xff] %v16663_v47  ;;  %v16667_v7 = vld [vmem:[#allocation3 + $0xf1] sm:$0xff] }
 0x4cd   : > { %17504 = vst [vmem:[#allocation52_spill] sm:$0xff] %v16667_v7 }
 0x4cf   : > { %13049 = vmatmul.mubr.msk.f32.gmra.mrb[42].mxu0 %vm6402_vm4, %v16651_v44  ;;  %v16671_v44 = vld [vmem:[#allocation3 + $0x109] sm:$0xff] }
 0x4d0   : > { %13051 = vmatprep.mubr.msk.f32.mxu0 %vm6402_vm4, %v16655_v36  ;;  %17505 = vst [vmem:[#allocation53_spill] sm:$0xff] %v16671_v44  ;;  %v16675_v36 = vld [vmem:[#allocation3 + $0x111] sm:$0xff] }
 0x4d1   : > { %17506 = vst [vmem:[#allocation54_spill] sm:$0xff] %v16675_v36 }
 0x4d3   : > { %13052 = vmatmul.mubr.msk.f32.gmra.mrb[44].mxu0 %vm6402_vm4, %v16659_v4  ;;  %v16679_v4 = vld [vmem:[#allocation3 + $0x129] sm:$0xff] }
 0x4d4   : > { %13054 = vmatprep.mubr.msk.f32.mxu0 %vm6402_vm4, %v16663_v47  ;;  %17507 = vst [vmem:[#allocation55_spill] sm:$0xff] %v16679_v4  ;;  %v16683_v47 = vld [vmem:[#allocation3 + $0x131] sm:$0xff] }
 0x4d5   : > { %17508 = vst [vmem:[#allocation56_spill] sm:$0xff] %v16683_v47 }
 0x4d7   : > { %13055 = vmatmul.mubr.msk.f32.gmra.mrb[46].mxu0 %vm6402_vm4, %v16667_v7  ;;  %v16687_v7 = vld [vmem:[#allocation3 + $0x149] sm:$0xff] }
 0x4d8   : > { %13057 = vmatprep.mubr.msk.f32.mxu0 %vm6402_vm4, %v16671_v44  ;;  %17509 = vst [vmem:[#allocation57_spill] sm:$0xff] %v16687_v7  ;;  %v16691_v44 = vld [vmem:[#allocation3 + $0x151] sm:$0xff] }
 0x4d9   : > { %17510 = vst [vmem:[#allocation58_spill] sm:$0xff] %v16691_v44 }
 0x4db   : > { %13058 = vmatmul.mubr.msk.f32.gmra.mrb[48].mxu0 %vm6402_vm4, %v16675_v36  ;;  %v16695_v36 = vld [vmem:[#allocation3 + $0x169] sm:$0xff] }
 0x4dc   : > { %13060 = vmatprep.mubr.msk.f32.mxu0 %vm6402_vm4, %v16679_v4  ;;  %17511 = vst [vmem:[#allocation59_spill] sm:$0xff] %v16695_v36  ;;  %v16699_v4 = vld [vmem:[#allocation3 + $0x171] sm:$0xff] }
 0x4dd   : > { %17512 = vst [vmem:[#allocation60_spill] sm:$0xff] %v16699_v4 }
 0x4df   : > { %13061 = vmatmul.mubr.msk.f32.gmra.mrb[50].mxu0 %vm6402_vm4, %v16683_v47  ;;  %v16703_v47 = vld [vmem:[#allocation3 + $0x189] sm:$0xff] }
 0x4e0   : > { %13063 = vmatprep.mubr.msk.f32.mxu0 %vm6402_vm4, %v16687_v7  ;;  %17513 = vst [vmem:[#allocation61_spill] sm:$0xff] %v16703_v47  ;;  %v16707_v7 = vld [vmem:[#allocation3 + $0x191] sm:$0xff] }
 0x4e1   : > { %17514 = vst [vmem:[#allocation62_spill] sm:$0xff] %v16707_v7 }
 0x4e3   : > { %13064 = vmatmul.mubr.msk.f32.gmra.mrb[52].mxu0 %vm6402_vm4, %v16691_v44  ;;  %v16711_v44 = vld [vmem:[#allocation3 + $0x1a9] sm:$0xff] }
 0x4e4   : > { %13066 = vmatprep.mubr.msk.f32.mxu0 %vm6402_vm4, %v16695_v36  ;;  %17515 = vst [vmem:[#allocation63_spill] sm:$0xff] %v16711_v44  ;;  %v16715_v36 = vld [vmem:[#allocation3 + $0x1b1] sm:$0xff] }
 0x4e7   : > { %13067 = vmatmul.mubr.msk.f32.gmra.mrb[54].mxu0 %vm6402_vm4, %v16699_v4  ;;  %v16719_v4 = vld [vmem:[#allocation3 + $0x1c9] sm:$0xff] }
 0x4e8   : > { %13069 = vmatprep.mubr.msk.f32.mxu0 %vm6402_vm4, %v16703_v47  ;;  %17516 = vst [vmem:[#allocation64_spill] sm:$0xff] %v16719_v4  ;;  %v16723_v47 = vld [vmem:[#allocation3 + $0x1d1] sm:$0xff] }
 0x4e9   : > { %17517 = vst [vmem:[#allocation65_spill] sm:$0xff] %v16723_v47 }
 0x4eb   : > { %13070 = vmatmul.mubr.msk.f32.gmra.mrb[56].mxu0 %vm6402_vm4, %v16707_v7  ;;  %v16727_v7 = vld [vmem:[#allocation3 + $0x1e9] sm:$0xff] }
 0x4ec   : > { %13072 = vmatprep.mubr.msk.f32.mxu0 %vm6402_vm4, %v16711_v44  ;;  %17518 = vst [vmem:[#allocation66_spill] sm:$0xff] %v16727_v7  ;;  %v16731_v44 = vld [vmem:[#allocation3 + $0x1f1] sm:$0xff] }
 0x4ed   : > { %17519 = vst [vmem:[#allocation67_spill] sm:$0xff] %v16731_v44 }
 0x4ef   : > { %13073 = vmatmul.mubr.msk.f32.gmra.mrb[58].mxu0 %vm6402_vm4, %v16715_v36 }
 0x4f0   : > { %13075 = vmatprep.mubr.msk.f32.mxu0 %vm6402_vm4, %v16719_v4  ;;  %v11004_v4 = vld [vmem:[%s17282_s5 + $0x28] sm:$0xff] }
 0x4f3   : > { %13076 = vmatmul.mubr.msk.f32.gmra.mrb[60].mxu0 %vm6402_vm4, %v16723_v47 }
 0x4f4   : > { %13078 = vmatprep.mubr.msk.f32.mxu0 %vm6402_vm4, %v16727_v7 }
 0x4f7   : > { %13079 = vmatmul.mubr.msk.f32.gmra.mrb[62].mxu0 %vm6402_vm4, %v16731_v44 }
 0x4f8   : > { %13083 = vmatprep.mubr.msk.f32.mxu0 %vm6402_vm4, %v16281_v57  ;;  %v16803_v57 = vld [vmem:[#allocation3 + $0x20f] sm:$0xff] }
 0x4fb   : > { %13084 = vmatmul.mubr.msk.f32.vlgmr.msra.gmra.mrb[32].mxu0 %vm6402_vm4, %v16300_v0  ;;  %v11037_v0 = vld [vmem:[%s17282_s5 + $0x30] sm:$0xff] }
 0x4fc   : > { %13132 = vmatpush3.msra.mxu0 %v16610_v11  ;;  %13086 = vmatprep.mubr.msk.f32.mxu0 %vm6402_vm4, %v16305_v15  ;;  %v16799_v11 = vld [vmem:[#allocation3 + $0x207] sm:$0xff] }
 0x4fd   : > { %13181 = vmatprep.subr.mxu0 %v11004_v4  ;;  %v17521_v15 = vld [vmem:[#allocation24_spill] sm:$0xff] }
 0x4ff   : > { %13087 = vmatmul.mubr.msk.f32.gmra.mrb[34].mxu0 %vm6402_vm4, %v16314_v26  ;;  %v16870_v26 = vld [vmem:[#allocation3 + $0x208] sm:$0xff] }
 0x500   : > { %13089 = vmatprep.mubr.msk.f32.mxu0 %vm6402_vm4, %v16319_v28  ;;  %17522 = vst [vmem:[#allocation68_spill] sm:$0xff] %v16870_v26  ;;  %v16874_v28 = vld [vmem:[#allocation3 + $0x210] sm:$0xff] }
 0x501   : > { %17523 = vst [vmem:[#allocation69_spill] sm:$0xff] %v16874_v28 }
 0x503   : > { %13090 = vmatmul.mubr.msk.f32.gmra.mrb[36].mxu0 %vm6402_vm4, %v16328_v31  ;;  %v17524_v31 = vld [vmem:[#allocation25_spill] sm:$0xff] }
 0x504   : > { %13092 = vmatprep.mubr.msk.f32.mxu0 %vm6402_vm4, %v16333_v5 }
 0x507   : > { %13093 = vmatmul.mubr.msk.f32.gmra.mrb[38].mxu0 %vm6402_vm4, %v16342_v61 }
 0x508   : > { %13095 = vmatprep.mubr.msk.f32.mxu0 %vm6402_vm4, %v16347_v17 }
 0x50b   : > { %13096 = vmatmul.mubr.msk.f32.gmra.mrb[40].mxu0 %vm6402_vm4, %v16356_v3 }
 0x50c   : > { %13098 = vmatprep.mubr.msk.f32.mxu0 %vm6402_vm4, %v16361_v41 }
 0x50f   : > { %13099 = vmatmul.mubr.msk.f32.gmra.mrb[42].mxu0 %vm6402_vm4, %v16370_v40 }
 0x510   : > { %13101 = vmatprep.mubr.msk.f32.mxu0 %vm6402_vm4, %v16375_v55 }
 0x513   : > { %13102 = vmatmul.mubr.msk.f32.gmra.mrb[44].mxu0 %vm6402_vm4, %v16384_v63 }
 0x514   : > { %13104 = vmatprep.mubr.msk.f32.mxu0 %vm6402_vm4, %v16389_v62 }
 0x517   : > { %13105 = vmatmul.mubr.msk.f32.gmra.mrb[46].mxu0 %vm6402_vm4, %v16398_v45 }
 0x518   : > { %13107 = vmatprep.mubr.msk.f32.mxu0 %vm6402_vm4, %v16403_v24 }
 0x51b   : > { %13108 = vmatmul.mubr.msk.f32.gmra.mrb[48].mxu0 %vm6402_vm4, %v16414_v54 }
 0x51c   : > { %13110 = vmatprep.mubr.msk.f32.mxu0 %vm6402_vm4, %v16419_v13 }
 0x51f   : > { %13111 = vmatmul.mubr.msk.f32.gmra.mrb[50].mxu0 %vm6402_vm4, %v16426_v33 }
 0x520   : > { %13113 = vmatprep.mubr.msk.f32.mxu0 %vm6402_vm4, %v16431_v48 }
 0x523   : > { %13114 = vmatmul.mubr.msk.f32.gmra.mrb[52].mxu0 %vm6402_vm4, %v16436_v60 }
 0x524   : > { %13116 = vmatprep.mubr.msk.f32.mxu0 %vm6402_vm4, %v16441_v59 }
 0x527   : > { %13117 = vmatmul.mubr.msk.f32.gmra.mrb[54].mxu0 %vm6402_vm4, %v16447_v12 }
 0x528   : > { %13119 = vmatprep.mubr.msk.f32.mxu0 %vm6402_vm4, %v16452_v2 }
 0x52b   : > { %13120 = vmatmul.mubr.msk.f32.gmra.mrb[56].mxu0 %vm6402_vm4, %v16457_v20 }
 0x52c   : > { %13122 = vmatprep.mubr.msk.f32.mxu0 %vm6402_vm4, %v16461_v16 }
 0x52f   : > { %13123 = vmatmul.mubr.msk.f32.gmra.mrb[58].mxu0 %vm6402_vm4, %v16465_v46 }
 0x530   : > { %13125 = vmatprep.mubr.msk.f32.mxu0 %vm6402_vm4, %v16469_v49 }
 0x533   : > { %13126 = vmatmul.mubr.msk.f32.gmra.mrb[60].mxu0 %vm6402_vm4, %v16473_v21 }
 0x534   : > { %13128 = vmatprep.mubr.msk.f32.mxu0 %vm6402_vm4, %v16799_v11 }
 0x537   : > { %13129 = vmatmul.mubr.msk.f32.gmra.mrb[62].mxu0 %vm6402_vm4, %v16803_v57 }
 0x538   : > { %13133 = vmatprep.mubr.msk.f32.mxu0 %vm6402_vm4, %v16484_v29  ;;  %v11070_v29 = vld [vmem:[%s17282_s5 + $0x38] sm:$0xff] }
 0x53b   : > { %13134 = vmatmul.mubr.msk.f32.vlgmr.msra.gmra.mrb[32].mxu0 %vm6402_vm4, %v16490_v30  ;;  %v17525_v30 = vld [vmem:[#allocation26_spill] sm:$0xff] }
 0x53c   : > { %13182 = vmatpush3.msra.mxu0 %v11004_v4  ;;  %13136 = vmatprep.mubr.msk.f32.mxu0 %vm6402_vm4, %v16494_v52  ;;  %v17520_v4 = vld [vmem:[#allocation22_spill] sm:$0xff] }
 0x53d   : > { %13231 = vmatprep.subr.mxu0 %v11037_v0 }
 0x53f   : > { %13137 = vmatmul.mubr.msk.f32.gmra.mrb[34].mxu0 %vm6402_vm4, %v16498_v42 }
 0x540   : > { %13139 = vmatprep.mubr.msk.f32.mxu0 %vm6402_vm4, %v16502_v6 }
 0x543   : > { %13140 = vmatmul.mubr.msk.f32.gmra.mrb[36].mxu0 %vm6402_vm4, %v16506_v43 }
 0x544   : > { %13142 = vmatprep.mubr.msk.f32.mxu0 %vm6402_vm4, %v16510_v22 }
 0x547   : > { %13143 = vmatmul.mubr.msk.f32.gmra.mrb[38].mxu0 %vm6402_vm4, %v16514_v37 }
 0x548   : > { %13145 = vmatprep.mubr.msk.f32.mxu0 %vm6402_vm4, %v16518_v8 }
 0x54b   : > { %13146 = vmatmul.mubr.msk.f32.gmra.mrb[40].mxu0 %vm6402_vm4, %v16522_v53 }
 0x54c   : > { %13148 = vmatprep.mubr.msk.f32.mxu0 %vm6402_vm4, %v16526_v27 }
 0x54f   : > { %13149 = vmatmul.mubr.msk.f32.gmra.mrb[42].mxu0 %vm6402_vm4, %v16530_v19 }
 0x550   : > { %13151 = vmatprep.mubr.msk.f32.mxu0 %vm6402_vm4, %v16534_v14 }
 0x553   : > { %13152 = vmatmul.mubr.msk.f32.gmra.mrb[44].mxu0 %vm6402_vm4, %v16538_v39 }
 0x554   : > { %13154 = vmatprep.mubr.msk.f32.mxu0 %vm6402_vm4, %v16542_v32 }
 0x557   : > { %13155 = vmatmul.mubr.msk.f32.gmra.mrb[46].mxu0 %vm6402_vm4, %v16546_v10 }
 0x558   : > { %13157 = vmatprep.mubr.msk.f32.mxu0 %vm6402_vm4, %v16550_v1 }
 0x55b   : > { %13158 = vmatmul.mubr.msk.f32.gmra.mrb[48].mxu0 %vm6402_vm4, %v16554_v25 }
 0x55c   : > { %13160 = vmatprep.mubr.msk.f32.mxu0 %vm6402_vm4, %v16558_v51 }
 0x55f   : > { %13161 = vmatmul.mubr.msk.f32.gmra.mrb[50].mxu0 %vm6402_vm4, %v16562_v23 }
 0x560   : > { %13163 = vmatprep.mubr.msk.f32.mxu0 %vm6402_vm4, %v16566_v50 }
 0x563   : > { %13164 = vmatmul.mubr.msk.f32.gmra.mrb[52].mxu0 %vm6402_vm4, %v16570_v18 }
 0x564   : > { %13166 = vmatprep.mubr.msk.f32.mxu0 %vm6402_vm4, %v16574_v58 }
 0x567   : > { %13167 = vmatmul.mubr.msk.f32.gmra.mrb[54].mxu0 %vm6402_vm4, %v16578_v9 }
 0x568   : > { %13169 = vmatprep.mubr.msk.f32.mxu0 %vm6402_vm4, %v16582_v35 }
 0x56b   : > { %13170 = vmatmul.mubr.msk.f32.gmra.mrb[56].mxu0 %vm6402_vm4, %v16586_v38 }
 0x56c   : > { %13172 = vmatprep.mubr.msk.f32.mxu0 %vm6402_vm4, %v16590_v56 }
 0x56f   : > { %13173 = vmatmul.mubr.msk.f32.gmra.mrb[58].mxu0 %vm6402_vm4, %v17520_v4  ;;  %v17531_v4 = vld [vmem:[#allocation32_spill] sm:$0xff] }
 0x570   : > { %13175 = vmatprep.mubr.msk.f32.mxu0 %vm6402_vm4, %v16598_v34  ;;  %v17528_v34 = vld [vmem:[#allocation29_spill] sm:$0xff] }
 0x573   : > { %13176 = vmatmul.mubr.msk.f32.gmra.mrb[60].mxu0 %vm6402_vm4, %v17521_v15  ;;  %v17526_v15 = vld [vmem:[#allocation27_spill] sm:$0xff] }
 0x574   : > { %13178 = vmatprep.mubr.msk.f32.mxu0 %vm6402_vm4, %v16870_v26  ;;  %v17527_v26 = vld [vmem:[#allocation28_spill] sm:$0xff] }
 0x577   : > { %13179 = vmatmul.mubr.msk.f32.gmra.mrb[62].mxu0 %vm6402_vm4, %v16874_v28  ;;  %v17529_v28 = vld [vmem:[#allocation30_spill] sm:$0xff] }
 0x578   : > { %13183 = vmatprep.mubr.msk.f32.mxu0 %vm6402_vm4, %v17524_v31  ;;  %v17530_v31 = vld [vmem:[#allocation31_spill] sm:$0xff] }
 0x57b   : > { %13184 = vmatmul.mubr.msk.f32.vlgmr.msra.gmra.mrb[32].mxu0 %vm6402_vm4, %v17525_v30  ;;  %v17533_v30 = vld [vmem:[#allocation6_spill] sm:$0xff] }
 0x57c   : > { %13232 = vmatpush3.msra.mxu0 %v11037_v0  ;;  %13186 = vmatprep.mubr.msk.f32.mxu0 %vm6402_vm4, %v17526_v15  ;;  %v17532_v0 = vld [vmem:[#allocation5_spill] sm:$0xff] }
 0x57d   : > { %13281 = vmatprep.subr.mxu0 %v11070_v29  ;;  %v17534_v15 = vld [vmem:[#allocation49_spill] sm:$0xff] }
 0x57f   : > { %13187 = vmatmul.mubr.msk.f32.gmra.mrb[34].mxu0 %vm6402_vm4, %v17527_v26  ;;  %v17535_v26 = vld [vmem:[#allocation50_spill] sm:$0xff] }
 0x580   : > { %13189 = vmatprep.mubr.msk.f32.mxu0 %vm6402_vm4, %v17528_v34  ;;  %v17536_v34 = vld [vmem:[#allocation51_spill] sm:$0xff] }
 0x583   : > { %13190 = vmatmul.mubr.msk.f32.gmra.mrb[36].mxu0 %vm6402_vm4, %v17529_v28  ;;  %v17537_v28 = vld [vmem:[#allocation52_spill] sm:$0xff] }
 0x584   : > { %13192 = vmatprep.mubr.msk.f32.mxu0 %vm6402_vm4, %v17530_v31  ;;  %v17538_v31 = vld [vmem:[#allocation53_spill] sm:$0xff] }
 0x587   : > { %13193 = vmatmul.mubr.msk.f32.gmra.mrb[38].mxu0 %vm6402_vm4, %v17531_v4  ;;  %v17539_v4 = vld [vmem:[#allocation54_spill] sm:$0xff] }
 0x588   : > { %13195 = vmatprep.mubr.msk.f32.mxu0 %vm6402_vm4, %v17532_v0  ;;  %v17540_v0 = vld [vmem:[#allocation55_spill] sm:$0xff] }
 0x58b   : > { %13196 = vmatmul.mubr.msk.f32.gmra.mrb[40].mxu0 %vm6402_vm4, %v17533_v30  ;;  %v17541_v30 = vld [vmem:[#allocation56_spill] sm:$0xff] }
 0x58c   : > { %13198 = vmatprep.mubr.msk.f32.mxu0 %vm6402_vm4, %v17534_v15  ;;  %v17542_v15 = vld [vmem:[#allocation57_spill] sm:$0xff] }
 0x58f   : > { %13199 = vmatmul.mubr.msk.f32.gmra.mrb[42].mxu0 %vm6402_vm4, %v17535_v26  ;;  %v17543_v26 = vld [vmem:[#allocation58_spill] sm:$0xff] }
 0x590   : > { %13201 = vmatprep.mubr.msk.f32.mxu0 %vm6402_vm4, %v17536_v34  ;;  %v17544_v34 = vld [vmem:[#allocation59_spill] sm:$0xff] }
 0x593   : > { %13202 = vmatmul.mubr.msk.f32.gmra.mrb[44].mxu0 %vm6402_vm4, %v17537_v28  ;;  %v17545_v28 = vld [vmem:[#allocation60_spill] sm:$0xff] }
 0x594   : > { %13204 = vmatprep.mubr.msk.f32.mxu0 %vm6402_vm4, %v17538_v31  ;;  %v17546_v31 = vld [vmem:[#allocation61_spill] sm:$0xff] }
 0x597   : > { %13205 = vmatmul.mubr.msk.f32.gmra.mrb[46].mxu0 %vm6402_vm4, %v17539_v4  ;;  %v17547_v4 = vld [vmem:[#allocation62_spill] sm:$0xff] }
 0x598   : > { %13207 = vmatprep.mubr.msk.f32.mxu0 %vm6402_vm4, %v17540_v0  ;;  %v17548_v0 = vld [vmem:[#allocation63_spill] sm:$0xff] }
 0x59b   : > { %13208 = vmatmul.mubr.msk.f32.gmra.mrb[48].mxu0 %vm6402_vm4, %v17541_v30 }
 0x59c   : > { %13210 = vmatprep.mubr.msk.f32.mxu0 %vm6402_vm4, %v17542_v15  ;;  %v17549_v15 = vld [vmem:[#allocation64_spill] sm:$0xff] }
 0x59f   : > { %13211 = vmatmul.mubr.msk.f32.gmra.mrb[50].mxu0 %vm6402_vm4, %v17543_v26 }
 0x5a0   : > { %13213 = vmatprep.mubr.msk.f32.mxu0 %vm6402_vm4, %v17544_v34 }
 0x5a3   : > { %13214 = vmatmul.mubr.msk.f32.gmra.mrb[52].mxu0 %vm6402_vm4, %v17545_v28 }
 0x5a4   : > { %13216 = vmatprep.mubr.msk.f32.mxu0 %vm6402_vm4, %v17546_v31  ;;  %v16941_v31 = vld [vmem:[#allocation3 + $0x209] sm:$0xff] }
 0x5a5   : > { %17550 = vst [vmem:[#allocation25_spill] sm:$0xff] %v16941_v31 }
 0x5a7   : > { %13217 = vmatmul.mubr.msk.f32.gmra.mrb[54].mxu0 %vm6402_vm4, %v17547_v4 }
 0x5a8   : > { %13219 = vmatprep.mubr.msk.f32.mxu0 %vm6402_vm4, %v17548_v0  ;;  %v16945_v0 = vld [vmem:[#allocation3 + $0x211] sm:$0xff] }
 0x5ab   : > { %13220 = vmatmul.mubr.msk.f32.gmra.mrb[56].mxu0 %vm6402_vm4, %v16715_v36 }
 0x5ac   : > { %13222 = vmatprep.mubr.msk.f32.mxu0 %vm6402_vm4, %v17549_v15  ;;  %v8842_v15 = vld [vmem:[#allocation3 + $0x47] sm:$0xff] }
 0x5af   : > { %13223 = vmatmul.mubr.msk.f32.gmra.mrb[58].mxu0 %vm6402_vm4, %v16723_v47  ;;  %v8843_v47 = vld [vmem:[#allocation3 + $0x4f] sm:$0xff] }
 0x5b0   : > { %13225 = vmatprep.mubr.msk.f32.mxu0 %vm6402_vm4, %v16727_v7  ;;  %v11103_v7 = vld [vmem:[%s17282_s5 + $0x40] sm:$0xff] }
 0x5b3   : > { %13226 = vmatmul.mubr.msk.f32.gmra.mrb[60].mxu0 %vm6402_vm4, %v16731_v44  ;;  %v8844_v44 = vld [vmem:[#allocation3 + $0x67] sm:$0xff] }
 0x5b4   : > { %13228 = vmatprep.mubr.msk.f32.mxu0 %vm6402_vm4, %v16941_v31  ;;  %v8845_v31 = vld [vmem:[#allocation3 + $0x6f] sm:$0xff] }
 0x5b7   : > { %13229 = vmatmul.mubr.msk.f32.gmra.mrb[62].mxu0 %vm6402_vm4, %v16945_v0 }
 0x5b8   : > { %13233 = vmatprep.mubr.msk.f32.mxu0 %vm6402_vm4, %v8842_v15  ;;  %v17581_v15 = vld [vmem:[#allocation9_spill] sm:$0xff] }
 0x5bb   : > { %13234 = vmatmul.mubr.msk.f32.vlgmr.msra.gmra.mrb[32].mxu0 %vm6402_vm4, %v8843_v47 }
 0x5bc   : > { %13282 = vmatpush3.msra.mxu0 %v11070_v29  ;;  %13236 = vmatprep.mubr.msk.f32.mxu0 %vm6402_vm4, %v8844_v44 }
 0x5bd   : > { %13331 = vmatprep.subr.mxu0 %v11103_v7 }
 0x5bf   : > { %13237 = vmatmul.mubr.msk.f32.gmra.mrb[34].mxu0 %vm6402_vm4, %v8845_v31  ;;  %v17582_v31 = vld [vmem:[#allocation10_spill] sm:$0xff] }
 0x5c0   : > { %13239 = vmatprep.mubr.msk.f32.mxu0 %vm6402_vm4, %v16333_v5  ;;  %v8872_v5 = vld [vmem:[#allocation3 + $0x227] sm:$0xff] }
 0x5c3   : > { %13240 = vmatmul.mubr.msk.f32.gmra.mrb[36].mxu0 %vm6402_vm4, %v16342_v61  ;;  %v8873_v61 = vld [vmem:[#allocation3 + $0x22f] sm:$0xff] }
 0x5c4   : > { %13242 = vmatprep.mubr.msk.f32.mxu0 %vm6402_vm4, %v16347_v17  ;;  %v17559_v17 = vld [vmem:[#allocation30_spill] sm:$0xff] }
 0x5c7   : > { %13243 = vmatmul.mubr.msk.f32.gmra.mrb[38].mxu0 %vm6402_vm4, %v16356_v3  ;;  %v17560_v3 = vld [vmem:[#allocation31_spill] sm:$0xff] }
 0x5c8   : > { %13245 = vmatprep.mubr.msk.f32.mxu0 %vm6402_vm4, %v16361_v41  ;;  %v17561_v41 = vld [vmem:[#allocation32_spill] sm:$0xff] }
 0x5cb   : > { %13246 = vmatmul.mubr.msk.f32.gmra.mrb[40].mxu0 %vm6402_vm4, %v16370_v40  ;;  %v17562_v40 = vld [vmem:[#allocation5_spill] sm:$0xff] }
 0x5cc   : > { %13248 = vmatprep.mubr.msk.f32.mxu0 %vm6402_vm4, %v16375_v55  ;;  %v17563_v55 = vld [vmem:[#allocation6_spill] sm:$0xff] }
 0x5cf   : > { %13249 = vmatmul.mubr.msk.f32.gmra.mrb[42].mxu0 %vm6402_vm4, %v16384_v63  ;;  %v17564_v63 = vld [vmem:[#allocation49_spill] sm:$0xff] }
 0x5d0   : > { %13251 = vmatprep.mubr.msk.f32.mxu0 %vm6402_vm4, %v16389_v62  ;;  %v17565_v62 = vld [vmem:[#allocation50_spill] sm:$0xff] }
 0x5d3   : > { %13252 = vmatmul.mubr.msk.f32.gmra.mrb[44].mxu0 %vm6402_vm4, %v16398_v45  ;;  %v17566_v45 = vld [vmem:[#allocation51_spill] sm:$0xff] }
 0x5d4   : > { %13254 = vmatprep.mubr.msk.f32.mxu0 %vm6402_vm4, %v16403_v24  ;;  %v17567_v24 = vld [vmem:[#allocation52_spill] sm:$0xff] }
 0x5d7   : > { %13255 = vmatmul.mubr.msk.f32.gmra.mrb[46].mxu0 %vm6402_vm4, %v16414_v54  ;;  %v17568_v54 = vld [vmem:[#allocation53_spill] sm:$0xff] }
 0x5d8   : > { %13257 = vmatprep.mubr.msk.f32.mxu0 %vm6402_vm4, %v16419_v13  ;;  %v17569_v13 = vld [vmem:[#allocation54_spill] sm:$0xff] }
 0x5db   : > { %13258 = vmatmul.mubr.msk.f32.gmra.mrb[48].mxu0 %vm6402_vm4, %v16426_v33  ;;  %v17570_v33 = vld [vmem:[#allocation55_spill] sm:$0xff] }
 0x5dc   : > { %13260 = vmatprep.mubr.msk.f32.mxu0 %vm6402_vm4, %v16431_v48  ;;  %v17571_v48 = vld [vmem:[#allocation57_spill] sm:$0xff] }
 0x5df   : > { %13261 = vmatmul.mubr.msk.f32.gmra.mrb[50].mxu0 %vm6402_vm4, %v16436_v60  ;;  %v17572_v60 = vld [vmem:[#allocation61_spill] sm:$0xff] }
 0x5e0   : > { %13263 = vmatprep.mubr.msk.f32.mxu0 %vm6402_vm4, %v16441_v59  ;;  %v17573_v59 = vld [vmem:[#allocation63_spill] sm:$0xff] }
 0x5e3   : > { %13264 = vmatmul.mubr.msk.f32.gmra.mrb[52].mxu0 %vm6402_vm4, %v16447_v12  ;;  %v17574_v12 = vld [vmem:[#allocation64_spill] sm:$0xff] }
 0x5e4   : > { %13266 = vmatprep.mubr.msk.f32.mxu0 %vm6402_vm4, %v16452_v2  ;;  %v17575_v2 = vld [vmem:[#allocation65_spill] sm:$0xff] }
 0x5e7   : > { %13267 = vmatmul.mubr.msk.f32.gmra.mrb[54].mxu0 %vm6402_vm4, %v16457_v20  ;;  %v17577_v20 = vld [vmem:[#allocation67_spill] sm:$0xff] }
 0x5e8   : > { %13269 = vmatprep.mubr.msk.f32.mxu0 %vm6402_vm4, %v16461_v16  ;;  %v17578_v16 = vld [vmem:[#allocation25_spill] sm:$0xff] }
 0x5eb   : > { %13270 = vmatmul.mubr.msk.f32.gmra.mrb[56].mxu0 %vm6402_vm4, %v16465_v46  ;;  %v9647_v46 = vld [vmem:[#allocation3 + $0x231] sm:$0xff] }
 0x5ec   : > { %13272 = vmatprep.mubr.msk.f32.mxu0 %vm6402_vm4, %v16469_v49  ;;  %v17137_v49 = vld [vmem:[%s17283_s6] ss:$0 sm:$0xff] }
 0x5ef   : > { %13273 = vmatmul.mubr.msk.f32.gmra.mrb[58].mxu0 %vm6402_vm4, %v16473_v21 }
 0x5f0   : > { %13275 = vmatprep.mubr.msk.f32.mxu0 %vm6402_vm4, %v16799_v11 }
 0x5f3   : > { %13276 = vmatmul.mubr.msk.f32.gmra.mrb[60].mxu0 %vm6402_vm4, %v16803_v57 }
 0x5f4   : > { %13278 = vmatprep.mubr.msk.f32.mxu0 %vm6402_vm4, %v8872_v5 }
 0x5f7   : > { %13279 = vmatmul.mubr.msk.f32.gmra.mrb[62].mxu0 %vm6402_vm4, %v8873_v61 }
 0x5f8   : > { %13283 = vmatprep.mubr.msk.f32.mxu0 %vm6402_vm4, %v16494_v52 }
 0x5fb   : > { %13284 = vmatmul.mubr.msk.f32.vlgmr.msra.gmra.mrb[32].mxu0 %vm6402_vm4, %v16498_v42 }
 0x5fc   : > { %13332 = vmatpush3.msra.mxu0 %v11103_v7  ;;  %13286 = vmatprep.mubr.msk.f32.mxu0 %vm6402_vm4, %v16502_v6 }
 0x5ff   : > { %13287 = vmatmul.mubr.msk.f32.gmra.mrb[34].mxu0 %vm6402_vm4, %v16506_v43 }
 0x600   : > { %13289 = vmatprep.mubr.msk.f32.mxu0 %vm6402_vm4, %v16510_v22 }
 0x603   : > { %13290 = vmatmul.mubr.msk.f32.gmra.mrb[36].mxu0 %vm6402_vm4, %v16514_v37 }
 0x604   : > { %13292 = vmatprep.mubr.msk.f32.mxu0 %vm6402_vm4, %v16518_v8 }
 0x607   : > { %13293 = vmatmul.mubr.msk.f32.gmra.mrb[38].mxu0 %vm6402_vm4, %v16522_v53 }
 0x608   : > { %13295 = vmatprep.mubr.msk.f32.mxu0 %vm6402_vm4, %v16526_v27 }
 0x60b   : > { %13296 = vmatmul.mubr.msk.f32.gmra.mrb[40].mxu0 %vm6402_vm4, %v16530_v19  ;;  %v17579_v19 = vld [vmem:[#allocation7_spill] sm:$0xff] }
 0x60c   : > { %13298 = vmatprep.mubr.msk.f32.mxu0 %vm6402_vm4, %v16534_v14 }
 0x60f   : > { %13299 = vmatmul.mubr.msk.f32.gmra.mrb[42].mxu0 %vm6402_vm4, %v16538_v39 }
 0x610   : > { %13301 = vmatprep.mubr.msk.f32.mxu0 %vm6402_vm4, %v16542_v32 }
 0x613   : > { %13302 = vmatmul.mubr.msk.f32.gmra.mrb[44].mxu0 %vm6402_vm4, %v16546_v10  ;;  %v17580_v10 = vld [vmem:[#allocation8_spill] sm:$0xff] }
 0x614   : > { %13304 = vmatprep.mubr.msk.f32.mxu0 %vm6402_vm4, %v16550_v1 }
 0x617   : > { %13305 = vmatmul.mubr.msk.f32.gmra.mrb[46].mxu0 %vm6402_vm4, %v16554_v25  ;;  %v17558_v25 = vld [vmem:[#allocation29_spill] sm:$0xff] }
 0x618   : > { %13307 = vmatprep.mubr.msk.f32.mxu0 %vm6402_vm4, %v16558_v51  ;;  %v17557_v51 = vld [vmem:[#allocation28_spill] sm:$0xff] }
 0x61b   : > { %13308 = vmatmul.mubr.msk.f32.gmra.mrb[48].mxu0 %vm6402_vm4, %v16562_v23  ;;  %v17551_v23 = vld [vmem:[#allocation22_spill] sm:$0xff] }
 0x61c   : > { %13310 = vmatprep.mubr.msk.f32.mxu0 %vm6402_vm4, %v16566_v50  ;;  %v17552_v50 = vld [vmem:[#allocation23_spill] sm:$0xff] }
 0x61f   : > { %13311 = vmatmul.mubr.msk.f32.gmra.mrb[50].mxu0 %vm6402_vm4, %v16570_v18  ;;  %v17553_v18 = vld [vmem:[#allocation24_spill] sm:$0xff] }
 0x620   : > { %13313 = vmatprep.mubr.msk.f32.mxu0 %vm6402_vm4, %v16574_v58  ;;  %v17554_v58 = vld [vmem:[#allocation68_spill] sm:$0xff] }
 0x623   : > { %13314 = vmatmul.mubr.msk.f32.gmra.mrb[52].mxu0 %vm6402_vm4, %v16578_v9  ;;  %v17555_v9 = vld [vmem:[#allocation69_spill] sm:$0xff] }
 0x624   : > { %13316 = vmatprep.mubr.msk.f32.mxu0 %vm6402_vm4, %v16582_v35  ;;  %v9259_v35 = vld [vmem:[#allocation3 + $0x228] sm:$0xff] }
 0x627   : > { %13317 = vmatmul.mubr.msk.f32.gmra.mrb[54].mxu0 %vm6402_vm4, %v16586_v38  ;;  %v9260_v38 = vld [vmem:[#allocation3 + $0x230] sm:$0xff] }
 0x628   : > { %13319 = vmatprep.mubr.msk.f32.mxu0 %vm6402_vm4, %v16590_v56  ;;  %v17556_v56 = vld [vmem:[#allocation27_spill] sm:$0xff] }
 0x62b   : > { %13320 = vmatmul.mubr.msk.f32.gmra.mrb[56].mxu0 %vm6402_vm4, %v17551_v23 }
 0x62c   : > { %13322 = vmatprep.mubr.msk.f32.mxu0 %vm6402_vm4, %v17552_v50 }
 0x62f   : > { %13323 = vmatmul.mubr.msk.f32.gmra.mrb[58].mxu0 %vm6402_vm4, %v17553_v18 }
 0x630   : > { %13325 = vmatprep.mubr.msk.f32.mxu0 %vm6402_vm4, %v17554_v58  ;;  %v17583_v58 = vld [vmem:[#allocation11_spill] sm:$0xff] }
 0x633   : > { %13326 = vmatmul.mubr.msk.f32.gmra.mrb[60].mxu0 %vm6402_vm4, %v17555_v9 }
 0x634   : > { %13328 = vmatprep.mubr.msk.f32.mxu0 %vm6402_vm4, %v9259_v35 }
 0x637   : > { %13329 = vmatmul.mubr.msk.f32.gmra.mrb[62].mxu0 %vm6402_vm4, %v9260_v38 }
 0x638   : > { %13333 = vmatprep.mubr.msk.f32.mxu0 %vm6402_vm4, %v17556_v56  ;;  %v17584_v56 = vld [vmem:[#allocation12_spill] sm:$0xff] }
 0x63b   : > { %13334 = vmatmul.mubr.msk.f32.vlgmr.msra.gmra.mrb[32].mxu0 %vm6402_vm4, %v17557_v51 }
 0x63c   : > { %13336 = vmatprep.mubr.msk.f32.mxu0 %vm6402_vm4, %v17558_v25 }
 0x63f   : > { %13337 = vmatmul.mubr.msk.f32.gmra.mrb[34].mxu0 %vm6402_vm4, %v17559_v17 }
 0x640   : > { %13339 = vmatprep.mubr.msk.f32.mxu0 %vm6402_vm4, %v17560_v3 }
 0x643   : > { %13340 = vmatmul.mubr.msk.f32.gmra.mrb[36].mxu0 %vm6402_vm4, %v17561_v41 }
 0x644   : > { %13342 = vmatprep.mubr.msk.f32.mxu0 %vm6402_vm4, %v17562_v40 }
 0x647   : > { %13343 = vmatmul.mubr.msk.f32.gmra.mrb[38].mxu0 %vm6402_vm4, %v17563_v55 }
 0x648   : > { %13345 = vmatprep.mubr.msk.f32.mxu0 %vm6402_vm4, %v17564_v63  ;;  %v17585_v63 = vld [vmem:[#allocation13_spill] sm:$0xff] }
 0x64b   : > { %13346 = vmatmul.mubr.msk.f32.gmra.mrb[40].mxu0 %vm6402_vm4, %v17565_v62 }
 0x64c   : > { %13348 = vmatprep.mubr.msk.f32.mxu0 %vm6402_vm4, %v17566_v45 }
 0x64f   : > { %13349 = vmatmul.mubr.msk.f32.gmra.mrb[42].mxu0 %vm6402_vm4, %v17567_v24 }
 0x650   : > { %13351 = vmatprep.mubr.msk.f32.mxu0 %vm6402_vm4, %v17568_v54  ;;  %v17586_v54 = vld [vmem:[#allocation14_spill] sm:$0xff] }
 0x653   : > { %13352 = vmatmul.mubr.msk.f32.gmra.mrb[44].mxu0 %vm6402_vm4, %v17569_v13 }
 0x654   : > { %13354 = vmatprep.mubr.msk.f32.mxu0 %vm6402_vm4, %v17570_v33 }
 0x657   : > { %13355 = vmatmul.mubr.msk.f32.gmra.mrb[46].mxu0 %vm6402_vm4, %v17541_v30 }
 0x658   : > { %13357 = vmatprep.mubr.msk.f32.mxu0 %vm6402_vm4, %v17571_v48 }
 0x65b   : > { %13358 = vmatmul.mubr.msk.f32.gmra.mrb[48].mxu0 %vm6402_vm4, %v17543_v26 }
 0x65c   : > { %13360 = vmatprep.mubr.msk.f32.mxu0 %vm6402_vm4, %v17544_v34  ;;  %v17576_v34 = vld [vmem:[#allocation66_spill] sm:$0xff] }
 0x65f   : > { %13361 = vmatmul.mubr.msk.f32.gmra.mrb[50].mxu0 %vm6402_vm4, %v17545_v28 }
 0x660   : > { %13363 = vmatprep.mubr.msk.f32.mxu0 %vm6402_vm4, %v17572_v60 }
 0x663   : > { %13364 = vmatmul.mubr.msk.f32.gmra.mrb[52].mxu0 %vm6402_vm4, %v17547_v4 }
 0x664   : > { %13366 = vmatprep.mubr.msk.f32.mxu0 %vm6402_vm4, %v17573_v59 }
 0x667   : > { %13367 = vmatmul.mubr.msk.f32.gmra.mrb[54].mxu0 %vm6402_vm4, %v16715_v36  ;;  %v9646_v36 = vld [vmem:[#allocation3 + $0x229] sm:$0xff] }
 0x668   : > { %13369 = vmatprep.mubr.msk.f32.mxu0 %vm6402_vm4, %v17574_v12 }
 0x66b   : > { %13370 = vmatmul.mubr.msk.f32.gmra.mrb[56].mxu0 %vm6402_vm4, %v17575_v2 }
 0x66c   : > { %13372 = vmatprep.mubr.msk.f32.mxu0 %vm6402_vm4, %v17576_v34  ;;  %v17587_v34 = vld [vmem:[#allocation15_spill] sm:$0xff] }
 0x66f   : > { %13373 = vmatmul.mubr.msk.f32.gmra.mrb[58].mxu0 %vm6402_vm4, %v17577_v20 }
 0x670   : > { %13375 = vmatprep.mubr.msk.f32.mxu0 %vm6402_vm4, %v17578_v16 }
 0x673   : > { %13376 = vmatmul.mubr.msk.f32.gmra.mrb[60].mxu0 %vm6402_vm4, %v16945_v0 }
 0x674   : > { %13378 = vmatprep.mubr.msk.f32.mxu0 %vm6402_vm4, %v9646_v36 }
 0x677   : > { %13379 = vmatmul.mubr.msk.f32.gmra.mrb[62].mxu0 %vm6402_vm4, %v9647_v46  ;;  %v17588_v46 = vld [vmem:[#allocation16_spill] sm:$0xff] }
 0x70e   : > { %v13335_v21 = vpop.f32.mrb[32].mxu0 }
 0x70f   : > { %v13479_v52 = vadd.f32 %v13335_v21, %v17137_v49  ;;  %v9812_v42 = vpop.f32.mrb[33].mxu0 }
 0x710   : > { %v13480_v6 = vadd.f32 %v17137_v49, %v9812_v42 }
 0x711   : > { %vm10004_vm8 = vcmp.ge.f32.partialorder %v13479_v52, 0.0  ;;  %v10036_v43 = vmul.f32 0.2, %v13479_v52 }
 0x712   : > { %vm10003_vm9 = vcmp.ge.f32.partialorder %v13480_v6, 0.0  ;;  %v10035_v22 = vmul.f32 0.2, %v13480_v6  ;;  %v13338_v37 = vpop.f32.mrb[34].mxu0 }
 0x713   : > { %v10068_v8 = vsel %vm10004_vm8, %v13479_v52, %v10036_v43  ;;  %v13481_v53 = vadd.f32 %v13338_v37, %v17137_v49  ;;  %v9822_v27 = vpop.f32.mrb[35].mxu0 }
 0x714   : > { %v10100_v14 = vadd.f32 %v17579_v19, %v10068_v8  ;;  %v10067_v39 = vsel %vm10003_vm9, %v13480_v6, %v10035_v22  ;;  %v13482_v32 = vadd.f32 %v17137_v49, %v9822_v27  ;;  %v17589_v8 = vld [vmem:[#allocation17_spill] sm:$0xff] }
 0x715   : > { %v10099_v1 = vadd.f32 %v17580_v10, %v10067_v39  ;;  %vm10006_vm10 = vcmp.ge.f32.partialorder %v13481_v53, 0.0  ;;  %v10038_v47 = vmul.f32 0.2, %v13481_v53 }
 0x716   : > { %10132 = vst.msk [vmem:[%s17146_s11 + $0x8] sm:$0xff] %vm6402_vm4, %v10100_v14  ;;  %vm10005_vm11 = vcmp.ge.f32.partialorder %v13482_v32, 0.0  ;;  %v10037_v7 = vmul.f32 0.2, %v13482_v32  ;;  %v13341_v44 = vpop.f32.mrb[36].mxu0  ;;  %v17590_v14 = vld [vmem:[#allocation18_spill] sm:$0xff] }
 0x717   : > { %10131 = vst.msk [vmem:[%s17146_s11] sm:$0xff] %vm6402_vm4, %v10099_v1  ;;  %v10070_v11 = vsel %vm10006_vm10, %v13481_v53, %v10038_v47  ;;  %v13483_v57 = vadd.f32 %v13341_v44, %v17137_v49  ;;  %v9832_v4 = vpop.f32.mrb[37].mxu0 }
 0x718   : > { %v10102_v26 = vadd.f32 %v17581_v15, %v10070_v11  ;;  %v10069_v28 = vsel %vm10005_vm11, %v13482_v32, %v10037_v7  ;;  %v13484_v29 = vadd.f32 %v17137_v49, %v9832_v4  ;;  %v17591_v11 = vld [vmem:[#allocation19_spill] sm:$0xff] }
 0x719   : > { %v10101_v0 = vadd.f32 %v17582_v31, %v10069_v28  ;;  %vm10008_vm12 = vcmp.ge.f32.partialorder %v13483_v57, 0.0  ;;  %v10040_v30 = vmul.f32 0.2, %v13483_v57 }
 0x71a   : > { %10134 = vst.msk [vmem:[%s17146_s11 + $0x18] sm:$0xff] %vm6402_vm4, %v10102_v26  ;;  %vm10007_vm13 = vcmp.ge.f32.partialorder %v13484_v29, 0.0  ;;  %v10039_v5 = vmul.f32 0.2, %v13484_v29  ;;  %v13344_v61 = vpop.f32.mrb[38].mxu0  ;;  %v17592_v26 = vld [vmem:[#allocation20_spill] sm:$0xff] }
 0x71b   : > { %10133 = vst.msk [vmem:[%s17146_s11 + $0x10] sm:$0xff] %vm6402_vm4, %v10101_v0  ;;  %v10072_v23 = vsel %vm10008_vm12, %v13483_v57, %v10040_v30  ;;  %v13485_v50 = vadd.f32 %v13344_v61, %v17137_v49  ;;  %v9842_v18 = vpop.f32.mrb[39].mxu0 }
 0x71c   : > { %v10104_v9 = vadd.f32 %v17583_v58, %v10072_v23  ;;  %v10071_v35 = vsel %vm10007_vm13, %v13484_v29, %v10039_v5  ;;  %v13486_v38 = vadd.f32 %v17137_v49, %v9842_v18  ;;  %v17593_v23 = vld [vmem:[#allocation21_spill] sm:$0xff] }
 0x71d   : > { %v10103_v51 = vadd.f32 %v17584_v56, %v10071_v35  ;;  %vm10010_vm14 = vcmp.ge.f32.partialorder %v13485_v50, 0.0  ;;  %v10042_v25 = vmul.f32 0.2, %v13485_v50 }
 0x71e   : > { %10136 = vst.msk [vmem:[%s17146_s11 + $0x28] sm:$0xff] %vm6402_vm4, %v10104_v9  ;;  %vm10009_vm15 = vcmp.ge.f32.partialorder %v13486_v38, 0.0  ;;  %v10041_v17 = vmul.f32 0.2, %v13486_v38  ;;  %v13347_v3 = vpop.f32.mrb[40].mxu0  ;;  %v17594_v9 = vld [vmem:[#allocation4_spill] sm:$0xff] }
 0x71f   : > { %10135 = vst.msk [vmem:[%s17146_s11 + $0x20] sm:$0xff] %vm6402_vm4, %v10103_v51  ;;  %v10074_v41 = vsel %vm10010_vm14, %v13485_v50, %v10042_v25  ;;  %v13487_v40 = vadd.f32 %v13347_v3, %v17137_v49  ;;  %v9852_v55 = vpop.f32.mrb[41].mxu0 }
 0x720   : > { %v10106_v62 = vadd.f32 %v17585_v63, %v10074_v41  ;;  %v10073_v45 = vsel %vm10009_vm15, %v13486_v38, %v10041_v17  ;;  %v13488_v24 = vadd.f32 %v17137_v49, %v9852_v55  ;;  %v17595_v41 = vld [vmem:[#allocation33_spill] sm:$0xff] }
 0x721   : > { %v10105_v13 = vadd.f32 %v17586_v54, %v10073_v45  ;;  %vm10012_vm0 = vcmp.ge.f32.partialorder %v13487_v40, 0.0  ;;  %v10044_v33 = vmul.f32 0.2, %v13487_v40 }
 0x722   : > { %10138 = vst.msk [vmem:[%s17146_s11 + $0x38] sm:$0xff] %vm6402_vm4, %v10106_v62  ;;  %vm10011_vm1 = vcmp.ge.f32.partialorder %v13488_v24, 0.0  ;;  %v10043_v48 = vmul.f32 0.2, %v13488_v24  ;;  %v13350_v60 = vpop.f32.mrb[42].mxu0  ;;  %v17596_v62 = vld [vmem:[#allocation34_spill] sm:$0xff] }
 0x723   : > { %10137 = vst.msk [vmem:[%s17146_s11 + $0x30] sm:$0xff] %vm6402_vm4, %v10105_v13  ;;  %v10076_v59 = vsel %vm10012_vm0, %v13487_v40, %v10044_v33  ;;  %v13489_v12 = vadd.f32 %v13350_v60, %v17137_v49  ;;  %v9862_v2 = vpop.f32.mrb[43].mxu0 }
 0x724   : > { %v10108_v20 = vadd.f32 %v17587_v34, %v10076_v59  ;;  %v10075_v16 = vsel %vm10011_vm1, %v13488_v24, %v10043_v48  ;;  %v13490_v36 = vadd.f32 %v17137_v49, %v9862_v2  ;;  %v17597_v59 = vld [vmem:[#allocation35_spill] sm:$0xff] }
 0x725   : > { %v10107_v21 = vadd.f32 %v17588_v46, %v10075_v16  ;;  %vm10014_vm2 = vcmp.ge.f32.partialorder %v13489_v12, 0.0  ;;  %v10046_v52 = vmul.f32 0.2, %v13489_v12 }
 0x726   : > { %10140 = vst.msk [vmem:[%s17146_s11 + $0x48] sm:$0xff] %vm6402_vm4, %v10108_v20  ;;  %vm10013_vm3 = vcmp.ge.f32.partialorder %v13490_v36, 0.0  ;;  %v10045_v42 = vmul.f32 0.2, %v13490_v36  ;;  %v13353_v6 = vpop.f32.mrb[44].mxu0  ;;  %v17598_v20 = vld [vmem:[#allocation36_spill] sm:$0xff] }
 0x727   : > { %10139 = vst.msk [vmem:[%s17146_s11 + $0x40] sm:$0xff] %vm6402_vm4, %v10107_v21  ;;  %v10078_v43 = vsel %vm10014_vm2, %v13489_v12, %v10046_v52  ;;  %v13491_v22 = vadd.f32 %v13353_v6, %v17137_v49  ;;  %v9872_v37 = vpop.f32.mrb[45].mxu0 }
 0x728   : > { %v10110_v53 = vadd.f32 %v17589_v8, %v10078_v43  ;;  %v10077_v27 = vsel %vm10013_vm3, %v13490_v36, %v10045_v42  ;;  %v13492_v19 = vadd.f32 %v17137_v49, %v9872_v37  ;;  %v17599_v43 = vld [vmem:[#allocation37_spill] sm:$0xff] }
 0x729   : > { %v10109_v39 = vadd.f32 %v17590_v14, %v10077_v27  ;;  %vm10016_vm5 = vcmp.ge.f32.partialorder %v13491_v22, 0.0  ;;  %v10048_v32 = vmul.f32 0.2, %v13491_v22 }
 0x72a   : > { %10142 = vst.msk [vmem:[%s17146_s11 + $0x58] sm:$0xff] %vm6402_vm4, %v10110_v53  ;;  %vm10015_vm6 = vcmp.ge.f32.partialorder %v13492_v19, 0.0  ;;  %v10047_v10 = vmul.f32 0.2, %v13492_v19  ;;  %v13356_v1 = vpop.f32.mrb[46].mxu0  ;;  %v17600_v53 = vld [vmem:[#allocation38_spill] sm:$0xff] }
 0x72b   : > { %10141 = vst.msk [vmem:[%s17146_s11 + $0x50] sm:$0xff] %vm6402_vm4, %v10109_v39  ;;  %v10080_v47 = vsel %vm10016_vm5, %v13491_v22, %v10048_v32  ;;  %v13493_v7 = vadd.f32 %v13356_v1, %v17137_v49  ;;  %v9882_v44 = vpop.f32.mrb[47].mxu0 }
 0x72c   : > { %v10112_v57 = vadd.f32 %v17591_v11, %v10080_v47  ;;  %v10079_v4 = vsel %vm10015_vm6, %v13492_v19, %v10047_v10  ;;  %v13494_v15 = vadd.f32 %v17137_v49, %v9882_v44  ;;  %v17601_v47 = vld [vmem:[#allocation39_spill] sm:$0xff] }
 0x72d   : > { %v10111_v28 = vadd.f32 %v17592_v26, %v10079_v4  ;;  %vm10018_vm7 = vcmp.ge.f32.partialorder %v13493_v7, 0.0  ;;  %v10050_v29 = vmul.f32 0.2, %v13493_v7 }
 0x72e   : > { %10144 = vst.msk [vmem:[%s17146_s11 + $0x68] sm:$0xff] %vm6402_vm4, %v10112_v57  ;;  %vm10017_vm8 = vcmp.ge.f32.partialorder %v13494_v15, 0.0  ;;  %v10049_v31 = vmul.f32 0.2, %v13494_v15  ;;  %v13359_v0 = vpop.f32.mrb[48].mxu0  ;;  %v17602_v57 = vld [vmem:[#allocation40_spill] sm:$0xff] }
 0x72f   : > { %10143 = vst.msk [vmem:[%s17146_s11 + $0x60] sm:$0xff] %vm6402_vm4, %v10111_v28  ;;  %v10082_v30 = vsel %vm10018_vm7, %v13493_v7, %v10050_v29  ;;  %v13495_v5 = vadd.f32 %v13359_v0, %v17137_v49  ;;  %v9892_v61 = vpop.f32.mrb[49].mxu0 }
 0x730   : > { %v10114_v50 = vadd.f32 %v17593_v23, %v10082_v30  ;;  %v10081_v18 = vsel %vm10017_vm8, %v13494_v15, %v10049_v31  ;;  %v13496_v58 = vadd.f32 %v17137_v49, %v9892_v61  ;;  %v17603_v30 = vld [vmem:[#allocation41_spill] sm:$0xff] }
 0x731   : > { %v10113_v35 = vadd.f32 %v17594_v9, %v10081_v18  ;;  %vm10020_vm9 = vcmp.ge.f32.partialorder %v13495_v5, 0.0  ;;  %v10052_v38 = vmul.f32 0.2, %v13495_v5 }
 0x732   : > { %10146 = vst.msk [vmem:[%s17146_s11 + $0x78] sm:$0xff] %vm6402_vm4, %v10114_v50  ;;  %vm10019_vm10 = vcmp.ge.f32.partialorder %v13496_v58, 0.0  ;;  %v10051_v56 = vmul.f32 0.2, %v13496_v58  ;;  %v13362_v51 = vpop.f32.mrb[50].mxu0  ;;  %v17604_v50 = vld [vmem:[#allocation42_spill] sm:$0xff] }
 0x733   : > { %10145 = vst.msk [vmem:[%s17146_s11 + $0x70] sm:$0xff] %vm6402_vm4, %v10113_v35  ;;  %v10084_v25 = vsel %vm10020_vm9, %v13495_v5, %v10052_v38  ;;  %v13497_v17 = vadd.f32 %v13362_v51, %v17137_v49  ;;  %v9902_v3 = vpop.f32.mrb[51].mxu0 }
 0x734   : > { %v10116_v40 = vadd.f32 %v17595_v41, %v10084_v25  ;;  %v10083_v55 = vsel %vm10019_vm10, %v13496_v58, %v10051_v56  ;;  %v13498_v63 = vadd.f32 %v17137_v49, %v9902_v3  ;;  %v17605_v25 = vld [vmem:[#allocation43_spill] sm:$0xff] }
 0x735   : > { %v10115_v45 = vadd.f32 %v17596_v62, %v10083_v55  ;;  %vm10022_vm11 = vcmp.ge.f32.partialorder %v13497_v17, 0.0  ;;  %v10054_v24 = vmul.f32 0.2, %v13497_v17 }
 0x736   : > { %10148 = vst.msk [vmem:[%s17146_s11 + $0x88] sm:$0xff] %vm6402_vm4, %v10116_v40  ;;  %vm10021_vm12 = vcmp.ge.f32.partialorder %v13498_v63, 0.0  ;;  %v10053_v54 = vmul.f32 0.2, %v13498_v63  ;;  %v13365_v13 = vpop.f32.mrb[52].mxu0  ;;  %v17606_v40 = vld [vmem:[#allocation44_spill] sm:$0xff] }
 0x737   : > { %10147 = vst.msk [vmem:[%s17146_s11 + $0x80] sm:$0xff] %vm6402_vm4, %v10115_v45  ;;  %v10086_v33 = vsel %vm10022_vm11, %v13497_v17, %v10054_v24  ;;  %v13499_v48 = vadd.f32 %v13365_v13, %v17137_v49  ;;  %v9912_v60 = vpop.f32.mrb[53].mxu0 }
 0x738   : > { %v10118_v12 = vadd.f32 %v17597_v59, %v10086_v33  ;;  %v10085_v2 = vsel %vm10021_vm12, %v13498_v63, %v10053_v54  ;;  %v13500_v34 = vadd.f32 %v17137_v49, %v9912_v60  ;;  %v17607_v33 = vld [vmem:[#allocation45_spill] sm:$0xff] }
 0x739   : > { %v10117_v16 = vadd.f32 %v17598_v20, %v10085_v2  ;;  %vm10024_vm13 = vcmp.ge.f32.partialorder %v13499_v48, 0.0  ;;  %v10056_v36 = vmul.f32 0.2, %v13499_v48 }
 0x73a   : > { %10150 = vst.msk [vmem:[%s17146_s11 + $0x98] sm:$0xff] %vm6402_vm4, %v10118_v12  ;;  %vm10023_vm14 = vcmp.ge.f32.partialorder %v13500_v34, 0.0  ;;  %v10055_v46 = vmul.f32 0.2, %v13500_v34  ;;  %v13368_v21 = vpop.f32.mrb[54].mxu0  ;;  %v17608_v12 = vld [vmem:[#allocation46_spill] sm:$0xff] }
 0x73b   : > { %10149 = vst.msk [vmem:[%s17146_s11 + $0x90] sm:$0xff] %vm6402_vm4, %v10117_v16  ;;  %v10088_v52 = vsel %vm10024_vm13, %v13499_v48, %v10056_v36  ;;  %v13501_v42 = vadd.f32 %v13368_v21, %v17137_v49  ;;  %v9922_v6 = vpop.f32.mrb[55].mxu0  ;;  %v17609_v36 = vld [vmem:[#allocation47_spill] sm:$0xff] }
 0x73c   : > { %v10120_v22 = vadd.f32 %v17599_v43, %v10088_v52  ;;  %v10087_v37 = vsel %vm10023_vm14, %v13500_v34, %v10055_v46  ;;  %v13502_v8 = vadd.f32 %v17137_v49, %v9922_v6  ;;  %v17610_v52 = vld [vmem:[#allocation48_spill] sm:$0xff] }
 0x73d   : > { %v10119_v27 = vadd.f32 %v17600_v53, %v10087_v37  ;;  %vm10026_vm15 = vcmp.ge.f32.partialorder %v13501_v42, 0.0  ;;  %v10058_v19 = vmul.f32 0.2, %v13501_v42 }
 0x73e   : > { %10152 = vst.msk [vmem:[%s17146_s11 + $0xa8] sm:$0xff] %vm6402_vm4, %v10120_v22  ;;  %vm10025_vm0 = vcmp.ge.f32.partialorder %v13502_v8, 0.0  ;;  %v10057_v14 = vmul.f32 0.2, %v13502_v8  ;;  %v13371_v39 = vpop.f32.mrb[56].mxu0 }
 0x73f   : > { %10151 = vst.msk [vmem:[%s17146_s11 + $0xa0] sm:$0xff] %vm6402_vm4, %v10119_v27  ;;  %v10090_v32 = vsel %vm10026_vm15, %v13501_v42, %v10058_v19  ;;  %v13503_v10 = vadd.f32 %v13371_v39, %v17137_v49  ;;  %v9932_v1 = vpop.f32.mrb[57].mxu0 }
 0x740   : > { %v10122_v7 = vadd.f32 %v17601_v47, %v10090_v32  ;;  %v10089_v44 = vsel %vm10025_vm0, %v13502_v8, %v10057_v14  ;;  %v13504_v11 = vadd.f32 %v17137_v49, %v9932_v1 }
 0x741   : > { %v10121_v4 = vadd.f32 %v17602_v57, %v10089_v44  ;;  %vm10028_vm1 = vcmp.ge.f32.partialorder %v13503_v10, 0.0  ;;  %v10060_v15 = vmul.f32 0.2, %v13503_v10 }
 0x742   : > { %10154 = vst.msk [vmem:[%s17146_s11 + $0xb8] sm:$0xff] %vm6402_vm4, %v10122_v7  ;;  %vm10027_vm2 = vcmp.ge.f32.partialorder %v13504_v11, 0.0  ;;  %v10059_v26 = vmul.f32 0.2, %v13504_v11  ;;  %v13374_v28 = vpop.f32.mrb[58].mxu0 }
 0x743   : > { %10153 = vst.msk [vmem:[%s17146_s11 + $0xb0] sm:$0xff] %vm6402_vm4, %v10121_v4  ;;  %v10092_v29 = vsel %vm10028_vm1, %v13503_v10, %v10060_v15  ;;  %v13505_v31 = vadd.f32 %v13374_v28, %v17137_v49  ;;  %v9942_v0 = vpop.f32.mrb[59].mxu0 }
 0x744   : > { %v10124_v5 = vadd.f32 %v17603_v30, %v10092_v29  ;;  %v10091_v61 = vsel %vm10027_vm2, %v13504_v11, %v10059_v26  ;;  %v13506_v23 = vadd.f32 %v17137_v49, %v9942_v0 }
 0x745   : > { %v10123_v18 = vadd.f32 %v17604_v50, %v10091_v61  ;;  %vm10030_vm3 = vcmp.ge.f32.partialorder %v13505_v31, 0.0  ;;  %v10062_v58 = vmul.f32 0.2, %v13505_v31 }
 0x746   : > { %10156 = vst.msk [vmem:[%s17146_s11 + $0xc8] sm:$0xff] %vm6402_vm4, %v10124_v5  ;;  %vm10029_vm5 = vcmp.ge.f32.partialorder %v13506_v23, 0.0  ;;  %v10061_v9 = vmul.f32 0.2, %v13506_v23  ;;  %v13377_v35 = vpop.f32.mrb[60].mxu0 }
 0x747   : > { %10155 = vst.msk [vmem:[%s17146_s11 + $0xc0] sm:$0xff] %vm6402_vm4, %v10123_v18  ;;  %v10094_v38 = vsel %vm10030_vm3, %v13505_v31, %v10062_v58  ;;  %v13507_v56 = vadd.f32 %v13377_v35, %v17137_v49  ;;  %v9952_v51 = vpop.f32.mrb[61].mxu0 }
 0x748   : > { %v10126_v17 = vadd.f32 %v17605_v25, %v10094_v38  ;;  %v10093_v3 = vsel %vm10029_vm5, %v13506_v23, %v10061_v9  ;;  %v13508_v41 = vadd.f32 %v17137_v49, %v9952_v51 }
 0x749   : > { %v10125_v55 = vadd.f32 %v17606_v40, %v10093_v3  ;;  %vm10032_vm6 = vcmp.ge.f32.partialorder %v13507_v56, 0.0  ;;  %v10064_v63 = vmul.f32 0.2, %v13507_v56 }
 0x74a   : > { %10158 = vst.msk [vmem:[%s17146_s11 + $0xd8] sm:$0xff] %vm6402_vm4, %v10126_v17  ;;  %vm10031_vm7 = vcmp.ge.f32.partialorder %v13508_v41, 0.0  ;;  %v10063_v62 = vmul.f32 0.2, %v13508_v41  ;;  %v13380_v45 = vpop.f32.mrb[62].mxu0 }
 0x74b   : > { %10157 = vst.msk [vmem:[%s17146_s11 + $0xd0] sm:$0xff] %vm6402_vm4, %v10125_v55  ;;  %v10096_v24 = vsel %vm10032_vm6, %v13507_v56, %v10064_v63  ;;  %v13509_v54 = vadd.f32 %v13380_v45, %v17137_v49  ;;  %v9962_v13 = vpop.f32.mrb[63].mxu0 }
 0x74c   : > { %v10128_v48 = vadd.f32 %v17607_v33, %v10096_v24  ;;  %v10095_v60 = vsel %vm10031_vm7, %v13508_v41, %v10063_v62  ;;  %v13510_v59 = vadd.f32 %v17137_v49, %v9962_v13 }
 0x74d   : > { %v10127_v2 = vadd.f32 %v17608_v12, %v10095_v60  ;;  %vm10034_vm8 = vcmp.ge.f32.partialorder %v13509_v54, 0.0  ;;  %v10066_v34 = vmul.f32 0.2, %v13509_v54 }
 0x74e   : > { %10160 = vst.msk [vmem:[%s17146_s11 + $0xe8] sm:$0xff] %vm6402_vm4, %v10128_v48  ;;  %vm10033_vm9 = vcmp.ge.f32.partialorder %v13510_v59, 0.0  ;;  %v10065_v20 = vmul.f32 0.2, %v13510_v59 }
 0x74f   : > { %10159 = vst.msk [vmem:[%s17146_s11 + $0xe0] sm:$0xff] %vm6402_vm4, %v10127_v2  ;;  %v10098_v16 = vsel %vm10034_vm8, %v13509_v54, %v10066_v34 }
 0x750   : > { %v10130_v46 = vadd.f32 %v17609_v36, %v10098_v16  ;;  %v10097_v21 = vsel %vm10033_vm9, %v13510_v59, %v10065_v20 }
 0x751   : > { %v10129_v42 = vadd.f32 %v17610_v52, %v10097_v21 }
 0x752   : > { %10162 = vst.msk [vmem:[%s17146_s11 + $0xf8] sm:$0xff] %vm6402_vm4, %v10130_v46 }
 0x753   : > { %10161 = vst.msk [vmem:[%s17146_s11 + $0xf0] sm:$0xff] %vm6402_vm4, %v10129_v42 }
 0x754 PF: > { %s17_s24 = sadd.s32 1, %s14359_s24  }
 0x755   : > { %p14_p4 = scmp.ge.s32.totalorder %s17_s24, 4  }
 0x757   :  { %16 = sbr.rel (!%p14_p4) target bundleno = 1 (0x1), region = 108 }

</bundles_post_ra>
